<compile_context>
chip_gen: v5e
topology: v5e:2x2
jax: 0.10.0
libtpu: 0.0.40
codegen_flags: <defaults>
</compile_context>

<pallas_src>
import functools

import jax
import jax.numpy as jnp
from jax import lax
from jax.experimental import pallas as pl
from jax.experimental.pallas import tpu as pltpu


def _round_up(x, m):
    return (x + m - 1) // m * m


def _lstm_head_kernel(lens_ref, x_ref, wih_ref, whh_ref, b_ref,
                      w1_ref, b1_ref, w2_ref, b2_ref,
                      out_ref, gx_sc, *, seq_len, batch, hidden):
    T, B, H = seq_len, batch, hidden

    # ---- Hoisted input projection: one MXU-friendly (T*B, E) x (E, 4H)
    #      matmul covering every time step, done once outside the recurrence.
    gx_sc[...] = (jnp.dot(x_ref[...], wih_ref[...],
                          preferred_element_type=jnp.float32) + b_ref[...])

    lens = lens_ref[...]                                     # (B, 1) int32

    def step(t, carry):
        h, c = carry                                         # (B, H) f32 each
        row = pl.multiple_of(jnp.asarray(t, jnp.int32) * B, B)
        g_x = gx_sc[pl.ds(row, B), :]                        # (B, 4H) slab
        gates = g_x + jnp.dot(h, whh_ref[...],
                              preferred_element_type=jnp.float32)
        # PyTorch gate order i, f, g, o; every slice is 128-lane aligned.
        i_g = jax.nn.sigmoid(gates[:, 0 * H:1 * H])
        f_g = jax.nn.sigmoid(gates[:, 1 * H:2 * H])
        g_g = jnp.tanh(gates[:, 2 * H:3 * H])
        o_g = jax.nn.sigmoid(gates[:, 3 * H:4 * H])
        c_new = f_g * c + i_g * g_g
        h_new = o_g * jnp.tanh(c_new)
        # Mask reproduces pack_padded_sequence final-hidden semantics.
        mask = t < lens                                      # (B, 1) bool
        return (jnp.where(mask, h_new, h), jnp.where(mask, c_new, c))

    h0 = jnp.zeros((B, H), jnp.float32)
    c0 = jnp.zeros((B, H), jnp.float32)
    h_fin, _ = lax.fori_loop(0, T, step, (h0, c0),
                             unroll=True if T <= 16 else 8)

    # ---- Classification head (runs once, weights single-buffered in VMEM).
    z1 = jax.nn.sigmoid(jnp.dot(h_fin, w1_ref[...],
                                preferred_element_type=jnp.float32)
                        + b1_ref[...])                       # (B, 512)
    z2 = jax.nn.sigmoid(jnp.dot(z1, w2_ref[...],
                                preferred_element_type=jnp.float32)
                        + b2_ref[...])                       # (B, C_pad)
    out_ref[...] = z2.astype(out_ref.dtype)


def model_forward(seqs, seqs_lengths, params):
    """seqs: (T, B) int32 time-major; seqs_lengths: (B,) int32 (desc-sorted)."""
    # Embedding lookup is a gather (glue) -- done in plain JAX.
    emb = params["emb"][seqs].astype(jnp.float32)            # (T, B, E)
    T, B, E = emb.shape
    H = params["w_hh"].shape[1]                              # w_hh: (4H, H)
    C = params["w2"].shape[0]                                # w2:  (C, 512)
    F1 = params["w1"].shape[0]                               # 512

    B_pad = _round_up(max(B, 8), 8)                          # full sublanes
    H_pad = _round_up(max(H, 128), 128)                      # lane-aligned gates
    C_pad = _round_up(max(C, 128), 128)                      # lane-dense output
    G = 4 * H_pad

    # ---- Batch padding + time flattened into the sublane axis: (T*B_pad, E).
    x = jnp.zeros((T, B_pad, E), jnp.float32).at[:, :B, :].set(emb)
    x = x.reshape(T * B_pad, E)
    lens = jnp.zeros((B_pad, 1), jnp.int32).at[:B, 0].set(
        seqs_lengths.astype(jnp.int32))

    # ---- Lane-align each LSTM gate: gate k occupies columns
    #      [k*H_pad, k*H_pad + H); padded columns stay exactly zero.
    def pad_gate_rows(w):                                    # (4H, X) -> (4*H_pad, X)
        X = w.shape[-1]
        w4 = w.reshape(4, H, X)
        return (jnp.zeros((4, H_pad, X), jnp.float32)
                .at[:, :H, :].set(w4).reshape(4 * H_pad, X))

    wih_t = pad_gate_rows(params["w_ih"]).T                  # (E, 4*H_pad)
    whh_t = jnp.zeros((H_pad, G), jnp.float32).at[:H, :].set(
        pad_gate_rows(params["w_hh"]).T)                     # (H_pad, 4*H_pad)
    b4 = (params["b_ih"] + params["b_hh"]).reshape(4, H)
    b = jnp.zeros((4, H_pad), jnp.float32).at[:, :H].set(b4).reshape(1, G)

    w1_t = jnp.zeros((H_pad, F1), jnp.float32).at[:H, :].set(params["w1"].T)
    b1 = params["b1"].reshape(1, F1).astype(jnp.float32)
    w2_t = jnp.zeros((F1, C_pad), jnp.float32).at[:, :C].set(params["w2"].T)
    b2 = jnp.zeros((1, C_pad), jnp.float32).at[0, :C].set(params["b2"])

    kernel = functools.partial(_lstm_head_kernel,
                               seq_len=T, batch=B_pad, hidden=H_pad)

    vmem_spec = pl.BlockSpec(memory_space=pltpu.MemorySpace.VMEM)
    out = pl.pallas_call(
        kernel,
        out_shape=jax.ShapeDtypeStruct((B_pad, C_pad), jnp.float32),
        in_specs=[vmem_spec] * 9,
        out_specs=vmem_spec,
        scratch_shapes=[pltpu.VMEM((T * B_pad, G), jnp.float32)],
    )(lens, x, wih_t, whh_t, b, w1_t, b1, w2_t, b2)

    return out[:B, :C]


def reference_forward(seqs, seqs_lengths, params):
    """Pure-JAX reference replicating the PyTorch forward semantics."""
    emb = params["emb"][seqs]                                # (T, B, E)
    T, B, E = emb.shape
    H = params["w_hh"].shape[0] // 4
    h = jnp.zeros((B, H), jnp.float32)
    c = jnp.zeros((B, H), jnp.float32)

    def step(carry, inp):
        h, c = carry
        x_t, t = inp
        gates = (x_t @ params["w_ih"].T + h @ params["w_hh"].T
                 + params["b_ih"] + params["b_hh"])
        i_g = jax.nn.sigmoid(gates[:, 0 * H:1 * H])
        f_g = jax.nn.sigmoid(gates[:, 1 * H:2 * H])
        g_g = jnp.tanh(gates[:, 2 * H:3 * H])
        o_g = jax.nn.sigmoid(gates[:, 3 * H:4 * H])
        c_new = f_g * c + i_g * g_g
        h_new = o_g * jnp.tanh(c_new)
        mask = (t < seqs_lengths)[:, None]
        return (jnp.where(mask, h_new, h), jnp.where(mask, c_new, c)), None

    (h, c), _ = lax.scan(step, (h, c), (emb, jnp.arange(T)))
    z1 = jax.nn.sigmoid(h @ params["w1"].T + params["b1"])
    z2 = jax.nn.sigmoid(z1 @ params["w2"].T + params["b2"])
    return z2


def init_params(key, vocab_size, embedding_dim, lstm_hidden_dim, num_classes):
    ks = jax.random.split(key, 9)
    E, H, C = embedding_dim, lstm_hidden_dim, num_classes
    emb = jax.random.normal(ks[0], (vocab_size, E), jnp.float32) * 0.1
    emb = emb.at[0].set(0.0)  # padding_idx=0
    return {
        "emb": emb,
        "w_ih": jax.random.normal(ks[1], (4 * H, E), jnp.float32) * 0.1,
        "w_hh": jax.random.normal(ks[2], (4 * H, H), jnp.float32) * 0.1,
        "b_ih": jax.random.normal(ks[3], (4 * H,), jnp.float32) * 0.1,
        "b_hh": jax.random.normal(ks[4], (4 * H,), jnp.float32) * 0.1,
        "w1": jax.random.normal(ks[5], (512, H), jnp.float32) * 0.1,
        "b1": jax.random.normal(ks[6], (512,), jnp.float32) * 0.1,
        "w2": jax.random.normal(ks[7], (C, 512), jnp.float32) * 0.1,
        "b2": jax.random.normal(ks[8], (C,), jnp.float32) * 0.1,
    }


if __name__ == "__main__":
    VOCAB, E, H, C = 32, 16, 32, 8
    T, B = 8, 4

    key = jax.random.PRNGKey(0)
    kp, ks = jax.random.split(key)
    params = init_params(kp, VOCAB, E, H, C)

    # lengths sorted descending (pack_padded_sequence default enforce_sorted=True)
    seqs_lengths = jnp.array([8, 6, 4, 2], dtype=jnp.int32)
    seqs = jax.random.randint(ks, (T, B), 1, VOCAB, dtype=jnp.int32)
    # zero-pad beyond each sequence's length (padding token = 0)
    time_idx = jnp.arange(T)[:, None]
    seqs = jnp.where(time_idx < seqs_lengths[None, :], seqs, 0)

    out = model_forward(seqs, seqs_lengths, params)
    out = jax.block_until_ready(out)

    ref = reference_forward(seqs, seqs_lengths, params)
    assert out.shape == (B, C)
    assert jnp.allclose(out, ref, atol=1e-5, rtol=1e-5), (out, ref)
    print("KERNEL_OK")
</pallas_src>

<mosaic_0001>
module attributes {stable_mosaic.version = 11 : i64} {
  func.func @_lstm_head_kernel(%arg0: memref<8x1xi32, #tpu.memory_space<vmem>>, %arg1: memref<64x16xf32, #tpu.memory_space<vmem>>, %arg2: memref<16x512xf32, #tpu.memory_space<vmem>>, %arg3: memref<128x512xf32, #tpu.memory_space<vmem>>, %arg4: memref<1x512xf32, #tpu.memory_space<vmem>>, %arg5: memref<128x512xf32, #tpu.memory_space<vmem>>, %arg6: memref<1x512xf32, #tpu.memory_space<vmem>>, %arg7: memref<512x128xf32, #tpu.memory_space<vmem>>, %arg8: memref<1x128xf32, #tpu.memory_space<vmem>>, %arg9: memref<8x128xf32, #tpu.memory_space<vmem>>, %arg10: memref<64x512xf32, #tpu.memory_space<vmem>>) attributes {dimension_semantics = [], scalar_prefetch = 0 : i64, scratch_operands = 1 : i64, tpu.core_type = #tpu.core_type<tc>} {
    %c0 = arith.constant 0 : index
    %c0_0 = arith.constant 0 : index
    %0 = vector.load %arg1[%c0, %c0_0] : memref<64x16xf32, #tpu.memory_space<vmem>>, vector<64x16xf32>
    %c0_1 = arith.constant 0 : index
    %c0_2 = arith.constant 0 : index
    %1 = vector.load %arg2[%c0_1, %c0_2] : memref<16x512xf32, #tpu.memory_space<vmem>>, vector<16x512xf32>
    %cst = arith.constant dense<0.000000e+00> : vector<64x512xf32>
    %2 = tpu.matmul %0, %1, %cst {dimension_numbers = #tpu.dot_dimension_numbers<[1], [0], [0], [1], [0, 0, 1, 1], [], []>} : vector<64x16xf32>, vector<16x512xf32>, vector<64x512xf32> -> vector<64x512xf32>
    %c0_3 = arith.constant 0 : index
    %c0_4 = arith.constant 0 : index
    %3 = vector.load %arg4[%c0_3, %c0_4] : memref<1x512xf32, #tpu.memory_space<vmem>>, vector<1x512xf32>
    %4 = vector.broadcast %3 : vector<1x512xf32> to vector<64x512xf32>
    %5 = arith.addf %2, %4 : vector<64x512xf32>
    %c0_5 = arith.constant 0 : index
    %c0_6 = arith.constant 0 : index
    %6 = vector.load %arg10[%c0_5, %c0_6] : memref<64x512xf32, #tpu.memory_space<vmem>>, vector<64x512xf32>
    tpu.vector_store %arg10[%c0_5, %c0_6], %5 {strides = array<i32>} : memref<64x512xf32, #tpu.memory_space<vmem>>, vector<64x512xf32>,
    %c0_7 = arith.constant 0 : index
    %c0_8 = arith.constant 0 : index
    %7 = vector.load %arg0[%c0_7, %c0_8] : memref<8x1xi32, #tpu.memory_space<vmem>>, vector<8x1xi32>
    %cst_9 = arith.constant 0.000000e+00 : f32
    %8 = vector.broadcast %cst_9 : f32 to vector<8x128xf32>
    %cst_10 = arith.constant 0.000000e+00 : f32
    %9 = vector.broadcast %cst_10 : f32 to vector<8x128xf32>
    %c0_i32 = arith.constant 0 : i32
    %c8_i32 = arith.constant 8 : i32
    %10 = arith.muli %c0_i32, %c8_i32 : i32
    %11 = tpu.assume_multiple %10, 8 : i32
    %12 = arith.index_cast %11 : i32 to index
    %c0_11 = arith.constant 0 : index
    %13 = vector.load %arg10[%12, %c0_11] : memref<64x512xf32, #tpu.memory_space<vmem>>, vector<8x512xf32>
    %c0_12 = arith.constant 0 : index
    %c0_13 = arith.constant 0 : index
    %14 = vector.load %arg3[%c0_12, %c0_13] : memref<128x512xf32, #tpu.memory_space<vmem>>, vector<128x512xf32>
    %cst_14 = arith.constant dense<0.000000e+00> : vector<8x512xf32>
    %15 = tpu.matmul %8, %14, %cst_14 {dimension_numbers = #tpu.dot_dimension_numbers<[1], [0], [0], [1], [0, 0, 1, 1], [], []>} : vector<8x128xf32>, vector<128x512xf32>, vector<8x512xf32> -> vector<8x512xf32>
    %16 = arith.addf %13, %15 : vector<8x512xf32>
    %17 = vector.extract_strided_slice %16 {offsets = [0, 0], sizes = [8, 128], strides = [1, 1]} : vector<8x512xf32> to vector<8x128xf32>
    %18 = arith.negf %17 : vector<8x128xf32>
    %19 = math.exp %18 : vector<8x128xf32>
    %cst_15 = arith.constant 1.000000e+00 : f32
    %20 = vector.broadcast %cst_15 : f32 to vector<8x128xf32>
    %21 = arith.addf %20, %19 : vector<8x128xf32>
    %22 = arith.divf %20, %21 : vector<8x128xf32>
    %23 = vector.extract_strided_slice %16 {offsets = [0, 128], sizes = [8, 128], strides = [1, 1]} : vector<8x512xf32> to vector<8x128xf32>
    %24 = arith.negf %23 : vector<8x128xf32>
    %25 = math.exp %24 : vector<8x128xf32>
    %cst_16 = arith.constant 1.000000e+00 : f32
    %26 = vector.broadcast %cst_16 : f32 to vector<8x128xf32>
    %27 = arith.addf %26, %25 : vector<8x128xf32>
    %28 = arith.divf %26, %27 : vector<8x128xf32>
    %29 = vector.extract_strided_slice %16 {offsets = [0, 256], sizes = [8, 128], strides = [1, 1]} : vector<8x512xf32> to vector<8x128xf32>
    %30 = math.tanh %29 : vector<8x128xf32>
    %31 = vector.extract_strided_slice %16 {offsets = [0, 384], sizes = [8, 128], strides = [1, 1]} : vector<8x512xf32> to vector<8x128xf32>
    %32 = arith.negf %31 : vector<8x128xf32>
    %33 = math.exp %32 : vector<8x128xf32>
    %cst_17 = arith.constant 1.000000e+00 : f32
    %34 = vector.broadcast %cst_17 : f32 to vector<8x128xf32>
    %35 = arith.addf %34, %33 : vector<8x128xf32>
    %36 = arith.divf %34, %35 : vector<8x128xf32>
    %37 = arith.mulf %28, %9 : vector<8x128xf32>
    %38 = arith.mulf %22, %30 : vector<8x128xf32>
    %39 = arith.addf %37, %38 : vector<8x128xf32>
    %40 = math.tanh %39 : vector<8x128xf32>
    %41 = arith.mulf %36, %40 : vector<8x128xf32>
    %42 = vector.broadcast %c0_i32 : i32 to vector<8x1xi32>
    %43 = arith.cmpi slt, %42, %7 : vector<8x1xi32>
    %44 = vector.shape_cast %43 : vector<8x1xi1> to vector<8x1xi1>
    %45 = vector.broadcast %44 : vector<8x1xi1> to vector<8x128xi1>
    %46 = arith.select %45, %41, %8 : vector<8x128xi1>, vector<8x128xf32>
    %47 = vector.shape_cast %43 : vector<8x1xi1> to vector<8x1xi1>
    %48 = vector.broadcast %47 : vector<8x1xi1> to vector<8x128xi1>
    %49 = arith.select %48, %39, %9 : vector<8x128xi1>, vector<8x128xf32>
    %c1_i32 = arith.constant 1 : i32
    %c8_i32_18 = arith.constant 8 : i32
    %50 = arith.muli %c1_i32, %c8_i32_18 : i32
    %51 = tpu.assume_multiple %50, 8 : i32
    %52 = arith.index_cast %51 : i32 to index
    %c0_19 = arith.constant 0 : index
    %53 = vector.load %arg10[%52, %c0_19] : memref<64x512xf32, #tpu.memory_space<vmem>>, vector<8x512xf32>
    %c0_20 = arith.constant 0 : index
    %c0_21 = arith.constant 0 : index
    %54 = vector.load %arg3[%c0_20, %c0_21] : memref<128x512xf32, #tpu.memory_space<vmem>>, vector<128x512xf32>
    %cst_22 = arith.constant dense<0.000000e+00> : vector<8x512xf32>
    %55 = tpu.matmul %46, %54, %cst_22 {dimension_numbers = #tpu.dot_dimension_numbers<[1], [0], [0], [1], [0, 0, 1, 1], [], []>} : vector<8x128xf32>, vector<128x512xf32>, vector<8x512xf32> -> vector<8x512xf32>
    %56 = arith.addf %53, %55 : vector<8x512xf32>
    %57 = vector.extract_strided_slice %56 {offsets = [0, 0], sizes = [8, 128], strides = [1, 1]} : vector<8x512xf32> to vector<8x128xf32>
    %58 = arith.negf %57 : vector<8x128xf32>
    %59 = math.exp %58 : vector<8x128xf32>
    %cst_23 = arith.constant 1.000000e+00 : f32
    %60 = vector.broadcast %cst_23 : f32 to vector<8x128xf32>
    %61 = arith.addf %60, %59 : vector<8x128xf32>
    %62 = arith.divf %60, %61 : vector<8x128xf32>
    %63 = vector.extract_strided_slice %56 {offsets = [0, 128], sizes = [8, 128], strides = [1, 1]} : vector<8x512xf32> to vector<8x128xf32>
    %64 = arith.negf %63 : vector<8x128xf32>
    %65 = math.exp %64 : vector<8x128xf32>
    %cst_24 = arith.constant 1.000000e+00 : f32
    %66 = vector.broadcast %cst_24 : f32 to vector<8x128xf32>
    %67 = arith.addf %66, %65 : vector<8x128xf32>
    %68 = arith.divf %66, %67 : vector<8x128xf32>
    %69 = vector.extract_strided_slice %56 {offsets = [0, 256], sizes = [8, 128], strides = [1, 1]} : vector<8x512xf32> to vector<8x128xf32>
    %70 = math.tanh %69 : vector<8x128xf32>
    %71 = vector.extract_strided_slice %56 {offsets = [0, 384], sizes = [8, 128], strides = [1, 1]} : vector<8x512xf32> to vector<8x128xf32>
    %72 = arith.negf %71 : vector<8x128xf32>
    %73 = math.exp %72 : vector<8x128xf32>
    %cst_25 = arith.constant 1.000000e+00 : f32
    %74 = vector.broadcast %cst_25 : f32 to vector<8x128xf32>
    %75 = arith.addf %74, %73 : vector<8x128xf32>
    %76 = arith.divf %74, %75 : vector<8x128xf32>
    %77 = arith.mulf %68, %49 : vector<8x128xf32>
    %78 = arith.mulf %62, %70 : vector<8x128xf32>
    %79 = arith.addf %77, %78 : vector<8x128xf32>
    %80 = math.tanh %79 : vector<8x128xf32>
    %81 = arith.mulf %76, %80 : vector<8x128xf32>
    %82 = vector.broadcast %c1_i32 : i32 to vector<8x1xi32>
    %83 = arith.cmpi slt, %82, %7 : vector<8x1xi32>
    %84 = vector.shape_cast %83 : vector<8x1xi1> to vector<8x1xi1>
    %85 = vector.broadcast %84 : vector<8x1xi1> to vector<8x128xi1>
    %86 = arith.select %85, %81, %46 : vector<8x128xi1>, vector<8x128xf32>
    %87 = vector.shape_cast %83 : vector<8x1xi1> to vector<8x1xi1>
    %88 = vector.broadcast %87 : vector<8x1xi1> to vector<8x128xi1>
    %89 = arith.select %88, %79, %49 : vector<8x128xi1>, vector<8x128xf32>
    %c2_i32 = arith.constant 2 : i32
    %c8_i32_26 = arith.constant 8 : i32
    %90 = arith.muli %c2_i32, %c8_i32_26 : i32
    %91 = tpu.assume_multiple %90, 8 : i32
    %92 = arith.index_cast %91 : i32 to index
    %c0_27 = arith.constant 0 : index
    %93 = vector.load %arg10[%92, %c0_27] : memref<64x512xf32, #tpu.memory_space<vmem>>, vector<8x512xf32>
    %c0_28 = arith.constant 0 : index
    %c0_29 = arith.constant 0 : index
    %94 = vector.load %arg3[%c0_28, %c0_29] : memref<128x512xf32, #tpu.memory_space<vmem>>, vector<128x512xf32>
    %cst_30 = arith.constant dense<0.000000e+00> : vector<8x512xf32>
    %95 = tpu.matmul %86, %94, %cst_30 {dimension_numbers = #tpu.dot_dimension_numbers<[1], [0], [0], [1], [0, 0, 1, 1], [], []>} : vector<8x128xf32>, vector<128x512xf32>, vector<8x512xf32> -> vector<8x512xf32>
    %96 = arith.addf %93, %95 : vector<8x512xf32>
    %97 = vector.extract_strided_slice %96 {offsets = [0, 0], sizes = [8, 128], strides = [1, 1]} : vector<8x512xf32> to vector<8x128xf32>
    %98 = arith.negf %97 : vector<8x128xf32>
    %99 = math.exp %98 : vector<8x128xf32>
    %cst_31 = arith.constant 1.000000e+00 : f32
    %100 = vector.broadcast %cst_31 : f32 to vector<8x128xf32>
    %101 = arith.addf %100, %99 : vector<8x128xf32>
    %102 = arith.divf %100, %101 : vector<8x128xf32>
    %103 = vector.extract_strided_slice %96 {offsets = [0, 128], sizes = [8, 128], strides = [1, 1]} : vector<8x512xf32> to vector<8x128xf32>
    %104 = arith.negf %103 : vector<8x128xf32>
    %105 = math.exp %104 : vector<8x128xf32>
    %cst_32 = arith.constant 1.000000e+00 : f32
    %106 = vector.broadcast %cst_32 : f32 to vector<8x128xf32>
    %107 = arith.addf %106, %105 : vector<8x128xf32>
    %108 = arith.divf %106, %107 : vector<8x128xf32>
    %109 = vector.extract_strided_slice %96 {offsets = [0, 256], sizes = [8, 128], strides = [1, 1]} : vector<8x512xf32> to vector<8x128xf32>
    %110 = math.tanh %109 : vector<8x128xf32>
    %111 = vector.extract_strided_slice %96 {offsets = [0, 384], sizes = [8, 128], strides = [1, 1]} : vector<8x512xf32> to vector<8x128xf32>
    %112 = arith.negf %111 : vector<8x128xf32>
    %113 = math.exp %112 : vector<8x128xf32>
    %cst_33 = arith.constant 1.000000e+00 : f32
    %114 = vector.broadcast %cst_33 : f32 to vector<8x128xf32>
    %115 = arith.addf %114, %113 : vector<8x128xf32>
    %116 = arith.divf %114, %115 : vector<8x128xf32>
    %117 = arith.mulf %108, %89 : vector<8x128xf32>
    %118 = arith.mulf %102, %110 : vector<8x128xf32>
    %119 = arith.addf %117, %118 : vector<8x128xf32>
    %120 = math.tanh %119 : vector<8x128xf32>
    %121 = arith.mulf %116, %120 : vector<8x128xf32>
    %122 = vector.broadcast %c2_i32 : i32 to vector<8x1xi32>
    %123 = arith.cmpi slt, %122, %7 : vector<8x1xi32>
    %124 = vector.shape_cast %123 : vector<8x1xi1> to vector<8x1xi1>
    %125 = vector.broadcast %124 : vector<8x1xi1> to vector<8x128xi1>
    %126 = arith.select %125, %121, %86 : vector<8x128xi1>, vector<8x128xf32>
    %127 = vector.shape_cast %123 : vector<8x1xi1> to vector<8x1xi1>
    %128 = vector.broadcast %127 : vector<8x1xi1> to vector<8x128xi1>
    %129 = arith.select %128, %119, %89 : vector<8x128xi1>, vector<8x128xf32>
    %c3_i32 = arith.constant 3 : i32
    %c8_i32_34 = arith.constant 8 : i32
    %130 = arith.muli %c3_i32, %c8_i32_34 : i32
    %131 = tpu.assume_multiple %130, 8 : i32
    %132 = arith.index_cast %131 : i32 to index
    %c0_35 = arith.constant 0 : index
    %133 = vector.load %arg10[%132, %c0_35] : memref<64x512xf32, #tpu.memory_space<vmem>>, vector<8x512xf32>
    %c0_36 = arith.constant 0 : index
    %c0_37 = arith.constant 0 : index
    %134 = vector.load %arg3[%c0_36, %c0_37] : memref<128x512xf32, #tpu.memory_space<vmem>>, vector<128x512xf32>
    %cst_38 = arith.constant dense<0.000000e+00> : vector<8x512xf32>
    %135 = tpu.matmul %126, %134, %cst_38 {dimension_numbers = #tpu.dot_dimension_numbers<[1], [0], [0], [1], [0, 0, 1, 1], [], []>} : vector<8x128xf32>, vector<128x512xf32>, vector<8x512xf32> -> vector<8x512xf32>
    %136 = arith.addf %133, %135 : vector<8x512xf32>
    %137 = vector.extract_strided_slice %136 {offsets = [0, 0], sizes = [8, 128], strides = [1, 1]} : vector<8x512xf32> to vector<8x128xf32>
    %138 = arith.negf %137 : vector<8x128xf32>
    %139 = math.exp %138 : vector<8x128xf32>
    %cst_39 = arith.constant 1.000000e+00 : f32
    %140 = vector.broadcast %cst_39 : f32 to vector<8x128xf32>
    %141 = arith.addf %140, %139 : vector<8x128xf32>
    %142 = arith.divf %140, %141 : vector<8x128xf32>
    %143 = vector.extract_strided_slice %136 {offsets = [0, 128], sizes = [8, 128], strides = [1, 1]} : vector<8x512xf32> to vector<8x128xf32>
    %144 = arith.negf %143 : vector<8x128xf32>
    %145 = math.exp %144 : vector<8x128xf32>
    %cst_40 = arith.constant 1.000000e+00 : f32
    %146 = vector.broadcast %cst_40 : f32 to vector<8x128xf32>
    %147 = arith.addf %146, %145 : vector<8x128xf32>
    %148 = arith.divf %146, %147 : vector<8x128xf32>
    %149 = vector.extract_strided_slice %136 {offsets = [0, 256], sizes = [8, 128], strides = [1, 1]} : vector<8x512xf32> to vector<8x128xf32>
    %150 = math.tanh %149 : vector<8x128xf32>
    %151 = vector.extract_strided_slice %136 {offsets = [0, 384], sizes = [8, 128], strides = [1, 1]} : vector<8x512xf32> to vector<8x128xf32>
    %152 = arith.negf %151 : vector<8x128xf32>
    %153 = math.exp %152 : vector<8x128xf32>
    %cst_41 = arith.constant 1.000000e+00 : f32
    %154 = vector.broadcast %cst_41 : f32 to vector<8x128xf32>
    %155 = arith.addf %154, %153 : vector<8x128xf32>
    %156 = arith.divf %154, %155 : vector<8x128xf32>
    %157 = arith.mulf %148, %129 : vector<8x128xf32>
    %158 = arith.mulf %142, %150 : vector<8x128xf32>
    %159 = arith.addf %157, %158 : vector<8x128xf32>
    %160 = math.tanh %159 : vector<8x128xf32>
    %161 = arith.mulf %156, %160 : vector<8x128xf32>
    %162 = vector.broadcast %c3_i32 : i32 to vector<8x1xi32>
    %163 = arith.cmpi slt, %162, %7 : vector<8x1xi32>
    %164 = vector.shape_cast %163 : vector<8x1xi1> to vector<8x1xi1>
    %165 = vector.broadcast %164 : vector<8x1xi1> to vector<8x128xi1>
    %166 = arith.select %165, %161, %126 : vector<8x128xi1>, vector<8x128xf32>
    %167 = vector.shape_cast %163 : vector<8x1xi1> to vector<8x1xi1>
    %168 = vector.broadcast %167 : vector<8x1xi1> to vector<8x128xi1>
    %169 = arith.select %168, %159, %129 : vector<8x128xi1>, vector<8x128xf32>
    %c4_i32 = arith.constant 4 : i32
    %c8_i32_42 = arith.constant 8 : i32
    %170 = arith.muli %c4_i32, %c8_i32_42 : i32
    %171 = tpu.assume_multiple %170, 8 : i32
    %172 = arith.index_cast %171 : i32 to index
    %c0_43 = arith.constant 0 : index
    %173 = vector.load %arg10[%172, %c0_43] : memref<64x512xf32, #tpu.memory_space<vmem>>, vector<8x512xf32>
    %c0_44 = arith.constant 0 : index
    %c0_45 = arith.constant 0 : index
    %174 = vector.load %arg3[%c0_44, %c0_45] : memref<128x512xf32, #tpu.memory_space<vmem>>, vector<128x512xf32>
    %cst_46 = arith.constant dense<0.000000e+00> : vector<8x512xf32>
    %175 = tpu.matmul %166, %174, %cst_46 {dimension_numbers = #tpu.dot_dimension_numbers<[1], [0], [0], [1], [0, 0, 1, 1], [], []>} : vector<8x128xf32>, vector<128x512xf32>, vector<8x512xf32> -> vector<8x512xf32>
    %176 = arith.addf %173, %175 : vector<8x512xf32>
    %177 = vector.extract_strided_slice %176 {offsets = [0, 0], sizes = [8, 128], strides = [1, 1]} : vector<8x512xf32> to vector<8x128xf32>
    %178 = arith.negf %177 : vector<8x128xf32>
    %179 = math.exp %178 : vector<8x128xf32>
    %cst_47 = arith.constant 1.000000e+00 : f32
    %180 = vector.broadcast %cst_47 : f32 to vector<8x128xf32>
    %181 = arith.addf %180, %179 : vector<8x128xf32>
    %182 = arith.divf %180, %181 : vector<8x128xf32>
    %183 = vector.extract_strided_slice %176 {offsets = [0, 128], sizes = [8, 128], strides = [1, 1]} : vector<8x512xf32> to vector<8x128xf32>
    %184 = arith.negf %183 : vector<8x128xf32>
    %185 = math.exp %184 : vector<8x128xf32>
    %cst_48 = arith.constant 1.000000e+00 : f32
    %186 = vector.broadcast %cst_48 : f32 to vector<8x128xf32>
    %187 = arith.addf %186, %185 : vector<8x128xf32>
    %188 = arith.divf %186, %187 : vector<8x128xf32>
    %189 = vector.extract_strided_slice %176 {offsets = [0, 256], sizes = [8, 128], strides = [1, 1]} : vector<8x512xf32> to vector<8x128xf32>
    %190 = math.tanh %189 : vector<8x128xf32>
    %191 = vector.extract_strided_slice %176 {offsets = [0, 384], sizes = [8, 128], strides = [1, 1]} : vector<8x512xf32> to vector<8x128xf32>
    %192 = arith.negf %191 : vector<8x128xf32>
    %193 = math.exp %192 : vector<8x128xf32>
    %cst_49 = arith.constant 1.000000e+00 : f32
    %194 = vector.broadcast %cst_49 : f32 to vector<8x128xf32>
    %195 = arith.addf %194, %193 : vector<8x128xf32>
    %196 = arith.divf %194, %195 : vector<8x128xf32>
    %197 = arith.mulf %188, %169 : vector<8x128xf32>
    %198 = arith.mulf %182, %190 : vector<8x128xf32>
    %199 = arith.addf %197, %198 : vector<8x128xf32>
    %200 = math.tanh %199 : vector<8x128xf32>
    %201 = arith.mulf %196, %200 : vector<8x128xf32>
    %202 = vector.broadcast %c4_i32 : i32 to vector<8x1xi32>
    %203 = arith.cmpi slt, %202, %7 : vector<8x1xi32>
    %204 = vector.shape_cast %203 : vector<8x1xi1> to vector<8x1xi1>
    %205 = vector.broadcast %204 : vector<8x1xi1> to vector<8x128xi1>
    %206 = arith.select %205, %201, %166 : vector<8x128xi1>, vector<8x128xf32>
    %207 = vector.shape_cast %203 : vector<8x1xi1> to vector<8x1xi1>
    %208 = vector.broadcast %207 : vector<8x1xi1> to vector<8x128xi1>
    %209 = arith.select %208, %199, %169 : vector<8x128xi1>, vector<8x128xf32>
    %c5_i32 = arith.constant 5 : i32
    %c8_i32_50 = arith.constant 8 : i32
    %210 = arith.muli %c5_i32, %c8_i32_50 : i32
    %211 = tpu.assume_multiple %210, 8 : i32
    %212 = arith.index_cast %211 : i32 to index
    %c0_51 = arith.constant 0 : index
    %213 = vector.load %arg10[%212, %c0_51] : memref<64x512xf32, #tpu.memory_space<vmem>>, vector<8x512xf32>
    %c0_52 = arith.constant 0 : index
    %c0_53 = arith.constant 0 : index
    %214 = vector.load %arg3[%c0_52, %c0_53] : memref<128x512xf32, #tpu.memory_space<vmem>>, vector<128x512xf32>
    %cst_54 = arith.constant dense<0.000000e+00> : vector<8x512xf32>
    %215 = tpu.matmul %206, %214, %cst_54 {dimension_numbers = #tpu.dot_dimension_numbers<[1], [0], [0], [1], [0, 0, 1, 1], [], []>} : vector<8x128xf32>, vector<128x512xf32>, vector<8x512xf32> -> vector<8x512xf32>
    %216 = arith.addf %213, %215 : vector<8x512xf32>
    %217 = vector.extract_strided_slice %216 {offsets = [0, 0], sizes = [8, 128], strides = [1, 1]} : vector<8x512xf32> to vector<8x128xf32>
    %218 = arith.negf %217 : vector<8x128xf32>
    %219 = math.exp %218 : vector<8x128xf32>
    %cst_55 = arith.constant 1.000000e+00 : f32
    %220 = vector.broadcast %cst_55 : f32 to vector<8x128xf32>
    %221 = arith.addf %220, %219 : vector<8x128xf32>
    %222 = arith.divf %220, %221 : vector<8x128xf32>
    %223 = vector.extract_strided_slice %216 {offsets = [0, 128], sizes = [8, 128], strides = [1, 1]} : vector<8x512xf32> to vector<8x128xf32>
    %224 = arith.negf %223 : vector<8x128xf32>
    %225 = math.exp %224 : vector<8x128xf32>
    %cst_56 = arith.constant 1.000000e+00 : f32
    %226 = vector.broadcast %cst_56 : f32 to vector<8x128xf32>
    %227 = arith.addf %226, %225 : vector<8x128xf32>
    %228 = arith.divf %226, %227 : vector<8x128xf32>
    %229 = vector.extract_strided_slice %216 {offsets = [0, 256], sizes = [8, 128], strides = [1, 1]} : vector<8x512xf32> to vector<8x128xf32>
    %230 = math.tanh %229 : vector<8x128xf32>
    %231 = vector.extract_strided_slice %216 {offsets = [0, 384], sizes = [8, 128], strides = [1, 1]} : vector<8x512xf32> to vector<8x128xf32>
    %232 = arith.negf %231 : vector<8x128xf32>
    %233 = math.exp %232 : vector<8x128xf32>
    %cst_57 = arith.constant 1.000000e+00 : f32
    %234 = vector.broadcast %cst_57 : f32 to vector<8x128xf32>
    %235 = arith.addf %234, %233 : vector<8x128xf32>
    %236 = arith.divf %234, %235 : vector<8x128xf32>
    %237 = arith.mulf %228, %209 : vector<8x128xf32>
    %238 = arith.mulf %222, %230 : vector<8x128xf32>
    %239 = arith.addf %237, %238 : vector<8x128xf32>
    %240 = math.tanh %239 : vector<8x128xf32>
    %241 = arith.mulf %236, %240 : vector<8x128xf32>
    %242 = vector.broadcast %c5_i32 : i32 to vector<8x1xi32>
    %243 = arith.cmpi slt, %242, %7 : vector<8x1xi32>
    %244 = vector.shape_cast %243 : vector<8x1xi1> to vector<8x1xi1>
    %245 = vector.broadcast %244 : vector<8x1xi1> to vector<8x128xi1>
    %246 = arith.select %245, %241, %206 : vector<8x128xi1>, vector<8x128xf32>
    %247 = vector.shape_cast %243 : vector<8x1xi1> to vector<8x1xi1>
    %248 = vector.broadcast %247 : vector<8x1xi1> to vector<8x128xi1>
    %249 = arith.select %248, %239, %209 : vector<8x128xi1>, vector<8x128xf32>
    %c6_i32 = arith.constant 6 : i32
    %c8_i32_58 = arith.constant 8 : i32
    %250 = arith.muli %c6_i32, %c8_i32_58 : i32
    %251 = tpu.assume_multiple %250, 8 : i32
    %252 = arith.index_cast %251 : i32 to index
    %c0_59 = arith.constant 0 : index
    %253 = vector.load %arg10[%252, %c0_59] : memref<64x512xf32, #tpu.memory_space<vmem>>, vector<8x512xf32>
    %c0_60 = arith.constant 0 : index
    %c0_61 = arith.constant 0 : index
    %254 = vector.load %arg3[%c0_60, %c0_61] : memref<128x512xf32, #tpu.memory_space<vmem>>, vector<128x512xf32>
    %cst_62 = arith.constant dense<0.000000e+00> : vector<8x512xf32>
    %255 = tpu.matmul %246, %254, %cst_62 {dimension_numbers = #tpu.dot_dimension_numbers<[1], [0], [0], [1], [0, 0, 1, 1], [], []>} : vector<8x128xf32>, vector<128x512xf32>, vector<8x512xf32> -> vector<8x512xf32>
    %256 = arith.addf %253, %255 : vector<8x512xf32>
    %257 = vector.extract_strided_slice %256 {offsets = [0, 0], sizes = [8, 128], strides = [1, 1]} : vector<8x512xf32> to vector<8x128xf32>
    %258 = arith.negf %257 : vector<8x128xf32>
    %259 = math.exp %258 : vector<8x128xf32>
    %cst_63 = arith.constant 1.000000e+00 : f32
    %260 = vector.broadcast %cst_63 : f32 to vector<8x128xf32>
    %261 = arith.addf %260, %259 : vector<8x128xf32>
    %262 = arith.divf %260, %261 : vector<8x128xf32>
    %263 = vector.extract_strided_slice %256 {offsets = [0, 128], sizes = [8, 128], strides = [1, 1]} : vector<8x512xf32> to vector<8x128xf32>
    %264 = arith.negf %263 : vector<8x128xf32>
    %265 = math.exp %264 : vector<8x128xf32>
    %cst_64 = arith.constant 1.000000e+00 : f32
    %266 = vector.broadcast %cst_64 : f32 to vector<8x128xf32>
    %267 = arith.addf %266, %265 : vector<8x128xf32>
    %268 = arith.divf %266, %267 : vector<8x128xf32>
    %269 = vector.extract_strided_slice %256 {offsets = [0, 256], sizes = [8, 128], strides = [1, 1]} : vector<8x512xf32> to vector<8x128xf32>
    %270 = math.tanh %269 : vector<8x128xf32>
    %271 = vector.extract_strided_slice %256 {offsets = [0, 384], sizes = [8, 128], strides = [1, 1]} : vector<8x512xf32> to vector<8x128xf32>
    %272 = arith.negf %271 : vector<8x128xf32>
    %273 = math.exp %272 : vector<8x128xf32>
    %cst_65 = arith.constant 1.000000e+00 : f32
    %274 = vector.broadcast %cst_65 : f32 to vector<8x128xf32>
    %275 = arith.addf %274, %273 : vector<8x128xf32>
    %276 = arith.divf %274, %275 : vector<8x128xf32>
    %277 = arith.mulf %268, %249 : vector<8x128xf32>
    %278 = arith.mulf %262, %270 : vector<8x128xf32>
    %279 = arith.addf %277, %278 : vector<8x128xf32>
    %280 = math.tanh %279 : vector<8x128xf32>
    %281 = arith.mulf %276, %280 : vector<8x128xf32>
    %282 = vector.broadcast %c6_i32 : i32 to vector<8x1xi32>
    %283 = arith.cmpi slt, %282, %7 : vector<8x1xi32>
    %284 = vector.shape_cast %283 : vector<8x1xi1> to vector<8x1xi1>
    %285 = vector.broadcast %284 : vector<8x1xi1> to vector<8x128xi1>
    %286 = arith.select %285, %281, %246 : vector<8x128xi1>, vector<8x128xf32>
    %287 = vector.shape_cast %283 : vector<8x1xi1> to vector<8x1xi1>
    %288 = vector.broadcast %287 : vector<8x1xi1> to vector<8x128xi1>
    %289 = arith.select %288, %279, %249 : vector<8x128xi1>, vector<8x128xf32>
    %c7_i32 = arith.constant 7 : i32
    %c8_i32_66 = arith.constant 8 : i32
    %290 = arith.muli %c7_i32, %c8_i32_66 : i32
    %291 = tpu.assume_multiple %290, 8 : i32
    %292 = arith.index_cast %291 : i32 to index
    %c0_67 = arith.constant 0 : index
    %293 = vector.load %arg10[%292, %c0_67] : memref<64x512xf32, #tpu.memory_space<vmem>>, vector<8x512xf32>
    %c0_68 = arith.constant 0 : index
    %c0_69 = arith.constant 0 : index
    %294 = vector.load %arg3[%c0_68, %c0_69] : memref<128x512xf32, #tpu.memory_space<vmem>>, vector<128x512xf32>
    %cst_70 = arith.constant dense<0.000000e+00> : vector<8x512xf32>
    %295 = tpu.matmul %286, %294, %cst_70 {dimension_numbers = #tpu.dot_dimension_numbers<[1], [0], [0], [1], [0, 0, 1, 1], [], []>} : vector<8x128xf32>, vector<128x512xf32>, vector<8x512xf32> -> vector<8x512xf32>
    %296 = arith.addf %293, %295 : vector<8x512xf32>
    %297 = vector.extract_strided_slice %296 {offsets = [0, 0], sizes = [8, 128], strides = [1, 1]} : vector<8x512xf32> to vector<8x128xf32>
    %298 = arith.negf %297 : vector<8x128xf32>
    %299 = math.exp %298 : vector<8x128xf32>
    %cst_71 = arith.constant 1.000000e+00 : f32
    %300 = vector.broadcast %cst_71 : f32 to vector<8x128xf32>
    %301 = arith.addf %300, %299 : vector<8x128xf32>
    %302 = arith.divf %300, %301 : vector<8x128xf32>
    %303 = vector.extract_strided_slice %296 {offsets = [0, 128], sizes = [8, 128], strides = [1, 1]} : vector<8x512xf32> to vector<8x128xf32>
    %304 = arith.negf %303 : vector<8x128xf32>
    %305 = math.exp %304 : vector<8x128xf32>
    %cst_72 = arith.constant 1.000000e+00 : f32
    %306 = vector.broadcast %cst_72 : f32 to vector<8x128xf32>
    %307 = arith.addf %306, %305 : vector<8x128xf32>
    %308 = arith.divf %306, %307 : vector<8x128xf32>
    %309 = vector.extract_strided_slice %296 {offsets = [0, 256], sizes = [8, 128], strides = [1, 1]} : vector<8x512xf32> to vector<8x128xf32>
    %310 = math.tanh %309 : vector<8x128xf32>
    %311 = vector.extract_strided_slice %296 {offsets = [0, 384], sizes = [8, 128], strides = [1, 1]} : vector<8x512xf32> to vector<8x128xf32>
    %312 = arith.negf %311 : vector<8x128xf32>
    %313 = math.exp %312 : vector<8x128xf32>
    %cst_73 = arith.constant 1.000000e+00 : f32
    %314 = vector.broadcast %cst_73 : f32 to vector<8x128xf32>
    %315 = arith.addf %314, %313 : vector<8x128xf32>
    %316 = arith.divf %314, %315 : vector<8x128xf32>
    %317 = arith.mulf %308, %289 : vector<8x128xf32>
    %318 = arith.mulf %302, %310 : vector<8x128xf32>
    %319 = arith.addf %317, %318 : vector<8x128xf32>
    %320 = math.tanh %319 : vector<8x128xf32>
    %321 = arith.mulf %316, %320 : vector<8x128xf32>
    %322 = vector.broadcast %c7_i32 : i32 to vector<8x1xi32>
    %323 = arith.cmpi slt, %322, %7 : vector<8x1xi32>
    %324 = vector.shape_cast %323 : vector<8x1xi1> to vector<8x1xi1>
    %325 = vector.broadcast %324 : vector<8x1xi1> to vector<8x128xi1>
    %326 = arith.select %325, %321, %286 : vector<8x128xi1>, vector<8x128xf32>
    %327 = vector.shape_cast %323 : vector<8x1xi1> to vector<8x1xi1>
    %328 = vector.broadcast %327 : vector<8x1xi1> to vector<8x128xi1>
    %329 = arith.select %328, %319, %289 : vector<8x128xi1>, vector<8x128xf32>
    %c8_i32_74 = arith.constant 8 : i32
    %c0_75 = arith.constant 0 : index
    %c0_76 = arith.constant 0 : index
    %330 = vector.load %arg5[%c0_75, %c0_76] : memref<128x512xf32, #tpu.memory_space<vmem>>, vector<128x512xf32>
    %cst_77 = arith.constant dense<0.000000e+00> : vector<8x512xf32>
    %331 = tpu.matmul %326, %330, %cst_77 {dimension_numbers = #tpu.dot_dimension_numbers<[1], [0], [0], [1], [0, 0, 1, 1], [], []>} : vector<8x128xf32>, vector<128x512xf32>, vector<8x512xf32> -> vector<8x512xf32>
    %c0_78 = arith.constant 0 : index
    %c0_79 = arith.constant 0 : index
    %332 = vector.load %arg6[%c0_78, %c0_79] : memref<1x512xf32, #tpu.memory_space<vmem>>, vector<1x512xf32>
    %333 = vector.broadcast %332 : vector<1x512xf32> to vector<8x512xf32>
    %334 = arith.addf %331, %333 : vector<8x512xf32>
    %335 = arith.negf %334 : vector<8x512xf32>
    %336 = math.exp %335 : vector<8x512xf32>
    %cst_80 = arith.constant 1.000000e+00 : f32
    %337 = vector.broadcast %cst_80 : f32 to vector<8x512xf32>
    %338 = arith.addf %337, %336 : vector<8x512xf32>
    %339 = arith.divf %337, %338 : vector<8x512xf32>
    %c0_81 = arith.constant 0 : index
    %c0_82 = arith.constant 0 : index
    %340 = vector.load %arg7[%c0_81, %c0_82] : memref<512x128xf32, #tpu.memory_space<vmem>>, vector<512x128xf32>
    %cst_83 = arith.constant dense<0.000000e+00> : vector<8x128xf32>
    %341 = tpu.matmul %339, %340, %cst_83 {dimension_numbers = #tpu.dot_dimension_numbers<[1], [0], [0], [1], [0, 0, 1, 1], [], []>} : vector<8x512xf32>, vector<512x128xf32>, vector<8x128xf32> -> vector<8x128xf32>
    %c0_84 = arith.constant 0 : index
    %c0_85 = arith.constant 0 : index
    %342 = vector.load %arg8[%c0_84, %c0_85] : memref<1x128xf32, #tpu.memory_space<vmem>>, vector<1x128xf32>
    %343 = vector.broadcast %342 : vector<1x128xf32> to vector<8x128xf32>
    %344 = arith.addf %341, %343 : vector<8x128xf32>
    %345 = arith.negf %344 : vector<8x128xf32>
    %346 = math.exp %345 : vector<8x128xf32>
    %cst_86 = arith.constant 1.000000e+00 : f32
    %347 = vector.broadcast %cst_86 : f32 to vector<8x128xf32>
    %348 = arith.addf %347, %346 : vector<8x128xf32>
    %349 = arith.divf %347, %348 : vector<8x128xf32>
    %c0_87 = arith.constant 0 : index
    %c0_88 = arith.constant 0 : index
    %350 = vector.load %arg9[%c0_87, %c0_88] : memref<8x128xf32, #tpu.memory_space<vmem>>, vector<8x128xf32>
    tpu.vector_store %arg9[%c0_87, %c0_88], %349 {strides = array<i32>} : memref<8x128xf32, #tpu.memory_space<vmem>>, vector<8x128xf32>,
    return
  }
}

</mosaic_0001>

<bundles_post_ra>
// kernel: tpu_custom_call.1
= control target key start
LH: loop header
LB: loop body
LE: loop exit
PB: predicated region body
PF: predicated region fallthrough
CT: control target
= control target key end

     0   :  { %14 = vsyncpa [#allocation4], 0  ;;  %s3640_s0 = inlined_call_operand.vmem [shape: s32[8,1], index: 0, kind: input, shape index: {}]   ;;  %s3641_s1 = inlined_call_operand.vmem [shape: f32[64,16], index: 1, kind: input, shape index: {}]   ;;  %s3642_s2 = inlined_call_operand.vmem [shape: f32[16,512], index: 2, kind: input, shape index: {}]   ;;  %s3643_s3 = inlined_call_operand.hbm [shape: f32[128,512], index: 3, kind: input, shape index: {}]   ;;  %s3644_s4 = inlined_call_operand.vmem [shape: f32[1,512], index: 4, kind: input, shape index: {}]   ;;  %s3645_s5 = inlined_call_operand.hbm [shape: f32[128,512], index: 5, kind: input, shape index: {}]   ;;  %s3646_s6 = inlined_call_operand.vmem [shape: f32[1,512], index: 6, kind: input, shape index: {}]   ;;  %s3647_s7 = inlined_call_operand.hbm [shape: f32[512,128], index: 7, kind: input, shape index: {}]   ;;  %s3648_s8 = inlined_call_operand.vmem [shape: f32[1,128], index: 8, kind: input, shape index: {}]   ;;  %s3649_s9 = inlined_call_operand.hbm [shape: f32[8,128], index: 9, kind: output, shape index: {}]  }
   0x1   :  { %15 = vsyncpa [#allocation7], 0 }
   0x2   :  { %16 = vsyncpa [#allocation5], 0  ;;  %s42_s11 = sshll.u32 %s3645_s5, 4  ;;  %s2504_s12 = smov [#allocation6]   ;;  %s43_s11 = int_to_ptr.hbm [resolvable:$true] %s42_s11 }
   0x3   :  { %s44_s13 = sshll.u32 %s2504_s12, 4  ;;  %s27_s16 = sshll.u32 %s3643_s3, 4  ;;  %s45_s13 = int_to_ptr.vmem [resolvable:$true] %s44_s13  ;;  %s28_s16 = int_to_ptr.hbm [resolvable:$true] %s27_s16 }
   0x4   :  { %s2505_s17 = smov 512   ;;  %s2506_s18 = smov 32  }
   0x5   :  { %50 = dma.hbm_to_vmem [thread:$0]  %s43_s11, 8192, %s45_s13, [#allocation7], %s2505_s17, %s2505_s17, %s2506_s18  }
   0x6   :  { %s2507_s19 = smov [#allocation3]   ;;  %s57_s23 = sshll.u32 %s3647_s7, 4  ;;  %s58_s23 = int_to_ptr.hbm [resolvable:$true] %s57_s23 }
   0x7   :  { %s29_s20 = sshll.u32 %s2507_s19, 4  ;;  %s2508_s5 = smov [#allocation8]   ;;  %s30_s20 = int_to_ptr.vmem [resolvable:$true] %s29_s20 }
   0x8   :  { %35 = dma.hbm_to_vmem [thread:$0]  %s28_s16, 8192, %s30_s20, [#allocation4], %s2505_s17, %s2505_s17, %s2506_s18  }
   0x9   :  { %s59_s24 = sshll.u32 %s2508_s5, 4  ;;  %s2509_s25 = smov 128   ;;  %s60_s24 = int_to_ptr.vmem [resolvable:$true] %s59_s24 }
   0xa   :  { %s2510_s26 = smov 8  }
   0xb   :  { %65 = dma.hbm_to_vmem [thread:$0]  %s58_s23, 8192, %s60_s24, [#allocation7], %s2509_s25, %s2509_s25, %s2510_s26  }
   0xc   :  { %2498 = dma.done.wait [#allocation4], 8192  }
   0xd   :  { %2499 = vsyncadd [#allocation4], 4294959104 }
   0xe   :  { %2500 = dma.done.wait [#allocation7], 16384  }
   0xf   :  { %2501 = vsyncadd [#allocation7], 4294950912  ;;  %v92_v0 = vld [vmem:[%s3642_s2 + $0x20] sm:$0xff]  ;;  %v93_v1 = vld [vmem:[%s3642_s2 + $0x28] sm:$0xff]  ;;  %vm106_vm0 = vcmask 130048   ;;  %s2092_s20 = sshll.u32 %s3649_s9, 4  ;;  %s2093_s20 = int_to_ptr.hbm [resolvable:$true] %s2092_s20 }
  0x10   :  { %v94_v2 = vld [vmem:[%s3642_s2 + $0x30] sm:$0xff]  ;;  %145 = vmatpush.msra.mxu0 %v92_v0  ;;  %186 = vmatpush.msra.mxu1 %v93_v1  ;;  %v95_v3 = vld [vmem:[%s3642_s2 + $0x38] sm:$0xff]  ;;  %v88_v4 = vld [vmem:[%s3642_s2] sm:$0xff] }
  0x11   :  { %v89_v5 = vld [vmem:[%s3642_s2 + $0x8] sm:$0xff]  ;;  %227 = vmatpush.msra.mxu2 %v94_v2  ;;  %268 = vmatpush.msra.mxu3 %v95_v3  ;;  %v90_v6 = vld [vmem:[%s3642_s2 + $0x10] sm:$0xff]  ;;  %v91_v7 = vld [vmem:[%s3642_s2 + $0x18] sm:$0xff] }
  0x12   :  { %v80_v8 = vld [vmem:[%s3641_s1] sm:$0xff]  ;;  %146 = vmatpush.msra.mxu0 %v88_v4  ;;  %187 = vmatpush.msra.mxu1 %v89_v5  ;;  %v2602_v10 = vld [vmem:[#allocation3 + $0x1e8] sm:$0xff]  ;;  %v2606_v11 = vld [vmem:[#allocation3 + $0x1f8] sm:$0xff] }
  0x13   :  { %228 = vmatpush.msra.mxu2 %v90_v6  ;;  %269 = vmatpush.msra.mxu3 %v91_v7  ;;  %v2600_v9 = vld [vmem:[#allocation3 + $0x1e0] sm:$0xff]  ;;  %v2612_v13 = vld [vmem:[#allocation3 + $0x1c8] sm:$0xff]  ;;  %v2616_v14 = vld [vmem:[#allocation3 + $0x1d8] sm:$0xff] }
  0x14   :  { %2110 = vmatmul.msk.f32.vlgmr.msra.gmra.mxu0 %vm106_vm0, %v80_v8  ;;  %2118 = vmatmul.msk.f32.vlgmr.msra.gmra.mxu1 %vm106_vm0, %v80_v8  ;;  %v2610_v12 = vld [vmem:[#allocation3 + $0x1c0] sm:$0xff]  ;;  %v2618_v15 = vld [vmem:[#allocation3 + $0x1f0] sm:$0xff]  ;;  %v2623_v17 = vld [vmem:[#allocation3 + $0x1a8] sm:$0xff] }
  0x15   :  { %2126 = vmatmul.msk.f32.vlgmr.msra.gmra.mxu2 %vm106_vm0, %v80_v8  ;;  %2134 = vmatmul.msk.f32.vlgmr.msra.gmra.mxu3 %vm106_vm0, %v80_v8  ;;  %v2621_v16 = vld [vmem:[#allocation3 + $0x1a0] sm:$0xff]  ;;  %v2626_v18 = vld [vmem:[#allocation3 + $0x1d0] sm:$0xff]  ;;  %v2630_v19 = vld [vmem:[#allocation3 + $0x1b8] sm:$0xff] }
  0x16   :  { %399 = vmatpush.msrb.mxu0 %v2600_v9  ;;  %419 = vmatpush.msrb.mxu1 %v2602_v10  ;;  %v81_v20 = vld [vmem:[%s3641_s1 + $0x8] sm:$0xff]  ;;  %v2637_v21 = vld [vmem:[#allocation3 + $0x1b0] sm:$0xff]  ;;  %v2641_v22 = vld [vmem:[#allocation3 + $0x180] sm:$0xff] }
  0x17   :  { %459 = vmatpush.msrb.mxu3 %v2606_v11  ;;  %439 = vmatpush.msrb.mxu2 %v2618_v15  ;;  %v2643_v23 = vld [vmem:[#allocation3 + $0x188] sm:$0xff]  ;;  %v2649_v24 = vld [vmem:[#allocation3 + $0x198] sm:$0xff]  ;;  %v2651_v25 = vld [vmem:[#allocation3 + $0x190] sm:$0xff] }
  0x18   :  { %400 = vmatpush.msrb.mxu0 %v2610_v12  ;;  %420 = vmatpush.msrb.mxu1 %v2612_v13  ;;  %v2655_v26 = vld [vmem:[#allocation3 + $0x160] sm:$0xff]  ;;  %v2657_v27 = vld [vmem:[#allocation3 + $0x168] sm:$0xff]  ;;  %v2661_v28 = vld [vmem:[#allocation3 + $0x178] sm:$0xff] }
  0x19   :  { %460 = vmatpush.msrb.mxu3 %v2616_v14  ;;  %440 = vmatpush.msrb.mxu2 %v2626_v18  ;;  %v2663_v29 = vld [vmem:[#allocation3 + $0x170] sm:$0xff]  ;;  %v2666_v30 = vld [vmem:[#allocation3 + $0x140] sm:$0xff]  ;;  %v2668_v31 = vld [vmem:[#allocation3 + $0x148] sm:$0xff] }
  0x1a   :  { %401 = vmatpush.msrb.mxu0 %v2621_v16  ;;  %421 = vmatpush.msrb.mxu1 %v2623_v17  ;;  %v2673_v32 = vld [vmem:[#allocation3 + $0x158] sm:$0xff]  ;;  %v2675_v33 = vld [vmem:[#allocation3 + $0x150] sm:$0xff]  ;;  %v2684_v35 = vld [vmem:[#allocation3 + $0x120] sm:$0xff] }
  0x1b   :  { %461 = vmatpush.msrb.mxu3 %v2630_v19  ;;  %441 = vmatpush.msrb.mxu2 %v2637_v21  ;;  %v82_v34 = vld [vmem:[%s3641_s1 + $0x10] sm:$0xff]  ;;  %v2686_v36 = vld [vmem:[#allocation3 + $0x128] sm:$0xff]  ;;  %v2692_v37 = vld [vmem:[#allocation3 + $0x138] sm:$0xff] }
  0x1c   :  { %2111 = vmatmul.msk.f32.gmra.mxu0 %vm106_vm0, %v81_v20  ;;  %2119 = vmatmul.msk.f32.gmra.mxu1 %vm106_vm0, %v81_v20  ;;  %v2694_v38 = vld [vmem:[#allocation3 + $0x130] sm:$0xff]  ;;  %v2698_v39 = vld [vmem:[#allocation3 + $0x100] sm:$0xff]  ;;  %v2700_v40 = vld [vmem:[#allocation3 + $0x108] sm:$0xff] }
  0x1d   :  { %2127 = vmatmul.msk.f32.gmra.mxu2 %vm106_vm0, %v81_v20  ;;  %2135 = vmatmul.msk.f32.gmra.mxu3 %vm106_vm0, %v81_v20  ;;  %v2704_v41 = vld [vmem:[#allocation3 + $0x118] sm:$0xff]  ;;  %v2706_v42 = vld [vmem:[#allocation3 + $0x110] sm:$0xff]  ;;  %v2709_v43 = vld [vmem:[#allocation3 + $0xe0] sm:$0xff] }
  0x1e   :  { %402 = vmatpush.msrb.mxu0 %v2641_v22  ;;  %422 = vmatpush.msrb.mxu1 %v2643_v23  ;;  %v2711_v44 = vld [vmem:[#allocation3 + $0xe8] sm:$0xff]  ;;  %v2716_v45 = vld [vmem:[#allocation3 + $0xf8] sm:$0xff]  ;;  %v2718_v46 = vld [vmem:[#allocation3 + $0xf0] sm:$0xff] }
  0x1f   :  { %462 = vmatpush.msrb.mxu3 %v2649_v24  ;;  %442 = vmatpush.msrb.mxu2 %v2651_v25  ;;  %v83_v47 = vld [vmem:[%s3641_s1 + $0x18] sm:$0xff]  ;;  %v2727_v48 = vld [vmem:[#allocation3 + $0xc0] sm:$0xff]  ;;  %v2729_v49 = vld [vmem:[#allocation3 + $0xc8] sm:$0xff] }
  0x20   :  { %403 = vmatpush.msrb.mxu0 %v2655_v26  ;;  %423 = vmatpush.msrb.mxu1 %v2657_v27  ;;  %v2735_v50 = vld [vmem:[#allocation3 + $0xd8] sm:$0xff]  ;;  %v2737_v51 = vld [vmem:[#allocation3 + $0xd0] sm:$0xff]  ;;  %v2741_v52 = vld [vmem:[#allocation3 + $0xa0] sm:$0xff] }
  0x21   :  { %463 = vmatpush.msrb.mxu3 %v2661_v28  ;;  %443 = vmatpush.msrb.mxu2 %v2663_v29  ;;  %3749 = vst [vmem:[#allocation13_spill] sm:$0xff] %v2735_v50  ;;  %v2743_v53 = vld [vmem:[#allocation3 + $0xa8] sm:$0xff]  ;;  %v2747_v54 = vld [vmem:[#allocation3 + $0xb8] sm:$0xff]  ;;  %v2749_v55 = vld [vmem:[#allocation3 + $0xb0] sm:$0xff] }
  0x22   :  { %404 = vmatpush.msrb.mxu0 %v2666_v30  ;;  %424 = vmatpush.msrb.mxu1 %v2668_v31  ;;  %3750 = vst [vmem:[#allocation14_spill] sm:$0xff] %v2737_v51  ;;  %v2752_v56 = vld [vmem:[#allocation3 + $0x80] sm:$0xff]  ;;  %v2754_v57 = vld [vmem:[#allocation3 + $0x88] sm:$0xff]  ;;  %v2759_v58 = vld [vmem:[#allocation3 + $0x98] sm:$0xff] }
  0x23   :  { %464 = vmatpush.msrb.mxu3 %v2673_v32  ;;  %444 = vmatpush.msrb.mxu2 %v2675_v33  ;;  %3751 = vst [vmem:[#allocation15_spill] sm:$0xff] %v2741_v52  ;;  %v2761_v59 = vld [vmem:[#allocation3 + $0x90] sm:$0xff]  ;;  %v84_v60 = vld [vmem:[%s3641_s1 + $0x20] sm:$0xff]  ;;  %v2772_v62 = vld [vmem:[#allocation3 + $0x68] sm:$0xff] }
  0x24   :  { %2112 = vmatmul.msk.f32.gmra.mxu0 %vm106_vm0, %v82_v34  ;;  %2120 = vmatmul.msk.f32.gmra.mxu1 %vm106_vm0, %v82_v34  ;;  %3752 = vst [vmem:[#allocation16_spill] sm:$0xff] %v2743_v53  ;;  %v2770_v61 = vld [vmem:[#allocation3 + $0x60] sm:$0xff]  ;;  %v2778_v63 = vld [vmem:[#allocation3 + $0x78] sm:$0xff]  ;;  %v2780_v0 = vld [vmem:[#allocation3 + $0x70] sm:$0xff] }
  0x25   :  { %2128 = vmatmul.msk.f32.gmra.mxu2 %vm106_vm0, %v82_v34  ;;  %2136 = vmatmul.msk.f32.gmra.mxu3 %vm106_vm0, %v82_v34  ;;  %3753 = vst [vmem:[#allocation17_spill] sm:$0xff] %v2747_v54  ;;  %v2784_v1 = vld [vmem:[#allocation3 + $0x40] sm:$0xff]  ;;  %v2786_v2 = vld [vmem:[#allocation3 + $0x48] sm:$0xff]  ;;  %v2790_v3 = vld [vmem:[#allocation3 + $0x58] sm:$0xff] }
  0x26   :  { %405 = vmatpush.msrb.mxu0 %v2684_v35  ;;  %425 = vmatpush.msrb.mxu1 %v2686_v36  ;;  %3754 = vst [vmem:[#allocation18_spill] sm:$0xff] %v2749_v55  ;;  %v2792_v4 = vld [vmem:[#allocation3 + $0x50] sm:$0xff]  ;;  %v2795_v5 = vld [vmem:[#allocation3 + $0x20] sm:$0xff]  ;;  %v2797_v6 = vld [vmem:[#allocation3 + $0x28] sm:$0xff] }
  0x27   :  { %465 = vmatpush.msrb.mxu3 %v2692_v37  ;;  %445 = vmatpush.msrb.mxu2 %v2694_v38  ;;  %3755 = vst [vmem:[#allocation19_spill] sm:$0xff] %v2752_v56  ;;  %v2802_v7 = vld [vmem:[#allocation3 + $0x30] sm:$0xff]  ;;  %v2804_v8 = vld [vmem:[#allocation3 + $0x38] sm:$0xff]  ;;  %v2809_v20 = vld [vmem:[%s3640_s0] sm:$0xff] }
  0x28   :  { %406 = vmatpush.msrb.mxu0 %v2698_v39  ;;  %426 = vmatpush.msrb.mxu1 %v2700_v40  ;;  %3756 = vst [vmem:[#allocation20_spill] sm:$0xff] %v2754_v57  ;;  %v85_v34 = vld [vmem:[%s3641_s1 + $0x28] sm:$0xff]  ;;  %vm546_vm1 = vcmp.gt.s32.totalorder %v2809_v20, 0  ;;  %vm708_vm2 = vcmp.gt.s32.totalorder %v2809_v20, 1  ;;  %vm1518_vm3 = vcmp.gt.s32.totalorder %v2809_v20, 6 }
  0x29   :  { %466 = vmatpush.msrb.mxu3 %v2704_v41  ;;  %446 = vmatpush.msrb.mxu2 %v2706_v42  ;;  %3757 = vst [vmem:[#allocation21_spill] sm:$0xff] %v2759_v58 }
  0x2a   :  { %407 = vmatpush.msrb.mxu0 %v2709_v43  ;;  %427 = vmatpush.msrb.mxu1 %v2711_v44  ;;  %3758 = vst [vmem:[#allocation22_spill] sm:$0xff] %v2761_v59 }
  0x2b   :  { %467 = vmatpush.msrb.mxu3 %v2716_v45  ;;  %447 = vmatpush.msrb.mxu2 %v2718_v46  ;;  %3759 = vst [vmem:[#allocation23_spill] sm:$0xff] %v2770_v61 }
  0x2c   :  { %2113 = vmatmul.msk.f32.gmra.mxu0 %vm106_vm0, %v83_v47  ;;  %2121 = vmatmul.msk.f32.gmra.mxu1 %vm106_vm0, %v83_v47  ;;  %3760 = vst [vmem:[#allocation24_spill] sm:$0xff] %v2772_v62 }
  0x2d   :  { %2129 = vmatmul.msk.f32.gmra.mxu2 %vm106_vm0, %v83_v47  ;;  %2137 = vmatmul.msk.f32.gmra.mxu3 %vm106_vm0, %v83_v47  ;;  %3761 = vst [vmem:[#allocation25_spill] sm:$0xff] %v2778_v63  ;;  %v2818_v47 = vld [vmem:[#allocation3] sm:$0xff] }
  0x2e   :  { %408 = vmatpush.msrb.mxu0 %v2727_v48  ;;  %428 = vmatpush.msrb.mxu1 %v2729_v49  ;;  %3762 = vst [vmem:[#allocation26_spill] sm:$0xff] %v2780_v0 }
  0x2f   :  { %468 = vmatpush.msrb.mxu3 %v2735_v50  ;;  %448 = vmatpush.msrb.mxu2 %v2737_v51  ;;  %3763 = vst [vmem:[#allocation27_spill] sm:$0xff] %v2784_v1 }
  0x30   :  { %409 = vmatpush.msrb.mxu0 %v2741_v52  ;;  %429 = vmatpush.msrb.mxu1 %v2743_v53  ;;  %3764 = vst [vmem:[#allocation28_spill] sm:$0xff] %v2786_v2 }
  0x31   :  { %469 = vmatpush.msrb.mxu3 %v2747_v54  ;;  %449 = vmatpush.msrb.mxu2 %v2749_v55  ;;  %3765 = vst [vmem:[#allocation29_spill] sm:$0xff] %v2790_v3 }
  0x32   :  { %410 = vmatpush.msrb.mxu0 %v2752_v56  ;;  %430 = vmatpush.msrb.mxu1 %v2754_v57  ;;  %3766 = vst [vmem:[#allocation30_spill] sm:$0xff] %v2792_v4 }
  0x33   :  { %470 = vmatpush.msrb.mxu3 %v2759_v58  ;;  %450 = vmatpush.msrb.mxu2 %v2761_v59  ;;  %3767 = vst [vmem:[#allocation31_spill] sm:$0xff] %v2795_v5 }
  0x34   :  { %2114 = vmatmul.msk.f32.gmra.mxu0 %vm106_vm0, %v84_v60  ;;  %2122 = vmatmul.msk.f32.gmra.mxu1 %vm106_vm0, %v84_v60  ;;  %3768 = vst [vmem:[#allocation32_spill] sm:$0xff] %v2797_v6 }
  0x35   :  { %2130 = vmatmul.msk.f32.gmra.mxu2 %vm106_vm0, %v84_v60  ;;  %2138 = vmatmul.msk.f32.gmra.mxu3 %vm106_vm0, %v84_v60  ;;  %3769 = vst [vmem:[#allocation33_spill] sm:$0xff] %v2802_v7  ;;  %v2820_v60 = vld [vmem:[#allocation3 + $0x8] sm:$0xff] }
  0x36   :  { %411 = vmatpush.msrb.mxu0 %v2770_v61  ;;  %431 = vmatpush.msrb.mxu1 %v2772_v62  ;;  %3770 = vst [vmem:[#allocation34_spill] sm:$0xff] %v2804_v8 }
  0x37   :  { %471 = vmatpush.msrb.mxu3 %v2778_v63  ;;  %451 = vmatpush.msrb.mxu2 %v2780_v0  ;;  %3771 = vst [vmem:[#allocation35_spill] sm:$0xff] %v2809_v20 }
  0x38   :  { %412 = vmatpush.msrb.mxu0 %v2784_v1  ;;  %432 = vmatpush.msrb.mxu1 %v2786_v2  ;;  %3772 = vst [vmem:[#allocation36_spill] sm:$0xff] %v2818_v47 }
  0x39   :  { %472 = vmatpush.msrb.mxu3 %v2790_v3  ;;  %452 = vmatpush.msrb.mxu2 %v2792_v4  ;;  %3773 = vst [vmem:[#allocation37_spill] sm:$0xff] %v2820_v60  ;;  %v2827_v3 = vld [vmem:[#allocation3 + $0x10] sm:$0xff]  ;;  %v2829_v4 = vld [vmem:[#allocation3 + $0x18] sm:$0xff] }
  0x3a   :  { %413 = vmatpush.msrb.mxu0 %v2795_v5  ;;  %433 = vmatpush.msrb.mxu1 %v2797_v6  ;;  %3774 = vst [vmem:[#allocation38_spill] sm:$0xff] %v2827_v3  ;;  %v86_v6 = vld [vmem:[%s3641_s1 + $0x30] sm:$0xff] }
  0x3b   :  { %453 = vmatpush.msrb.mxu2 %v2802_v7  ;;  %473 = vmatpush.msrb.mxu3 %v2804_v8  ;;  %3775 = vst [vmem:[#allocation39_spill] sm:$0xff] %v2829_v4  ;;  %v3660_v7 = vmov 0  }
  0x3c   :  { %2115 = vmatmul.msk.f32.gmra.mxu0 %vm106_vm0, %v85_v34  ;;  %2123 = vmatmul.msk.f32.gmra.mxu1 %vm106_vm0, %v85_v34  ;;  %v547_v8 = vsel %vm546_vm1, 1, %v3660_v7 }
  0x3d   :  { %2131 = vmatmul.msk.f32.gmra.mxu2 %vm106_vm0, %v85_v34  ;;  %2139 = vmatmul.msk.f32.gmra.mxu3 %vm106_vm0, %v85_v34  ;;  %v87_v34 = vld [vmem:[%s3641_s1 + $0x38] sm:$0xff]  ;;  %v3780_v20 = vld [vmem:[#allocation34_spill] sm:$0xff] }
  0x3e   :  { %414 = vmatpush.msrb.mxu0 %v2818_v47  ;;  %434 = vmatpush.msrb.mxu1 %v2820_v60 }
  0x3f   :  { %454 = vmatpush.msrb.mxu2 %v2827_v3  ;;  %474 = vmatpush.msrb.mxu3 %v2829_v4 }
  0x40   :  { %2185 = vset.pattern.permute.xlu0 %v3660_v7  ;;  %561 = vmatpush.msra.mxu0 %v2600_v9 }
  0x41   :  { %549 = vperm.xlu0 %2185, %v547_v8   ;;  %581 = vmatpush.msra.mxu1 %v2602_v10  ;;  %v709_v8 = vsel %vm708_vm2, 1, %v3660_v7 }
  0x42   :  { %601 = vmatpush.msra.mxu2 %v2618_v15  ;;  %621 = vmatpush.msra.mxu3 %v2606_v11 }
  0x43   :  { %562 = vmatpush.msra.mxu0 %v2610_v12  ;;  %582 = vmatpush.msra.mxu1 %v2612_v13 }
  0x44   :  { %2116 = vmatmul.msk.f32.gmra.mxu0 %vm106_vm0, %v86_v6  ;;  %2124 = vmatmul.msk.f32.gmra.mxu1 %vm106_vm0, %v86_v6 }
  0x45   :  { %2132 = vmatmul.msk.f32.gmra.mxu2 %vm106_vm0, %v86_v6  ;;  %2140 = vmatmul.msk.f32.gmra.mxu3 %vm106_vm0, %v86_v6  ;;  %v1519_v6 = vsel %vm1518_vm3, 1, %v3660_v7  ;;  %v3779_v7 = vld [vmem:[#allocation33_spill] sm:$0xff] }
  0x46   :  { %602 = vmatpush.msra.mxu2 %v2626_v18  ;;  %622 = vmatpush.msra.mxu3 %v2616_v14 }
  0x47   :  { %563 = vmatpush.msra.mxu0 %v2621_v16  ;;  %583 = vmatpush.msra.mxu1 %v2623_v17 }
  0x48   :  { %603 = vmatpush.msra.mxu2 %v2637_v21  ;;  %623 = vmatpush.msra.mxu3 %v2630_v19 }
  0x49   :  { %711 = vperm.xlu0 %2185, %v709_v8   ;;  %564 = vmatpush.msra.mxu0 %v2641_v22  ;;  %v2512_v8 = vmov 0.0  }
  0x4a   :  { %584 = vmatpush.msra.mxu1 %v2643_v23  ;;  %604 = vmatpush.msra.mxu2 %v2651_v25 }
  0x4b   :  { %624 = vmatpush.msra.mxu3 %v2649_v24  ;;  %565 = vmatpush.msra.mxu0 %v2655_v26 }
  0x4c   :  { %2117 = vmatmul.msk.f32.gmra.mxu0 %vm106_vm0, %v87_v34  ;;  %2125 = vmatmul.msk.f32.gmra.mxu1 %vm106_vm0, %v87_v34 }
  0x4d   :  { %2133 = vmatmul.msk.f32.gmra.mxu2 %vm106_vm0, %v87_v34  ;;  %2141 = vmatmul.msk.f32.gmra.mxu3 %vm106_vm0, %v87_v34  ;;  %v3776_v34 = vld [vmem:[#allocation30_spill] sm:$0xff] }
  0x4e   :  { %585 = vmatpush.msra.mxu1 %v2657_v27  ;;  %605 = vmatpush.msra.mxu2 %v2663_v29 }
  0x4f   :  { %625 = vmatpush.msra.mxu3 %v2661_v28  ;;  %566 = vmatpush.msra.mxu0 %v2666_v30 }
  0x50   :  { %586 = vmatpush.msra.mxu1 %v2668_v31  ;;  %606 = vmatpush.msra.mxu2 %v2675_v33 }
  0x51   :  { %1521 = vperm.xlu0 %2185, %v1519_v6   ;;  %626 = vmatpush.msra.mxu3 %v2673_v32  ;;  %v3777_v6 = vld [vmem:[#allocation29_spill] sm:$0xff] }
  0x52   :  { %567 = vmatpush.msra.mxu0 %v2684_v35  ;;  %587 = vmatpush.msra.mxu1 %v2686_v36 }
  0x53   :  { %607 = vmatpush.msra.mxu2 %v2694_v38  ;;  %627 = vmatpush.msra.mxu3 %v2692_v37 }
  0x54   :  { %415 = vmatmul.f32.vlgmr.msrb.gmra.mxu0 %v2512_v8  ;;  %435 = vmatmul.f32.vlgmr.msrb.gmra.mxu1 %v2512_v8 }
  0x55   :  { %455 = vmatmul.f32.vlgmr.msrb.gmra.mxu2 %v2512_v8  ;;  %475 = vmatmul.f32.vlgmr.msrb.gmra.mxu3 %v2512_v8  ;;  %v3778_v8 = vld [vmem:[#allocation32_spill] sm:$0xff] }
  0x56   :  { %568 = vmatpush.msra.mxu0 %v2698_v39  ;;  %588 = vmatpush.msra.mxu1 %v2700_v40 }
  0x57   :  { %608 = vmatpush.msra.mxu2 %v2706_v42  ;;  %628 = vmatpush.msra.mxu3 %v2704_v41 }
  0x58   :  { %569 = vmatpush.msra.mxu0 %v2709_v43  ;;  %589 = vmatpush.msra.mxu1 %v2711_v44 }
  0x59   :  { %609 = vmatpush.msra.mxu2 %v2718_v46  ;;  %629 = vmatpush.msra.mxu3 %v2716_v45 }
  0x5a   :  { %570 = vmatpush.msra.mxu0 %v2727_v48  ;;  %590 = vmatpush.msra.mxu1 %v2729_v49 }
  0x5b   :  { %610 = vmatpush.msra.mxu2 %v2737_v51  ;;  %630 = vmatpush.msra.mxu3 %v2735_v50 }
  0x5c   :  { %571 = vmatpush.msra.mxu0 %v2741_v52  ;;  %591 = vmatpush.msra.mxu1 %v2743_v53 }
  0x5d   :  { %611 = vmatpush.msra.mxu2 %v2749_v55  ;;  %631 = vmatpush.msra.mxu3 %v2747_v54 }
  0x5e   :  { %572 = vmatpush.msra.mxu0 %v2752_v56  ;;  %592 = vmatpush.msra.mxu1 %v2754_v57 }
  0x5f   :  { %612 = vmatpush.msra.mxu2 %v2761_v59  ;;  %632 = vmatpush.msra.mxu3 %v2759_v58 }
  0x60   :  { %573 = vmatpush.msra.mxu0 %v2770_v61  ;;  %593 = vmatpush.msra.mxu1 %v2772_v62 }
  0x61   :  { %613 = vmatpush.msra.mxu2 %v2780_v0  ;;  %633 = vmatpush.msra.mxu3 %v2778_v63 }
  0x62   :  { %574 = vmatpush.msra.mxu0 %v2784_v1  ;;  %594 = vmatpush.msra.mxu1 %v2786_v2 }
  0x63   :  { %614 = vmatpush.msra.mxu2 %v3776_v34  ;;  %634 = vmatpush.msra.mxu3 %v3777_v6 }
  0x64   :  { %575 = vmatpush.msra.mxu0 %v2795_v5  ;;  %595 = vmatpush.msra.mxu1 %v3778_v8 }
  0x65   :  { %615 = vmatpush.msra.mxu2 %v3779_v7  ;;  %635 = vmatpush.msra.mxu3 %v3780_v20 }
  0x66   :  { %576 = vmatpush.msra.mxu0 %v2818_v47  ;;  %596 = vmatpush.msra.mxu1 %v2820_v60 }
  0x67   :  { %616 = vmatpush.msra.mxu2 %v2827_v3  ;;  %636 = vmatpush.msra.mxu3 %v2829_v4 }
  0x68   :  { %723 = vmatpush.msrb.mxu0 %v2600_v9  ;;  %743 = vmatpush.msrb.mxu1 %v2602_v10 }
  0x69   :  { %763 = vmatpush.msrb.mxu2 %v2618_v15  ;;  %783 = vmatpush.msrb.mxu3 %v2606_v11 }
  0x6a   :  { %724 = vmatpush.msrb.mxu0 %v2610_v12  ;;  %744 = vmatpush.msrb.mxu1 %v2612_v13 }
  0x6b   :  { %764 = vmatpush.msrb.mxu2 %v2626_v18  ;;  %784 = vmatpush.msrb.mxu3 %v2616_v14 }
  0x6c   :  { %725 = vmatpush.msrb.mxu0 %v2621_v16  ;;  %745 = vmatpush.msrb.mxu1 %v2623_v17 }
  0x6d   :  { %765 = vmatpush.msrb.mxu2 %v2637_v21  ;;  %785 = vmatpush.msrb.mxu3 %v2630_v19 }
  0x6e   :  { %726 = vmatpush.msrb.mxu0 %v2641_v22  ;;  %746 = vmatpush.msrb.mxu1 %v2643_v23 }
  0x6f   :  { %766 = vmatpush.msrb.mxu2 %v2651_v25  ;;  %786 = vmatpush.msrb.mxu3 %v2649_v24 }
  0x70   :  { %727 = vmatpush.msrb.mxu0 %v2655_v26  ;;  %747 = vmatpush.msrb.mxu1 %v2657_v27 }
  0x71   :  { %767 = vmatpush.msrb.mxu2 %v2663_v29  ;;  %787 = vmatpush.msrb.mxu3 %v2661_v28 }
  0x72   :  { %728 = vmatpush.msrb.mxu0 %v2666_v30  ;;  %748 = vmatpush.msrb.mxu1 %v2668_v31 }
  0x73   :  { %768 = vmatpush.msrb.mxu2 %v2675_v33  ;;  %788 = vmatpush.msrb.mxu3 %v2673_v32 }
  0x74   :  { %729 = vmatpush.msrb.mxu0 %v2684_v35  ;;  %749 = vmatpush.msrb.mxu1 %v2686_v36 }
  0x75   :  { %769 = vmatpush.msrb.mxu2 %v2694_v38  ;;  %789 = vmatpush.msrb.mxu3 %v2692_v37 }
  0x76   :  { %730 = vmatpush.msrb.mxu0 %v2698_v39  ;;  %750 = vmatpush.msrb.mxu1 %v2700_v40 }
  0x77   :  { %770 = vmatpush.msrb.mxu2 %v2706_v42  ;;  %790 = vmatpush.msrb.mxu3 %v2704_v41 }
  0x78   :  { %731 = vmatpush.msrb.mxu0 %v2709_v43  ;;  %751 = vmatpush.msrb.mxu1 %v2711_v44 }
  0x79   :  { %771 = vmatpush.msrb.mxu2 %v2718_v46  ;;  %791 = vmatpush.msrb.mxu3 %v2716_v45 }
  0x7a   :  { %732 = vmatpush.msrb.mxu0 %v2727_v48  ;;  %752 = vmatpush.msrb.mxu1 %v2729_v49 }
  0x7b   :  { %772 = vmatpush.msrb.mxu2 %v2737_v51  ;;  %792 = vmatpush.msrb.mxu3 %v2735_v50 }
  0x7c   :  { %733 = vmatpush.msrb.mxu0 %v2741_v52  ;;  %753 = vmatpush.msrb.mxu1 %v2743_v53 }
  0x7d   :  { %773 = vmatpush.msrb.mxu2 %v2749_v55  ;;  %793 = vmatpush.msrb.mxu3 %v2747_v54 }
  0x7e   :  { %734 = vmatpush.msrb.mxu0 %v2752_v56  ;;  %754 = vmatpush.msrb.mxu1 %v2754_v57 }
  0x7f   :  { %774 = vmatpush.msrb.mxu2 %v2761_v59  ;;  %794 = vmatpush.msrb.mxu3 %v2759_v58 }
  0x80   :  { %735 = vmatpush.msrb.mxu0 %v2770_v61  ;;  %755 = vmatpush.msrb.mxu1 %v2772_v62 }
  0x81   :  { %775 = vmatpush.msrb.mxu2 %v2780_v0  ;;  %795 = vmatpush.msrb.mxu3 %v2778_v63 }
  0x82   :  { %736 = vmatpush.msrb.mxu0 %v2784_v1  ;;  %756 = vmatpush.msrb.mxu1 %v2786_v2  ;;  %v3781_v2 = vmov 0  }
  0x83   :  { %776 = vmatpush.msrb.mxu2 %v3776_v34  ;;  %796 = vmatpush.msrb.mxu3 %v3777_v6 }
  0x84   :  { %737 = vmatpush.msrb.mxu0 %v2795_v5  ;;  %757 = vmatpush.msrb.mxu1 %v3778_v8 }
  0x85   :  { %777 = vmatpush.msrb.mxu2 %v3779_v7  ;;  %797 = vmatpush.msrb.mxu3 %v3780_v20  ;;  %v96_v7 = vld [vmem:[%s3644_s4] sm:$0xf] }
  0x86   :  { %738 = vmatpush.msrb.mxu0 %v2818_v47  ;;  %758 = vmatpush.msrb.mxu1 %v2820_v60  ;;  %v98_v8 = vperm.slane %v96_v7, 0  ;;  %v99_v20 = vperm.slane %v96_v7, 1  ;;  %v2998_v63 = vperm.slane %v96_v7, 2 }
  0x87   :  { %778 = vmatpush.msrb.mxu2 %v2827_v3  ;;  %798 = vmatpush.msrb.mxu3 %v2829_v4 }
  0x88   :  { %2186 = vset.pattern.permute.xlu1 %v3781_v2  ;;  %2187 = vset.pattern.permute.xlu2 %v3781_v2  ;;  %v101_v2 = vperm.slane %v96_v7, 3 }
  0x91   :  { %v148_v6 = vpop.f32.mrf.mxu0  ;;  %v189_v5 = vpop.f32.mrf.mxu1 }
  0x98   :  { %v2990_v34 = vpop.f32.mrf.mxu2  ;;  %v2992_v47 = vpop.f32.mrf.mxu3 }
  0x99   :  { %v151_v60 = vpop.f32.mrf.mxu0  ;;  %v192_v3 = vpop.f32.mrf.mxu1 }
  0x9a   :  { %v2994_v1 = vadd.f32 %v151_v60, %v98_v8  ;;  %v2996_v4 = vadd.f32 %v192_v3, %v99_v20 }
  0x9c   :  { %3782 = vst [vmem:[#allocation40_spill] sm:$0xff] %v2994_v1 }
  0x9d   :  { %3783 = vst [vmem:[#allocation41_spill] sm:$0xff] %v2996_v4 }
  0xa0   :  { %v233_v0 = vpop.f32.mrf.mxu2  ;;  %v274_v62 = vpop.f32.mrf.mxu3 }
  0xa1   :  { %v3001_v61 = vadd.f32 %v233_v0, %v2998_v63  ;;  %v3003_v58 = vadd.f32 %v274_v62, %v101_v2  ;;  %v154_v59 = vpop.f32.mrf.mxu0  ;;  %v195_v57 = vpop.f32.mrf.mxu1 }
  0xa2   :  { %v3005_v56 = vadd.f32 %v154_v59, %v98_v8  ;;  %v3007_v54 = vadd.f32 %v195_v57, %v99_v20 }
  0xa3   :  { %3784 = vst [vmem:[#allocation42_spill] sm:$0xff] %v3001_v61 }
  0xa4   :  { %3785 = vst [vmem:[#allocation43_spill] sm:$0xff] %v3003_v58 }
  0xa5   :  { %3786 = vst [vmem:[#allocation44_spill] sm:$0xff] %v3005_v56 }
  0xa6   :  { %3787 = vst [vmem:[#allocation45_spill] sm:$0xff] %v3007_v54 }
  0xa8   :  { %v236_v60 = vpop.f32.mrf.mxu2  ;;  %v277_v1 = vpop.f32.mrf.mxu3 }
  0xa9   :  { %v3010_v3 = vadd.f32 %v236_v60, %v2998_v63  ;;  %v3012_v4 = vadd.f32 %v277_v1, %v101_v2  ;;  %v157_v7 = vpop.f32.mrf.mxu0  ;;  %v198_v55 = vpop.f32.mrf.mxu1 }
  0xaa   :  { %v3014_v53 = vadd.f32 %v157_v7, %v98_v8  ;;  %v3016_v0 = vadd.f32 %v198_v55, %v99_v20 }
  0xab   :  { %3788 = vst [vmem:[#allocation46_spill] sm:$0xff] %v3010_v3 }
  0xac   :  { %3789 = vst [vmem:[#allocation47_spill] sm:$0xff] %v3012_v4 }
  0xad   :  { %3790 = vst [vmem:[#allocation48_spill] sm:$0xff] %v3014_v53 }
  0xae   :  { %3791 = vst [vmem:[#allocation49_spill] sm:$0xff] %v3016_v0 }
  0xb0   :  { %v239_v62 = vpop.f32.mrf.mxu2  ;;  %v280_v61 = vpop.f32.mrf.mxu3 }
  0xb1   :  { %v3019_v59 = vadd.f32 %v239_v62, %v2998_v63  ;;  %v3021_v57 = vadd.f32 %v280_v61, %v101_v2  ;;  %v160_v54 = vpop.f32.mrf.mxu0  ;;  %v201_v56 = vpop.f32.mrf.mxu1 }
  0xb2   :  { %v3023_v58 = vadd.f32 %v160_v54, %v98_v8  ;;  %v3025_v60 = vadd.f32 %v201_v56, %v99_v20 }
  0xb3   :  { %3792 = vst [vmem:[#allocation50_spill] sm:$0xff] %v3019_v59 }
  0xb4   :  { %3793 = vst [vmem:[#allocation51_spill] sm:$0xff] %v3021_v57 }
  0xb5   :  { %3794 = vst [vmem:[#allocation52_spill] sm:$0xff] %v3023_v58 }
  0xb6   :  { %3795 = vst [vmem:[#allocation53_spill] sm:$0xff] %v3025_v60 }
  0xb8   :  { %v242_v1 = vpop.f32.mrf.mxu2  ;;  %v283_v3 = vpop.f32.mrf.mxu3 }
  0xb9   :  { %v3028_v7 = vadd.f32 %v242_v1, %v2998_v63  ;;  %v3030_v55 = vadd.f32 %v283_v3, %v101_v2  ;;  %v163_v0 = vpop.f32.mrf.mxu0  ;;  %v204_v53 = vpop.f32.mrf.mxu1 }
  0xba   :  { %v3032_v4 = vadd.f32 %v163_v0, %v98_v8  ;;  %v3034_v62 = vadd.f32 %v204_v53, %v99_v20 }
  0xbb   :  { %3796 = vst [vmem:[#allocation54_spill] sm:$0xff] %v3028_v7 }
  0xbc   :  { %3797 = vst [vmem:[#allocation55_spill] sm:$0xff] %v3030_v55 }
  0xbd   :  { %3798 = vst [vmem:[#allocation56_spill] sm:$0xff] %v3032_v4 }
  0xbe   :  { %3799 = vst [vmem:[#allocation57_spill] sm:$0xff] %v3034_v62 }
  0xc0   :  { %v245_v61 = vpop.f32.mrf.mxu2  ;;  %v286_v59 = vpop.f32.mrf.mxu3 }
  0xc1   :  { %v3037_v54 = vadd.f32 %v245_v61, %v2998_v63  ;;  %v3039_v56 = vadd.f32 %v286_v59, %v101_v2  ;;  %v166_v60 = vpop.f32.mrf.mxu0  ;;  %v207_v58 = vpop.f32.mrf.mxu1  ;;  %v149_v59 = vadd.f32 %v148_v6, %v98_v8 }
  0xc2   :  { %v3041_v57 = vadd.f32 %v166_v60, %v98_v8  ;;  %v3043_v1 = vadd.f32 %v207_v58, %v99_v20 }
  0xc3   :  { %3800 = vst [vmem:[#allocation58_spill] sm:$0xff] %v3037_v54  ;;  %v190_v54 = vadd.f32 %v189_v5, %v99_v20 }
  0xc4   :  { %3801 = vst [vmem:[#allocation59_spill] sm:$0xff] %v3039_v56 }
  0xc5   :  { %3802 = vst [vmem:[#allocation60_spill] sm:$0xff] %v3041_v57 }
  0xc6   :  { %3803 = vst [vmem:[#allocation61_spill] sm:$0xff] %v3043_v1 }
  0xc8   :  { %v248_v3 = vpop.f32.mrf.mxu2  ;;  %v289_v7 = vpop.f32.mrf.mxu3 }
  0xc9   :  { %v3046_v0 = vadd.f32 %v248_v3, %v2998_v63  ;;  %v3048_v53 = vadd.f32 %v289_v7, %v101_v2  ;;  %v169_v62 = vpop.f32.mrf.mxu0  ;;  %v210_v4 = vpop.f32.mrf.mxu1 }
  0xca   :  { %v3050_v55 = vadd.f32 %v169_v62, %v98_v8  ;;  %v3052_v61 = vadd.f32 %v210_v4, %v99_v20  ;;  %v272_v62 = vadd.f32 %v2992_v47, %v101_v2 }
  0xcb   :  { %3804 = vst [vmem:[#allocation62_spill] sm:$0xff] %v3046_v0 }
  0xcc   :  { %3805 = vst [vmem:[#allocation63_spill] sm:$0xff] %v3048_v53 }
  0xcd   :  { %3806 = vst [vmem:[#allocation64_spill] sm:$0xff] %v3050_v55 }
  0xce   :  { %3807 = vst [vmem:[#allocation65_spill] sm:$0xff] %v3052_v61 }
  0xd0   :  { %v251_v56 = vpop.f32.mrf.mxu2  ;;  %v292_v60 = vpop.f32.mrf.mxu3 }
  0xd1   :  { %v3055_v58 = vadd.f32 %v251_v56, %v2998_v63  ;;  %v3057_v1 = vadd.f32 %v292_v60, %v101_v2  ;;  %v416_v57 = vpop.f32.mrf.mxu0  ;;  %v436_v3 = vpop.f32.mrf.mxu1 }
  0xd2   :  { %v479_v0 = vadd.f32 %v416_v57, %v149_v59  ;;  %v480_v7 = vadd.f32 %v436_v3, %v190_v54  ;;  %v231_v57 = vadd.f32 %v2990_v34, %v2998_v63 }
  0xd3   :  { %3808 = vst [vmem:[#allocation66_spill] sm:$0xff] %v3055_v58 }
  0xd4   :  { %3809 = vst [vmem:[#allocation67_spill] sm:$0xff] %v3057_v1  ;;  %v2142_v53 = vmul.f32 -1.442695, %v479_v0  ;;  %v2143_v52 = vmul.f32 -1.442695, %v480_v7 }
  0xd6   :  { %2189 = vpow2.f32 %v2142_v53 }
  0xd7   :  { %2191 = vpow2.f32 %v2143_v52 }
  0xd8   :  { %v476_v4 = vpop.f32.mrf.mxu3  ;;  %v456_v60 = vpop.f32.mrf.mxu2 }
  0xd9   :  { %v482_v6 = vadd.f32 %v476_v4, %v272_v62  ;;  %v481_v53 = vadd.f32 %v456_v60, %v231_v57 }
  0xdb   :  { %v2144_v5 = vmul.f32 -1.442695, %v482_v6 }
  0xdc   :  { %v2190_v20 = vpop.eup %2189 }
  0xdd   :  { %v2192_v8 = vpop.eup %2191  ;;  %v486_v61 = vadd.f32 1.0, %v2190_v20  ;;  %2193 = vpow2.f32 %v2144_v5 }
  0xde   :  { %v505_v56 = vadd.f32 1.0, %v2192_v8 }
  0xdf   :  { %2195 = vrcp.f32 %v486_v61  ;;  %v498_v7 = vand.u32 2147483648, %v486_v61  ;;  %v496_v6 = vand.u32 2147483647, %v486_v61  ;;  %vm492_vm6 = vweird.f32 %v486_v61 }
  0xe0   :  { %2197 = vrcp.f32 %v505_v56  ;;  %v517_v62 = vand.u32 2147483648, %v505_v56  ;;  %v515_v20 = vand.u32 2147483647, %v505_v56  ;;  %vm511_vm7 = vweird.f32 %v505_v56 }
  0xe1   :  { %v499_v34 = vor.u32 1.1754944e-38, %v498_v7  ;;  %vm497_vm9 = vcmp.eq.f32.partialorder %v496_v6, 8.507059e+37 }
  0xe2   :  { %v518_v57 = vor.u32 1.1754944e-38, %v517_v62  ;;  %vm516_vm11 = vcmp.eq.f32.partialorder %v515_v20, 8.507059e+37 }
  0xe3   :  { %v2194_v58 = vpop.eup %2193 }
  0xe4   :  { %v525_v54 = vadd.f32 1.0, %v2194_v58 }
  0xe5   :  { %v2196_v0 = vpop.eup %2195 }
  0xe6   :  { %v2198_v2 = vpop.eup %2197  ;;  %v488_v52 = vmul.f32 %v2196_v0, %v486_v61  ;;  %2199 = vrcp.f32 %v525_v54  ;;  %vm493_vm4 = vweird.f32 %v2196_v0  ;;  %v537_v7 = vand.u32 2147483648, %v525_v54 }
  0xe7   :  { %v507_v47 = vmul.f32 %v2198_v2, %v505_v56  ;;  %2201 = vtanh.f32 %v481_v53  ;;  %vm512_vm5 = vweird.f32 %v2198_v2  ;;  %vm494_vm8 = vmor %vm492_vm6, %vm493_vm4  ;;  %vm531_vm14 = vweird.f32 %v525_v54 }
  0xe8   :  { %v489_v59 = vsub.f32 1.0, %v488_v52  ;;  %vm513_vm10 = vmor %vm511_vm7, %vm512_vm5  ;;  %v535_v62 = vand.u32 2147483647, %v525_v54  ;;  %v538_v6 = vor.u32 1.1754944e-38, %v537_v7 }
  0xe9   :  { %v508_v3 = vsub.f32 1.0, %v507_v47 }
  0xea   :  { %v490_v4 = vmul.f32 %v2196_v0, %v489_v59  ;;  %vm536_vm0 = vcmp.eq.f32.partialorder %v535_v62, 8.507059e+37 }
  0xeb   :  { %v509_v5 = vmul.f32 %v2198_v2, %v508_v3 }
  0xec   :  { %v2200_v8 = vpop.eup %2199  ;;  %v491_v63 = vadd.f32 %v2196_v0, %v490_v4  ;;  %v550_v4 = vpop.permute.xlu0 %549 }
  0xed   :  { %v510_v58 = vadd.f32 %v2198_v2, %v509_v5  ;;  %v527_v60 = vmul.f32 %v2200_v8, %v525_v54  ;;  %v2202_v53 = vpop.eup %2201  ;;  %vm551_vm12 = vcmp.eq.s32.totalorder %v550_v4, 1  ;;  %vm532_vm13 = vweird.f32 %v2200_v8 }
  0xee   :  { %v495_v52 = vsel %vm494_vm8, %v2196_v0, %v491_v63  ;;  %vm533_vm15 = vmor %vm531_vm14, %vm532_vm13 }
  0xef   :  { %v500_v47 = vsel %vm497_vm9, %v499_v34, %v495_v52  ;;  %v514_v59 = vsel %vm513_vm10, %v2198_v2, %v510_v58  ;;  %v528_v1 = vsub.f32 1.0, %v527_v60  ;;  %v3840_v58 = vmov 0  }
  0xf0   :  { %v519_v3 = vsel %vm516_vm11, %v518_v57, %v514_v59  ;;  %v542_v55 = vmul.f32 %v2202_v53, %v500_v47  ;;  %v3841_v47 = vld [vmem:[#allocation42_spill] sm:$0xff] }
  0xf1   :  { %v541_v50 = vmul.f32 0.0, %v519_v3  ;;  %v529_v51 = vmul.f32 %v2200_v8, %v528_v1 }
  0xf3   :  { %v543_v61 = vadd.f32 %v542_v55, %v541_v50  ;;  %v530_v56 = vadd.f32 %v2200_v8, %v529_v51 }
  0xf5   :  { %2203 = vtanh.f32 %v543_v61  ;;  %v3063_v0 = vsel %vm551_vm12, %v543_v61, 0.0  ;;  %v534_v2 = vsel %vm533_vm15, %v2200_v8, %v530_v56  ;;  %v3839_v8 = vld [vmem:[#allocation35_spill] sm:$0xff] }
  0xf6   :  { %v539_v20 = vsel %vm536_vm0, %v538_v6, %v534_v2  ;;  %vm870_vm1 = vcmp.gt.s32.totalorder %v3839_v8, 2  ;;  %vm1032_vm2 = vcmp.gt.s32.totalorder %v3839_v8, 3  ;;  %vm1680_vm8 = vcmp.gt.s32.totalorder %v3839_v8, 7  ;;  %v3202_v8 = vld [vmem:[#allocation3 + $0x198] sm:$0xff] }
  0xf7   :  { %v871_v60 = vsel %vm870_vm1, 1, %v3840_v58  ;;  %v1033_v7 = vsel %vm1032_vm2, 1, %v3840_v58 }
  0xf8   :  { %873 = vperm.xlu1 %2186, %v871_v60   ;;  %v3208_v60 = vld [vmem:[#allocation3 + $0x168] sm:$0xff] }
  0xfb   :  { %v2204_v5 = vpop.eup %2203 }
  0xfc   :  { %v545_v63 = vmul.f32 %v2204_v5, %v539_v20 }
  0xfe   :  { %2145 = vmatmul.msk.f32.vlgmr.msra.gmra.mxu0 %vm551_vm12, %v545_v63  ;;  %2146 = vmatmul.msk.f32.vlgmr.msra.gmra.mxu1 %vm551_vm12, %v545_v63  ;;  %v3068_v50 = vsel %vm551_vm12, %v545_v63, 0.0 }
  0xff   :  { %2147 = vmatmul.msk.f32.vlgmr.msra.gmra.mxu2 %vm551_vm12, %v545_v63  ;;  %2148 = vmatmul.msk.f32.vlgmr.msra.gmra.mxu3 %vm551_vm12, %v545_v63 }
 0x100   :  { %885 = vmatpush.msra.mxu0 %v2600_v9  ;;  %905 = vmatpush.msra.mxu1 %v2602_v10  ;;  %v3810_v9 = vld [vmem:[#allocation14_spill] sm:$0xff]  ;;  %v3811_v10 = vld [vmem:[#allocation13_spill] sm:$0xff] }
 0x101   :  { %925 = vmatpush.msra.mxu2 %v2618_v15  ;;  %945 = vmatpush.msra.mxu3 %v2606_v11  ;;  %v3812_v11 = vld [vmem:[#allocation15_spill] sm:$0xff] }
 0x102   :  { %886 = vmatpush.msra.mxu0 %v2610_v12  ;;  %906 = vmatpush.msra.mxu1 %v2612_v13  ;;  %v3813_v12 = vld [vmem:[#allocation16_spill] sm:$0xff]  ;;  %v3814_v13 = vld [vmem:[#allocation18_spill] sm:$0xff]  ;;  %v3816_v15 = vld [vmem:[#allocation19_spill] sm:$0xff] }
 0x103   :  { %926 = vmatpush.msra.mxu2 %v2626_v18  ;;  %946 = vmatpush.msra.mxu3 %v2616_v14  ;;  %v3815_v14 = vld [vmem:[#allocation17_spill] sm:$0xff] }
 0x104   :  { %887 = vmatpush.msra.mxu0 %v2621_v16  ;;  %907 = vmatpush.msra.mxu1 %v2623_v17  ;;  %v3817_v16 = vld [vmem:[#allocation20_spill] sm:$0xff]  ;;  %v3818_v17 = vld [vmem:[#allocation22_spill] sm:$0xff]  ;;  %v3819_v18 = vld [vmem:[#allocation21_spill] sm:$0xff] }
 0x105   :  { %927 = vmatpush.msra.mxu2 %v2637_v21  ;;  %947 = vmatpush.msra.mxu3 %v2630_v19  ;;  %v3820_v19 = vld [vmem:[#allocation23_spill] sm:$0xff]  ;;  %v3821_v21 = vld [vmem:[#allocation24_spill] sm:$0xff] }
 0x106   :  { %888 = vmatpush.msra.mxu0 %v2641_v22  ;;  %908 = vmatpush.msra.mxu1 %v2643_v23  ;;  %v3822_v22 = vld [vmem:[#allocation26_spill] sm:$0xff]  ;;  %v3823_v23 = vld [vmem:[#allocation25_spill] sm:$0xff] }
 0x107   :  { %928 = vmatpush.msra.mxu2 %v2651_v25  ;;  %948 = vmatpush.msra.mxu3 %v2649_v24  ;;  %v3824_v24 = vld [vmem:[#allocation27_spill] sm:$0xff]  ;;  %v3825_v25 = vld [vmem:[#allocation28_spill] sm:$0xff] }
 0x108   :  { %889 = vmatpush.msra.mxu0 %v2655_v26  ;;  %909 = vmatpush.msra.mxu1 %v2657_v27  ;;  %v3826_v26 = vld [vmem:[#allocation30_spill] sm:$0xff]  ;;  %v3827_v27 = vld [vmem:[#allocation29_spill] sm:$0xff] }
 0x109   :  { %929 = vmatpush.msra.mxu2 %v2663_v29  ;;  %949 = vmatpush.msra.mxu3 %v2661_v28  ;;  %v3828_v28 = vld [vmem:[#allocation31_spill] sm:$0xff]  ;;  %v3829_v29 = vld [vmem:[#allocation32_spill] sm:$0xff] }
 0x10a   :  { %890 = vmatpush.msra.mxu0 %v2666_v30  ;;  %910 = vmatpush.msra.mxu1 %v2668_v31  ;;  %v3830_v30 = vld [vmem:[#allocation33_spill] sm:$0xff]  ;;  %v3831_v31 = vld [vmem:[#allocation34_spill] sm:$0xff] }
 0x10b   :  { %930 = vmatpush.msra.mxu2 %v2675_v33  ;;  %950 = vmatpush.msra.mxu3 %v2673_v32  ;;  %v3832_v32 = vld [vmem:[#allocation36_spill] sm:$0xff]  ;;  %v3833_v33 = vld [vmem:[#allocation37_spill] sm:$0xff] }
 0x10c   :  { %891 = vmatpush.msra.mxu0 %v2684_v35  ;;  %911 = vmatpush.msra.mxu1 %v2686_v36  ;;  %v3834_v35 = vld [vmem:[#allocation38_spill] sm:$0xff]  ;;  %v3835_v36 = vld [vmem:[#allocation39_spill] sm:$0xff] }
 0x10d   :  { %931 = vmatpush.msra.mxu2 %v2694_v38  ;;  %951 = vmatpush.msra.mxu3 %v2692_v37 }
 0x10e   :  { %892 = vmatpush.msra.mxu0 %v2698_v39  ;;  %912 = vmatpush.msra.mxu1 %v2700_v40  ;;  %v3836_v39 = vld [vmem:[#allocation40_spill] sm:$0xff] }
 0x10f   :  { %932 = vmatpush.msra.mxu2 %v2706_v42  ;;  %952 = vmatpush.msra.mxu3 %v2704_v41  ;;  %v3837_v41 = vld [vmem:[#allocation41_spill] sm:$0xff] }
 0x110   :  { %893 = vmatpush.msra.mxu0 %v2709_v43  ;;  %913 = vmatpush.msra.mxu1 %v2711_v44 }
 0x111   :  { %933 = vmatpush.msra.mxu2 %v2718_v46  ;;  %953 = vmatpush.msra.mxu3 %v2716_v45  ;;  %v3838_v46 = vld [vmem:[#allocation43_spill] sm:$0xff] }
 0x112   :  { %894 = vmatpush.msra.mxu0 %v2727_v48  ;;  %914 = vmatpush.msra.mxu1 %v2729_v49 }
 0x113   :  { %934 = vmatpush.msra.mxu2 %v3810_v9  ;;  %954 = vmatpush.msra.mxu3 %v3811_v10 }
 0x114   :  { %895 = vmatpush.msra.mxu0 %v3812_v11  ;;  %915 = vmatpush.msra.mxu1 %v3813_v12 }
 0x115   :  { %935 = vmatpush.msra.mxu2 %v3814_v13  ;;  %955 = vmatpush.msra.mxu3 %v3815_v14 }
 0x116   :  { %896 = vmatpush.msra.mxu0 %v3816_v15  ;;  %916 = vmatpush.msra.mxu1 %v3817_v16 }
 0x117   :  { %936 = vmatpush.msra.mxu2 %v3818_v17  ;;  %956 = vmatpush.msra.mxu3 %v3819_v18 }
 0x118   :  { %897 = vmatpush.msra.mxu0 %v3820_v19  ;;  %917 = vmatpush.msra.mxu1 %v3821_v21 }
 0x119   :  { %937 = vmatpush.msra.mxu2 %v3822_v22  ;;  %957 = vmatpush.msra.mxu3 %v3823_v23 }
 0x11a   :  { %898 = vmatpush.msra.mxu0 %v3824_v24  ;;  %918 = vmatpush.msra.mxu1 %v3825_v25  ;;  %v1681_v24 = vsel %vm1680_vm8, 1, %v3840_v58  ;;  %v3340_v58 = vld [vmem:[#allocation3 + $0x8] sm:$0xff] }
 0x11b   :  { %938 = vmatpush.msra.mxu2 %v3826_v26  ;;  %958 = vmatpush.msra.mxu3 %v3827_v27  ;;  %v712_v27 = vpop.permute.xlu0 %711  ;;  %3867 = vst [vmem:[#allocation39_spill] sm:$0xff] %v3340_v58 }
 0x11c   :  { %899 = vmatpush.msra.mxu0 %v3828_v28  ;;  %919 = vmatpush.msra.mxu1 %v3829_v29  ;;  %vm713_vm12 = vcmp.eq.s32.totalorder %v712_v27, 1  ;;  %v3310_v27 = vld [vmem:[#allocation3 + $0x78] sm:$0xff] }
 0x11d   :  { %939 = vmatpush.msra.mxu2 %v3830_v30  ;;  %959 = vmatpush.msra.mxu3 %v3831_v31  ;;  %3857 = vst [vmem:[#allocation28_spill] sm:$0xff] %v3310_v27 }
 0x11e   :  { %900 = vmatpush.msra.mxu0 %v3832_v32  ;;  %920 = vmatpush.msra.mxu1 %v3833_v33 }
 0x11f   :  { %940 = vmatpush.msra.mxu2 %v3834_v35  ;;  %960 = vmatpush.msra.mxu3 %v3835_v36 }
 0x120   :  { %1035 = vperm.xlu1 %2186, %v1033_v7   ;;  %v3238_v7 = vld [vmem:[#allocation3 + $0x138] sm:$0xff] }
 0x128   :  { %1683 = vperm.xlu1 %2186, %v1681_v24   ;;  %v3301_v24 = vld [vmem:[#allocation3 + $0x60] sm:$0xff] }
 0x129   :  { %3854 = vst [vmem:[#allocation26_spill] sm:$0xff] %v3301_v24 }
 0x17b   :  { %v578_v37 = vpop.f32.mrf.mxu0  ;;  %v598_v38 = vpop.f32.mrf.mxu1 }
 0x17c   :  { %v641_v40 = vadd.f32 %v578_v37, %v3836_v39  ;;  %v642_v42 = vadd.f32 %v598_v38, %v3837_v41  ;;  %v3163_v41 = vld [vmem:[#allocation3 + $0x1f0] sm:$0xff] }
 0x17e   :  { %v2149_v43 = vmul.f32 -1.442695, %v641_v40  ;;  %v2150_v44 = vmul.f32 -1.442695, %v642_v42  ;;  %v3160_v40 = vld [vmem:[#allocation3 + $0x1e8] sm:$0xff]  ;;  %v3169_v42 = vld [vmem:[#allocation3 + $0x1c0] sm:$0xff] }
 0x180   :  { %2205 = vpow2.f32 %v2149_v43  ;;  %v3172_v43 = vld [vmem:[#allocation3 + $0x1c8] sm:$0xff] }
 0x181   :  { %2207 = vpow2.f32 %v2150_v44  ;;  %v3175_v44 = vld [vmem:[#allocation3 + $0x1d0] sm:$0xff] }
 0x182   :  { %v638_v45 = vpop.f32.mrf.mxu3  ;;  %v618_v34 = vpop.f32.mrf.mxu2 }
 0x183   :  { %v644_v48 = vadd.f32 %v638_v45, %v3838_v46  ;;  %v643_v59 = vadd.f32 %v618_v34, %v3841_v47  ;;  %v3178_v45 = vld [vmem:[#allocation3 + $0x1d8] sm:$0xff]  ;;  %v3181_v46 = vld [vmem:[#allocation3 + $0x1a0] sm:$0xff]  ;;  %v3220_v47 = vld [vmem:[#allocation3 + $0x148] sm:$0xff] }
 0x184   :  { %v3205_v34 = vld [vmem:[#allocation3 + $0x160] sm:$0xff] }
 0x185   :  { %v2151_v49 = vmul.f32 -1.442695, %v644_v48  ;;  %v3184_v48 = vld [vmem:[#allocation3 + $0x1a8] sm:$0xff] }
 0x186   :  { %v2206_v51 = vpop.eup %2205 }
 0x187   :  { %v2208_v55 = vpop.eup %2207  ;;  %v648_v1 = vadd.f32 1.0, %v2206_v51  ;;  %2209 = vpow2.f32 %v2151_v49  ;;  %v3187_v49 = vld [vmem:[#allocation3 + $0x1b0] sm:$0xff]  ;;  %v3190_v51 = vld [vmem:[#allocation3 + $0x1b8] sm:$0xff] }
 0x188   :  { %v667_v54 = vadd.f32 1.0, %v2208_v55  ;;  %v3193_v55 = vld [vmem:[#allocation3 + $0x180] sm:$0xff] }
 0x189   :  { %2211 = vrcp.f32 %v648_v1  ;;  %v660_v2 = vand.u32 2147483648, %v648_v1  ;;  %v658_v20 = vand.u32 2147483647, %v648_v1  ;;  %vm654_vm6 = vweird.f32 %v648_v1 }
 0x18a   :  { %2213 = vrcp.f32 %v667_v54  ;;  %v679_v6 = vand.u32 2147483648, %v667_v54  ;;  %v677_v9 = vand.u32 2147483647, %v667_v54  ;;  %vm673_vm5 = vweird.f32 %v667_v54 }
 0x18b   :  { %v661_v12 = vor.u32 1.1754944e-38, %v660_v2  ;;  %vm659_vm10 = vcmp.eq.f32.partialorder %v658_v20, 8.507059e+37  ;;  %v3244_v2 = vld [vmem:[#allocation3 + $0x108] sm:$0xff]  ;;  %v3253_v20 = vld [vmem:[#allocation3 + $0xe0] sm:$0xff] }
 0x18c   :  { %v680_v15 = vor.u32 1.1754944e-38, %v679_v6  ;;  %vm678_vm11 = vcmp.eq.f32.partialorder %v677_v9, 8.507059e+37  ;;  %v3247_v6 = vld [vmem:[#allocation3 + $0x110] sm:$0xff] }
 0x18d   :  { %v2210_v57 = vpop.eup %2209  ;;  %v3259_v9 = vld [vmem:[#allocation3 + $0xf0] sm:$0xff] }
 0x18e   :  { %v687_v52 = vadd.f32 1.0, %v2210_v57  ;;  %v3211_v57 = vld [vmem:[#allocation3 + $0x170] sm:$0xff] }
 0x18f   :  { %v2212_v53 = vpop.eup %2211 }
 0x190   :  { %v2214_v3 = vpop.eup %2213  ;;  %v650_v4 = vmul.f32 %v2212_v53, %v648_v1  ;;  %2215 = vrcp.f32 %v687_v52  ;;  %vm655_vm3 = vweird.f32 %v2212_v53  ;;  %v699_v30 = vand.u32 2147483648, %v687_v52  ;;  %v3196_v1 = vld [vmem:[#allocation3 + $0x188] sm:$0xff] }
 0x191   :  { %v669_v61 = vmul.f32 %v2214_v3, %v667_v54  ;;  %2217 = vtanh.f32 %v643_v59  ;;  %vm674_vm4 = vweird.f32 %v2214_v3  ;;  %vm656_vm7 = vmor %vm654_vm6, %vm655_vm3  ;;  %vm693_vm14 = vweird.f32 %v687_v52  ;;  %v3199_v54 = vld [vmem:[#allocation3 + $0x190] sm:$0xff] }
 0x192   :  { %v651_v56 = vsub.f32 1.0, %v650_v4  ;;  %vm675_vm9 = vmor %vm673_vm5, %vm674_vm4  ;;  %v697_v32 = vand.u32 2147483647, %v687_v52  ;;  %v700_v35 = vor.u32 1.1754944e-38, %v699_v30  ;;  %v3223_v59 = vld [vmem:[#allocation3 + $0x150] sm:$0xff]  ;;  %v3229_v4 = vld [vmem:[#allocation3 + $0x120] sm:$0xff] }
 0x193   :  { %v670_v62 = vsub.f32 1.0, %v669_v61  ;;  %v3232_v61 = vld [vmem:[#allocation3 + $0x128] sm:$0xff]  ;;  %v3319_v30 = vld [vmem:[#allocation3 + $0x50] sm:$0xff] }
 0x194   :  { %v652_v5 = vmul.f32 %v2212_v53, %v651_v56  ;;  %vm698_vm0 = vcmp.eq.f32.partialorder %v697_v32, 8.507059e+37  ;;  %v3235_v56 = vld [vmem:[#allocation3 + $0x130] sm:$0xff]  ;;  %3860 = vst [vmem:[#allocation31_spill] sm:$0xff] %v3319_v30  ;;  %v3322_v32 = vld [vmem:[#allocation3 + $0x58] sm:$0xff] }
 0x195   :  { %v671_v63 = vmul.f32 %v2214_v3, %v670_v62  ;;  %v3241_v62 = vld [vmem:[#allocation3 + $0x100] sm:$0xff]  ;;  %3861 = vst [vmem:[#allocation32_spill] sm:$0xff] %v3322_v32 }
 0x196   :  { %v2216_v10 = vpop.eup %2215  ;;  %v653_v11 = vadd.f32 %v2212_v53, %v652_v5  ;;  %v3250_v5 = vld [vmem:[#allocation3 + $0x118] sm:$0xff] }
 0x197   :  { %v672_v13 = vadd.f32 %v2214_v3, %v671_v63  ;;  %v689_v14 = vmul.f32 %v2216_v10, %v687_v52  ;;  %v2218_v17 = vpop.eup %2217  ;;  %vm694_vm13 = vweird.f32 %v2216_v10  ;;  %v3214_v52 = vld [vmem:[#allocation3 + $0x178] sm:$0xff]  ;;  %v3256_v63 = vld [vmem:[#allocation3 + $0xe8] sm:$0xff] }
 0x198   :  { %v657_v16 = vsel %vm656_vm7, %v2212_v53, %v653_v11  ;;  %vm695_vm15 = vmor %vm693_vm14, %vm694_vm13  ;;  %v3217_v53 = vld [vmem:[#allocation3 + $0x140] sm:$0xff] }
 0x199   :  { %v662_v18 = vsel %vm659_vm10, %v661_v12, %v657_v16  ;;  %v676_v19 = vsel %vm675_vm9, %v2214_v3, %v672_v13  ;;  %v690_v21 = vsub.f32 1.0, %v689_v14  ;;  %v3226_v3 = vld [vmem:[#allocation3 + $0x158] sm:$0xff]  ;;  %v3265_v11 = vld [vmem:[#allocation3 + $0xc0] sm:$0xff]  ;;  %v3268_v12 = vld [vmem:[#allocation3 + $0xc8] sm:$0xff] }
 0x19a   :  { %v681_v22 = vsel %vm678_vm11, %v680_v15, %v676_v19  ;;  %v704_v23 = vmul.f32 %v2218_v17, %v662_v18  ;;  %3842 = vst [vmem:[#allocation14_spill] sm:$0xff] %v3265_v11  ;;  %v3271_v13 = vld [vmem:[#allocation3 + $0xd0] sm:$0xff]  ;;  %v3274_v14 = vld [vmem:[#allocation3 + $0xd8] sm:$0xff]  ;;  %v3277_v15 = vld [vmem:[#allocation3 + $0xa0] sm:$0xff] }
 0x19b   :  { %v703_v25 = vmul.f32 %v681_v22, %v3063_v0  ;;  %v691_v26 = vmul.f32 %v2216_v10, %v690_v21  ;;  %3843 = vst [vmem:[#allocation13_spill] sm:$0xff] %v3268_v12  ;;  %v3280_v16 = vld [vmem:[#allocation3 + $0xa8] sm:$0xff]  ;;  %v3283_v17 = vld [vmem:[#allocation3 + $0xb0] sm:$0xff]  ;;  %v3286_v18 = vld [vmem:[#allocation3 + $0xb8] sm:$0xff] }
 0x19c   :  { %3844 = vst [vmem:[#allocation15_spill] sm:$0xff] %v3271_v13  ;;  %v3289_v19 = vld [vmem:[#allocation3 + $0x80] sm:$0xff]  ;;  %v3292_v21 = vld [vmem:[#allocation3 + $0x88] sm:$0xff]  ;;  %v3295_v22 = vld [vmem:[#allocation3 + $0x90] sm:$0xff] }
 0x19d   :  { %v705_v28 = vadd.f32 %v704_v23, %v703_v25  ;;  %v692_v29 = vadd.f32 %v2216_v10, %v691_v26  ;;  %3845 = vst [vmem:[#allocation16_spill] sm:$0xff] %v3274_v14  ;;  %v3298_v23 = vld [vmem:[#allocation3 + $0x98] sm:$0xff]  ;;  %v3304_v25 = vld [vmem:[#allocation3 + $0x68] sm:$0xff]  ;;  %v3307_v26 = vld [vmem:[#allocation3 + $0x70] sm:$0xff] }
 0x19e   :  { %3846 = vst [vmem:[#allocation18_spill] sm:$0xff] %v3277_v15 }
 0x19f   :  { %2219 = vtanh.f32 %v705_v28  ;;  %v3148_v31 = vsel %vm713_vm12, %v705_v28, %v3063_v0  ;;  %v696_v33 = vsel %vm695_vm15, %v2216_v10, %v692_v29  ;;  %v3157_v0 = vld [vmem:[#allocation3 + $0x1e0] sm:$0xff]  ;;  %v3262_v10 = vld [vmem:[#allocation3 + $0xf8] sm:$0xff]  ;;  %3847 = vst [vmem:[#allocation17_spill] sm:$0xff] %v3280_v16  ;;  %v3316_v29 = vld [vmem:[#allocation3 + $0x48] sm:$0xff] }
 0x1a0   :  { %v701_v37 = vsel %vm698_vm0, %v700_v35, %v696_v33  ;;  %3848 = vst [vmem:[#allocation19_spill] sm:$0xff] %v3283_v17  ;;  %v3313_v28 = vld [vmem:[#allocation3 + $0x40] sm:$0xff]  ;;  %v3328_v35 = vld [vmem:[#allocation3 + $0x28] sm:$0xff] }
 0x1a1   :  { %3849 = vst [vmem:[#allocation20_spill] sm:$0xff] %v3286_v18  ;;  %v3325_v33 = vld [vmem:[#allocation3 + $0x20] sm:$0xff] }
 0x1a2   :  { %3850 = vst [vmem:[#allocation22_spill] sm:$0xff] %v3289_v19 }
 0x1a3   :  { %3851 = vst [vmem:[#allocation21_spill] sm:$0xff] %v3292_v21 }
 0x1a4   :  { %3852 = vst [vmem:[#allocation23_spill] sm:$0xff] %v3295_v22 }
 0x1a5   :  { %v2220_v36 = vpop.eup %2219  ;;  %3853 = vst [vmem:[#allocation24_spill] sm:$0xff] %v3298_v23 }
 0x1a6   :  { %v707_v38 = vmul.f32 %v2220_v36, %v701_v37  ;;  %3855 = vst [vmem:[#allocation25_spill] sm:$0xff] %v3304_v25  ;;  %v3331_v36 = vld [vmem:[#allocation3 + $0x30] sm:$0xff]  ;;  %v3334_v37 = vld [vmem:[#allocation3 + $0x38] sm:$0xff] }
 0x1a7   :  { %3856 = vst [vmem:[#allocation27_spill] sm:$0xff] %v3307_v26 }
 0x1a8   :  { %v3151_v39 = vsel %vm713_vm12, %v707_v38, %v3068_v50  ;;  %v3166_v50 = vld [vmem:[#allocation3 + $0x1f8] sm:$0xff]  ;;  %3858 = vst [vmem:[#allocation30_spill] sm:$0xff] %v3313_v28  ;;  %v3337_v38 = vld [vmem:[#allocation3] sm:$0xff] }
 0x1a9   :  { %739 = vmatmul.f32.vlgmr.msrb.gmra.mxu0 %v3151_v39  ;;  %759 = vmatmul.f32.vlgmr.msrb.gmra.mxu1 %v3151_v39  ;;  %3859 = vst [vmem:[#allocation29_spill] sm:$0xff] %v3316_v29 }
 0x1aa   :  { %779 = vmatmul.f32.vlgmr.msrb.gmra.mxu2 %v3151_v39  ;;  %799 = vmatmul.f32.vlgmr.msrb.gmra.mxu3 %v3151_v39  ;;  %3862 = vst [vmem:[#allocation33_spill] sm:$0xff] %v3325_v33 }
 0x1ab   :  { %1047 = vmatpush.msrb.mxu0 %v3157_v0  ;;  %1067 = vmatpush.msrb.mxu1 %v3160_v40  ;;  %3863 = vst [vmem:[#allocation34_spill] sm:$0xff] %v3328_v35 }
 0x1ac   :  { %1087 = vmatpush.msrb.mxu2 %v3163_v41  ;;  %1107 = vmatpush.msrb.mxu3 %v3166_v50  ;;  %3864 = vst [vmem:[#allocation36_spill] sm:$0xff] %v3331_v36 }
 0x1ad   :  { %1048 = vmatpush.msrb.mxu0 %v3169_v42  ;;  %1068 = vmatpush.msrb.mxu1 %v3172_v43  ;;  %3865 = vst [vmem:[#allocation37_spill] sm:$0xff] %v3334_v37 }
 0x1ae   :  { %1088 = vmatpush.msrb.mxu2 %v3175_v44  ;;  %1108 = vmatpush.msrb.mxu3 %v3178_v45  ;;  %3866 = vst [vmem:[#allocation38_spill] sm:$0xff] %v3337_v38 }
 0x1af   :  { %1049 = vmatpush.msrb.mxu0 %v3181_v46  ;;  %1069 = vmatpush.msrb.mxu1 %v3184_v48 }
 0x1b0   :  { %1089 = vmatpush.msrb.mxu2 %v3187_v49  ;;  %1109 = vmatpush.msrb.mxu3 %v3190_v51 }
 0x1b1   :  { %1050 = vmatpush.msrb.mxu0 %v3193_v55  ;;  %1070 = vmatpush.msrb.mxu1 %v3196_v1 }
 0x1b2   :  { %1090 = vmatpush.msrb.mxu2 %v3199_v54  ;;  %1110 = vmatpush.msrb.mxu3 %v3202_v8 }
 0x1b3   :  { %1051 = vmatpush.msrb.mxu0 %v3205_v34  ;;  %1071 = vmatpush.msrb.mxu1 %v3208_v60 }
 0x1b4   :  { %1091 = vmatpush.msrb.mxu2 %v3211_v57  ;;  %1111 = vmatpush.msrb.mxu3 %v3214_v52 }
 0x1b5   :  { %1052 = vmatpush.msrb.mxu0 %v3217_v53  ;;  %1072 = vmatpush.msrb.mxu1 %v3220_v47 }
 0x1b6   :  { %1092 = vmatpush.msrb.mxu2 %v3223_v59  ;;  %1112 = vmatpush.msrb.mxu3 %v3226_v3 }
 0x1b7   :  { %1053 = vmatpush.msrb.mxu0 %v3229_v4  ;;  %1073 = vmatpush.msrb.mxu1 %v3232_v61 }
 0x1b8   :  { %1093 = vmatpush.msrb.mxu2 %v3235_v56  ;;  %1113 = vmatpush.msrb.mxu3 %v3238_v7 }
 0x1b9   :  { %1054 = vmatpush.msrb.mxu0 %v3241_v62  ;;  %1074 = vmatpush.msrb.mxu1 %v3244_v2 }
 0x1ba   :  { %1094 = vmatpush.msrb.mxu2 %v3247_v6  ;;  %1114 = vmatpush.msrb.mxu3 %v3250_v5 }
 0x1bb   :  { %1055 = vmatpush.msrb.mxu0 %v3253_v20  ;;  %1075 = vmatpush.msrb.mxu1 %v3256_v63 }
 0x1bc   :  { %1095 = vmatpush.msrb.mxu2 %v3259_v9  ;;  %1115 = vmatpush.msrb.mxu3 %v3262_v10 }
 0x1bd   :  { %1056 = vmatpush.msrb.mxu0 %v3265_v11  ;;  %1076 = vmatpush.msrb.mxu1 %v3268_v12  ;;  %v874_v12 = vpop.permute.xlu1 %873 }
 0x1be   :  { %1096 = vmatpush.msrb.mxu2 %v3271_v13  ;;  %1116 = vmatpush.msrb.mxu3 %v3274_v14  ;;  %vm875_vm9 = vcmp.eq.s32.totalorder %v874_v12, 1  ;;  %v3877_v12 = vld [vmem:[#allocation16_spill] sm:$0xff] }
 0x1bf   :  { %1057 = vmatpush.msrb.mxu0 %v3277_v15  ;;  %1077 = vmatpush.msrb.mxu1 %v3280_v16 }
 0x1c0   :  { %1097 = vmatpush.msrb.mxu2 %v3283_v17  ;;  %1117 = vmatpush.msrb.mxu3 %v3286_v18 }
 0x1c1   :  { %1058 = vmatpush.msrb.mxu0 %v3289_v19  ;;  %1078 = vmatpush.msrb.mxu1 %v3292_v21 }
 0x1c2   :  { %1098 = vmatpush.msrb.mxu2 %v3295_v22  ;;  %1118 = vmatpush.msrb.mxu3 %v3298_v23 }
 0x1c3   :  { %1059 = vmatpush.msrb.mxu0 %v3301_v24  ;;  %1079 = vmatpush.msrb.mxu1 %v3304_v25 }
 0x1c4   :  { %1099 = vmatpush.msrb.mxu2 %v3307_v26  ;;  %1119 = vmatpush.msrb.mxu3 %v3310_v27 }
 0x1c5   :  { %1060 = vmatpush.msrb.mxu0 %v3313_v28  ;;  %1080 = vmatpush.msrb.mxu1 %v3316_v29  ;;  %v3871_v29 = vld [vmem:[#allocation45_spill] sm:$0xff] }
 0x1c6   :  { %1100 = vmatpush.msrb.mxu2 %v3319_v30  ;;  %1120 = vmatpush.msrb.mxu3 %v3322_v32  ;;  %v3870_v30 = vld [vmem:[#allocation44_spill] sm:$0xff] }
 0x1c7   :  { %1061 = vmatpush.msrb.mxu0 %v3325_v33  ;;  %1081 = vmatpush.msrb.mxu1 %v3328_v35  ;;  %v3343_v33 = vld [vmem:[#allocation3 + $0x10] sm:$0xff]  ;;  %v3346_v35 = vld [vmem:[#allocation3 + $0x18] sm:$0xff] }
 0x1c8   :  { %1101 = vmatpush.msrb.mxu2 %v3331_v36  ;;  %1121 = vmatpush.msrb.mxu3 %v3334_v37  ;;  %3868 = vst [vmem:[#allocation40_spill] sm:$0xff] %v3343_v33 }
 0x1c9   :  { %1062 = vmatpush.msrb.mxu0 %v3337_v38  ;;  %1082 = vmatpush.msrb.mxu1 %v3340_v58  ;;  %3869 = vst [vmem:[#allocation41_spill] sm:$0xff] %v3346_v35  ;;  %v3872_v58 = vld [vmem:[#allocation47_spill] sm:$0xff] }
 0x1ca   :  { %1102 = vmatpush.msrb.mxu2 %v3343_v33  ;;  %1122 = vmatpush.msrb.mxu3 %v3346_v35 }
 0x226   :  { %v740_v36 = vpop.f32.mrf.mxu0  ;;  %v760_v32 = vpop.f32.mrf.mxu1 }
 0x227   :  { %v803_v37 = vadd.f32 %v740_v36, %v3870_v30  ;;  %v804_v28 = vadd.f32 %v760_v32, %v3871_v29  ;;  %v3873_v29 = vld [vmem:[#allocation46_spill] sm:$0xff] }
 0x229   :  { %v2152_v27 = vmul.f32 -1.442695, %v803_v37  ;;  %v2153_v38 = vmul.f32 -1.442695, %v804_v28 }
 0x22b   :  { %2221 = vpow2.f32 %v2152_v27 }
 0x22c   :  { %2223 = vpow2.f32 %v2153_v38 }
 0x22d   :  { %v800_v26 = vpop.f32.mrf.mxu3  ;;  %v780_v35 = vpop.f32.mrf.mxu2 }
 0x22e   :  { %v806_v25 = vadd.f32 %v800_v26, %v3872_v58  ;;  %v805_v32 = vadd.f32 %v780_v35, %v3873_v29 }
 0x230   :  { %v2154_v24 = vmul.f32 -1.442695, %v806_v25 }
 0x231   :  { %v2222_v23 = vpop.eup %2221 }
 0x232   :  { %v2224_v33 = vpop.eup %2223  ;;  %v810_v22 = vadd.f32 1.0, %v2222_v23  ;;  %2225 = vpow2.f32 %v2154_v24 }
 0x233   :  { %v829_v21 = vadd.f32 1.0, %v2224_v33 }
 0x234   :  { %2227 = vrcp.f32 %v810_v22  ;;  %v822_v25 = vand.u32 2147483648, %v810_v22  ;;  %v820_v23 = vand.u32 2147483647, %v810_v22  ;;  %vm816_vm3 = vweird.f32 %v810_v22 }
 0x235   :  { %2229 = vrcp.f32 %v829_v21  ;;  %v841_v24 = vand.u32 2147483648, %v829_v21  ;;  %v839_v18 = vand.u32 2147483647, %v829_v21  ;;  %vm835_vm5 = vweird.f32 %v829_v21 }
 0x236   :  { %v823_v35 = vor.u32 1.1754944e-38, %v822_v25  ;;  %vm821_vm6 = vcmp.eq.f32.partialorder %v820_v23, 8.507059e+37 }
 0x237   :  { %vm840_vm8 = vcmp.eq.f32.partialorder %v839_v18, 8.507059e+37 }
 0x238   :  { %v2226_v19 = vpop.eup %2225 }
 0x239   :  { %v849_v30 = vadd.f32 1.0, %v2226_v19 }
 0x23a   :  { %v2228_v36 = vpop.eup %2227 }
 0x23b   :  { %v2230_v28 = vpop.eup %2229  ;;  %v812_v27 = vmul.f32 %v2228_v36, %v810_v22  ;;  %2231 = vrcp.f32 %v849_v30  ;;  %vm817_vm1 = vweird.f32 %v2228_v36  ;;  %vm855_vm11 = vweird.f32 %v849_v30 }
 0x23c   :  { %v831_v37 = vmul.f32 %v2230_v28, %v829_v21  ;;  %2233 = vtanh.f32 %v805_v32  ;;  %vm836_vm2 = vweird.f32 %v2230_v28  ;;  %vm818_vm4 = vmor %vm816_vm3, %vm817_vm1  ;;  %v861_v21 = vand.u32 2147483648, %v849_v30 }
 0x23d   :  { %v813_v38 = vsub.f32 1.0, %v812_v27  ;;  %vm837_vm7 = vmor %vm835_vm5, %vm836_vm2  ;;  %v842_v27 = vor.u32 1.1754944e-38, %v841_v24  ;;  %v3880_v24 = vld [vmem:[#allocation19_spill] sm:$0xff] }
 0x23e   :  { %v832_v58 = vsub.f32 1.0, %v831_v37  ;;  %v862_v18 = vor.u32 1.1754944e-38, %v861_v21  ;;  %v3893_v21 = vld [vmem:[#allocation32_spill] sm:$0xff] }
 0x23f   :  { %v814_v26 = vmul.f32 %v2228_v36, %v813_v38 }
 0x240   :  { %v833_v33 = vmul.f32 %v2230_v28, %v832_v58 }
 0x241   :  { %v2232_v17 = vpop.eup %2231  ;;  %v815_v19 = vadd.f32 %v2228_v36, %v814_v26 }
 0x242   :  { %v851_v29 = vmul.f32 %v2232_v17, %v849_v30  ;;  %v834_v16 = vadd.f32 %v2230_v28, %v833_v33  ;;  %v2234_v32 = vpop.eup %2233  ;;  %vm856_vm10 = vweird.f32 %v2232_v17  ;;  %v3881_v33 = vld [vmem:[#allocation20_spill] sm:$0xff] }
 0x243   :  { %v819_v15 = vsel %vm818_vm4, %v2228_v36, %v815_v19  ;;  %vm857_vm12 = vmor %vm855_vm11, %vm856_vm10  ;;  %v3882_v19 = vld [vmem:[#allocation22_spill] sm:$0xff] }
 0x244   :  { %v824_v37 = vsel %vm821_vm6, %v823_v35, %v819_v15  ;;  %v852_v38 = vsub.f32 1.0, %v851_v29  ;;  %v838_v14 = vsel %vm837_vm7, %v2230_v28, %v834_v16  ;;  %v859_v15 = vand.u32 2147483647, %v849_v30  ;;  %v3879_v30 = vld [vmem:[#allocation17_spill] sm:$0xff]  ;;  %v3884_v29 = vld [vmem:[#allocation23_spill] sm:$0xff] }
 0x245   :  { %v866_v58 = vmul.f32 %v2234_v32, %v824_v37  ;;  %v843_v13 = vsel %vm840_vm8, %v842_v27, %v838_v14  ;;  %v3883_v35 = vld [vmem:[#allocation21_spill] sm:$0xff]  ;;  %v3885_v27 = vld [vmem:[#allocation24_spill] sm:$0xff]  ;;  %v3886_v32 = vld [vmem:[#allocation26_spill] sm:$0xff] }
 0x246   :  { %v853_v11 = vmul.f32 %v2232_v17, %v852_v38  ;;  %v865_v22 = vmul.f32 %v843_v13, %v3148_v31  ;;  %vm860_vm13 = vcmp.eq.f32.partialorder %v859_v15, 8.507059e+37  ;;  %v3887_v37 = vld [vmem:[#allocation25_spill] sm:$0xff]  ;;  %v3888_v38 = vld [vmem:[#allocation27_spill] sm:$0xff] }
 0x247   :  { %v3894_v15 = vld [vmem:[#allocation33_spill] sm:$0xff] }
 0x248   :  { %v867_v25 = vadd.f32 %v866_v58, %v865_v22  ;;  %v854_v26 = vadd.f32 %v2232_v17, %v853_v11  ;;  %v3876_v11 = vld [vmem:[#allocation15_spill] sm:$0xff]  ;;  %v3889_v58 = vld [vmem:[#allocation28_spill] sm:$0xff]  ;;  %v3890_v22 = vld [vmem:[#allocation30_spill] sm:$0xff] }
 0x24a   :  { %2235 = vtanh.f32 %v867_v25  ;;  %v3356_v36 = vsel %vm875_vm9, %v867_v25, %v3148_v31  ;;  %v858_v16 = vsel %vm857_vm12, %v2232_v17, %v854_v26  ;;  %v3874_v31 = vld [vmem:[#allocation14_spill] sm:$0xff]  ;;  %v3891_v25 = vld [vmem:[#allocation29_spill] sm:$0xff]  ;;  %v3892_v26 = vld [vmem:[#allocation31_spill] sm:$0xff] }
 0x24b   :  { %v863_v28 = vsel %vm860_vm13, %v862_v18, %v858_v16  ;;  %v3878_v17 = vld [vmem:[#allocation18_spill] sm:$0xff]  ;;  %v3896_v18 = vld [vmem:[#allocation36_spill] sm:$0xff] }
 0x24c   :  { %v3895_v16 = vld [vmem:[#allocation34_spill] sm:$0xff] }
 0x250   :  { %v2236_v14 = vpop.eup %2235 }
 0x251   :  { %v869_v23 = vmul.f32 %v2236_v14, %v863_v28  ;;  %v3897_v14 = vld [vmem:[#allocation37_spill] sm:$0xff]  ;;  %v3898_v28 = vld [vmem:[#allocation38_spill] sm:$0xff] }
 0x253   :  { %v3360_v13 = vsel %vm875_vm9, %v869_v23, %v3151_v39  ;;  %v3875_v39 = vld [vmem:[#allocation13_spill] sm:$0xff]  ;;  %v3899_v23 = vld [vmem:[#allocation39_spill] sm:$0xff] }
 0x254   :  { %901 = vmatmul.f32.vlgmr.msra.gmra.mxu0 %v3360_v13  ;;  %921 = vmatmul.f32.vlgmr.msra.gmra.mxu1 %v3360_v13 }
 0x255   :  { %941 = vmatmul.f32.vlgmr.msra.gmra.mxu2 %v3360_v13  ;;  %961 = vmatmul.f32.vlgmr.msra.gmra.mxu3 %v3360_v13 }
 0x256   :  { %1209 = vmatpush.msra.mxu0 %v3157_v0  ;;  %1229 = vmatpush.msra.mxu1 %v3160_v40 }
 0x257   :  { %1249 = vmatpush.msra.mxu2 %v3163_v41  ;;  %1269 = vmatpush.msra.mxu3 %v3166_v50 }
 0x258   :  { %1210 = vmatpush.msra.mxu0 %v3169_v42  ;;  %1230 = vmatpush.msra.mxu1 %v3172_v43 }
 0x259   :  { %1250 = vmatpush.msra.mxu2 %v3175_v44  ;;  %1270 = vmatpush.msra.mxu3 %v3178_v45 }
 0x25a   :  { %1211 = vmatpush.msra.mxu0 %v3181_v46  ;;  %1231 = vmatpush.msra.mxu1 %v3184_v48 }
 0x25b   :  { %1251 = vmatpush.msra.mxu2 %v3187_v49  ;;  %1271 = vmatpush.msra.mxu3 %v3190_v51 }
 0x25c   :  { %1212 = vmatpush.msra.mxu0 %v3193_v55  ;;  %1232 = vmatpush.msra.mxu1 %v3196_v1 }
 0x25d   :  { %1252 = vmatpush.msra.mxu2 %v3199_v54  ;;  %1272 = vmatpush.msra.mxu3 %v3202_v8 }
 0x25e   :  { %1213 = vmatpush.msra.mxu0 %v3205_v34  ;;  %1233 = vmatpush.msra.mxu1 %v3208_v60 }
 0x25f   :  { %1253 = vmatpush.msra.mxu2 %v3211_v57  ;;  %1273 = vmatpush.msra.mxu3 %v3214_v52 }
 0x260   :  { %1214 = vmatpush.msra.mxu0 %v3217_v53  ;;  %1234 = vmatpush.msra.mxu1 %v3220_v47 }
 0x261   :  { %1254 = vmatpush.msra.mxu2 %v3223_v59  ;;  %1274 = vmatpush.msra.mxu3 %v3226_v3 }
 0x262   :  { %1215 = vmatpush.msra.mxu0 %v3229_v4  ;;  %1235 = vmatpush.msra.mxu1 %v3232_v61 }
 0x263   :  { %1255 = vmatpush.msra.mxu2 %v3235_v56  ;;  %1275 = vmatpush.msra.mxu3 %v3238_v7 }
 0x264   :  { %1216 = vmatpush.msra.mxu0 %v3241_v62  ;;  %1236 = vmatpush.msra.mxu1 %v3244_v2 }
 0x265   :  { %1256 = vmatpush.msra.mxu2 %v3247_v6  ;;  %1276 = vmatpush.msra.mxu3 %v3250_v5 }
 0x266   :  { %1217 = vmatpush.msra.mxu0 %v3253_v20  ;;  %1237 = vmatpush.msra.mxu1 %v3256_v63 }
 0x267   :  { %1257 = vmatpush.msra.mxu2 %v3259_v9  ;;  %1277 = vmatpush.msra.mxu3 %v3262_v10 }
 0x268   :  { %1218 = vmatpush.msra.mxu0 %v3874_v31  ;;  %1238 = vmatpush.msra.mxu1 %v3875_v39 }
 0x269   :  { %1258 = vmatpush.msra.mxu2 %v3876_v11  ;;  %1278 = vmatpush.msra.mxu3 %v3877_v12 }
 0x26a   :  { %1219 = vmatpush.msra.mxu0 %v3878_v17  ;;  %1239 = vmatpush.msra.mxu1 %v3879_v30 }
 0x26b   :  { %1259 = vmatpush.msra.mxu2 %v3880_v24  ;;  %1279 = vmatpush.msra.mxu3 %v3881_v33 }
 0x26c   :  { %1220 = vmatpush.msra.mxu0 %v3882_v19  ;;  %1240 = vmatpush.msra.mxu1 %v3883_v35 }
 0x26d   :  { %1260 = vmatpush.msra.mxu2 %v3884_v29  ;;  %1280 = vmatpush.msra.mxu3 %v3885_v27 }
 0x26e   :  { %1221 = vmatpush.msra.mxu0 %v3886_v32  ;;  %1241 = vmatpush.msra.mxu1 %v3887_v37  ;;  %v3903_v37 = vld [vmem:[#allocation49_spill] sm:$0xff] }
 0x26f   :  { %1261 = vmatpush.msra.mxu2 %v3888_v38  ;;  %1281 = vmatpush.msra.mxu3 %v3889_v58  ;;  %v3900_v58 = vld [vmem:[#allocation40_spill] sm:$0xff] }
 0x270   :  { %1222 = vmatpush.msra.mxu0 %v3890_v22  ;;  %1242 = vmatpush.msra.mxu1 %v3891_v25  ;;  %v3901_v22 = vld [vmem:[#allocation41_spill] sm:$0xff]  ;;  %v3902_v38 = vld [vmem:[#allocation48_spill] sm:$0xff] }
 0x271   :  { %1262 = vmatpush.msra.mxu2 %v3892_v26  ;;  %1282 = vmatpush.msra.mxu3 %v3893_v21 }
 0x272   :  { %1223 = vmatpush.msra.mxu0 %v3894_v15  ;;  %1243 = vmatpush.msra.mxu1 %v3895_v16 }
 0x273   :  { %1263 = vmatpush.msra.mxu2 %v3896_v18  ;;  %1283 = vmatpush.msra.mxu3 %v3897_v14  ;;  %v3904_v14 = vld [vmem:[#allocation51_spill] sm:$0xff] }
 0x274   :  { %1224 = vmatpush.msra.mxu0 %v3898_v28  ;;  %1244 = vmatpush.msra.mxu1 %v3899_v23 }
 0x275   :  { %1264 = vmatpush.msra.mxu2 %v3900_v58  ;;  %1284 = vmatpush.msra.mxu3 %v3901_v22 }
 0x2d1   :  { %v902_v25 = vpop.f32.mrf.mxu0  ;;  %v922_v26 = vpop.f32.mrf.mxu1 }
 0x2d2   :  { %v965_v21 = vadd.f32 %v902_v25, %v3902_v38  ;;  %v966_v15 = vadd.f32 %v922_v26, %v3903_v37  ;;  %v2401_v38 = vld [vmem:[%s3640_s0] sm:$0xff]  ;;  %v3905_v25 = vmov 0  }
 0x2d3   :  { %vm1194_vm14 = vcmp.gt.s32.totalorder %v2401_v38, 4  ;;  %vm1356_vm15 = vcmp.gt.s32.totalorder %v2401_v38, 5 }
 0x2d4   :  { %v2155_v32 = vmul.f32 -1.442695, %v965_v21  ;;  %v2156_v16 = vmul.f32 -1.442695, %v966_v15 }
 0x2d6   :  { %2237 = vpow2.f32 %v2155_v32  ;;  %v1195_v32 = vsel %vm1194_vm14, 1, %v3905_v25 }
 0x2d7   :  { %2239 = vpow2.f32 %v2156_v16  ;;  %1197 = vperm.xlu2 %2187, %v1195_v32  }
 0x2d8   :  { %v962_v18 = vpop.f32.mrf.mxu3  ;;  %v942_v37 = vpop.f32.mrf.mxu2 }
 0x2d9   :  { %v968_v27 = vadd.f32 %v962_v18, %v3904_v14 }
 0x2db   :  { %v2157_v28 = vmul.f32 -1.442695, %v968_v27  ;;  %v3906_v27 = vld [vmem:[#allocation50_spill] sm:$0xff] }
 0x2dc   :  { %v2238_v29 = vpop.eup %2237  ;;  %v967_v16 = vadd.f32 %v942_v37, %v3906_v27 }
 0x2dd   :  { %v2240_v23 = vpop.eup %2239  ;;  %v972_v35 = vadd.f32 1.0, %v2238_v29  ;;  %2241 = vpow2.f32 %v2157_v28 }
 0x2de   :  { %v991_v58 = vadd.f32 1.0, %v2240_v23  ;;  %v1357_v23 = vsel %vm1356_vm15, 1, %v3905_v25 }
 0x2df   :  { %2243 = vrcp.f32 %v972_v35  ;;  %v984_v19 = vand.u32 2147483648, %v972_v35  ;;  %v982_v30 = vand.u32 2147483647, %v972_v35  ;;  %1359 = vperm.xlu2 %2187, %v1357_v23   ;;  %vm978_vm2 = vweird.f32 %v972_v35 }
 0x2e0   :  { %2245 = vrcp.f32 %v991_v58  ;;  %v1003_v33 = vand.u32 2147483648, %v991_v58  ;;  %vm997_vm3 = vweird.f32 %v991_v58 }
 0x2e1   :  { %v985_v27 = vor.u32 1.1754944e-38, %v984_v19  ;;  %vm983_vm6 = vcmp.eq.f32.partialorder %v982_v30, 8.507059e+37 }
 0x2e2   :  { %v1004_v25 = vor.u32 1.1754944e-38, %v1003_v33 }
 0x2e3   :  { %v2242_v26 = vpop.eup %2241 }
 0x2e4   :  { %v1011_v21 = vadd.f32 1.0, %v2242_v26  ;;  %v1001_v26 = vand.u32 2147483647, %v991_v58 }
 0x2e5   :  { %v2244_v15 = vpop.eup %2243 }
 0x2e6   :  { %v2246_v29 = vpop.eup %2245  ;;  %v974_v18 = vmul.f32 %v2244_v15, %v972_v35  ;;  %2247 = vrcp.f32 %v1011_v21  ;;  %vm979_vm0 = vweird.f32 %v2244_v15  ;;  %vm1002_vm7 = vcmp.eq.f32.partialorder %v1001_v26, 8.507059e+37  ;;  %v1036_v35 = vpop.permute.xlu1 %1035 }
 0x2e7   :  { %v993_v14 = vmul.f32 %v2246_v29, %v991_v58  ;;  %2249 = vtanh.f32 %v967_v16  ;;  %vm998_vm1 = vweird.f32 %v2246_v29  ;;  %vm980_vm4 = vmor %vm978_vm2, %vm979_vm0  ;;  %vm1037_vm8 = vcmp.eq.s32.totalorder %v1036_v35, 1  ;;  %v3922_v35 = vld [vmem:[#allocation30_spill] sm:$0xff] }
 0x2e8   :  { %v975_v28 = vsub.f32 1.0, %v974_v18  ;;  %vm999_vm5 = vmor %vm997_vm3, %vm998_vm1  ;;  %vm1017_vm10 = vweird.f32 %v1011_v21  ;;  %v1021_v30 = vand.u32 2147483647, %v1011_v21 }
 0x2e9   :  { %v994_v22 = vsub.f32 1.0, %v993_v14 }
 0x2ea   :  { %v976_v24 = vmul.f32 %v2244_v15, %v975_v28  ;;  %vm1022_vm12 = vcmp.eq.f32.partialorder %v1021_v30, 8.507059e+37  ;;  %v3926_v30 = vld [vmem:[#allocation33_spill] sm:$0xff] }
 0x2eb   :  { %v995_v32 = vmul.f32 %v2246_v29, %v994_v22 }
 0x2ec   :  { %v2248_v37 = vpop.eup %2247  ;;  %v977_v38 = vadd.f32 %v2244_v15, %v976_v24 }
 0x2ed   :  { %v996_v18 = vadd.f32 %v2246_v29, %v995_v32  ;;  %v1013_v17 = vmul.f32 %v2248_v37, %v1011_v21  ;;  %v2250_v16 = vpop.eup %2249  ;;  %vm1018_vm9 = vweird.f32 %v2248_v37  ;;  %v1023_v32 = vand.u32 2147483648, %v1011_v21  ;;  %v3910_v21 = vld [vmem:[#allocation18_spill] sm:$0xff] }
 0x2ee   :  { %v981_v14 = vsel %vm980_vm4, %v2244_v15, %v977_v38  ;;  %vm1019_vm11 = vmor %vm1017_vm10, %vm1018_vm9  ;;  %v3912_v38 = vld [vmem:[#allocation19_spill] sm:$0xff] }
 0x2ef   :  { %v986_v28 = vsel %vm983_vm6, %v985_v27, %v981_v14  ;;  %v1000_v12 = vsel %vm999_vm5, %v2246_v29, %v996_v18  ;;  %v1014_v22 = vsub.f32 1.0, %v1013_v17  ;;  %v1024_v17 = vor.u32 1.1754944e-38, %v1023_v32  ;;  %v3913_v27 = vld [vmem:[#allocation20_spill] sm:$0xff]  ;;  %v3914_v18 = vld [vmem:[#allocation22_spill] sm:$0xff]  ;;  %v3916_v14 = vld [vmem:[#allocation23_spill] sm:$0xff] }
 0x2f0   :  { %v1005_v11 = vsel %vm1002_vm7, %v1004_v25, %v1000_v12  ;;  %v1028_v39 = vmul.f32 %v2250_v16, %v986_v28  ;;  %v3915_v25 = vld [vmem:[#allocation21_spill] sm:$0xff]  ;;  %v3917_v16 = vld [vmem:[#allocation24_spill] sm:$0xff]  ;;  %v3918_v28 = vld [vmem:[#allocation26_spill] sm:$0xff] }
 0x2f1   :  { %v1027_v23 = vmul.f32 %v1005_v11, %v3356_v36  ;;  %v1015_v24 = vmul.f32 %v2248_v37, %v1014_v22  ;;  %v3919_v22 = vld [vmem:[#allocation25_spill] sm:$0xff]  ;;  %v3925_v32 = vld [vmem:[#allocation32_spill] sm:$0xff] }
 0x2f3   :  { %v1029_v58 = vadd.f32 %v1028_v39, %v1027_v23  ;;  %v1016_v19 = vadd.f32 %v2248_v37, %v1015_v24  ;;  %v3909_v39 = vld [vmem:[#allocation16_spill] sm:$0xff]  ;;  %v3920_v23 = vld [vmem:[#allocation27_spill] sm:$0xff] }
 0x2f4   :  { %v3921_v24 = vld [vmem:[#allocation28_spill] sm:$0xff] }
 0x2f5   :  { %2251 = vtanh.f32 %v1029_v58  ;;  %v3441_v33 = vsel %vm1037_vm8, %v1029_v58, %v3356_v36  ;;  %v1020_v15 = vsel %vm1019_vm11, %v2248_v37, %v1016_v19  ;;  %v3907_v36 = vld [vmem:[#allocation13_spill] sm:$0xff]  ;;  %v3924_v19 = vld [vmem:[#allocation31_spill] sm:$0xff] }
 0x2f6   :  { %v1025_v29 = vsel %vm1022_vm12, %v1024_v17, %v1020_v15  ;;  %v3911_v37 = vld [vmem:[#allocation17_spill] sm:$0xff]  ;;  %v3927_v15 = vld [vmem:[#allocation34_spill] sm:$0xff]  ;;  %v3928_v17 = vld [vmem:[#allocation36_spill] sm:$0xff] }
 0x2f7   :  { %v3923_v58 = vld [vmem:[#allocation29_spill] sm:$0xff] }
 0x2fb   :  { %v2252_v12 = vpop.eup %2251 }
 0x2fc   :  { %v1031_v11 = vmul.f32 %v2252_v12, %v1025_v29  ;;  %v3929_v12 = vld [vmem:[#allocation37_spill] sm:$0xff]  ;;  %v3930_v29 = vld [vmem:[#allocation38_spill] sm:$0xff] }
 0x2fe   :  { %v3444_v26 = vsel %vm1037_vm8, %v1031_v11, %v3360_v13  ;;  %v3908_v13 = vld [vmem:[#allocation15_spill] sm:$0xff] }
 0x2ff   :  { %1063 = vmatmul.f32.vlgmr.msrb.gmra.mxu0 %v3444_v26  ;;  %1083 = vmatmul.f32.vlgmr.msrb.gmra.mxu1 %v3444_v26  ;;  %v3931_v11 = vld [vmem:[#allocation39_spill] sm:$0xff] }
 0x300   :  { %1103 = vmatmul.f32.vlgmr.msrb.gmra.mxu2 %v3444_v26  ;;  %1123 = vmatmul.f32.vlgmr.msrb.gmra.mxu3 %v3444_v26 }
 0x301   :  { %1371 = vmatpush.msrb.mxu0 %v3157_v0  ;;  %1391 = vmatpush.msrb.mxu1 %v3160_v40 }
 0x302   :  { %1411 = vmatpush.msrb.mxu2 %v3163_v41  ;;  %1431 = vmatpush.msrb.mxu3 %v3166_v50 }
 0x303   :  { %1372 = vmatpush.msrb.mxu0 %v3169_v42  ;;  %1392 = vmatpush.msrb.mxu1 %v3172_v43 }
 0x304   :  { %1412 = vmatpush.msrb.mxu2 %v3175_v44  ;;  %1432 = vmatpush.msrb.mxu3 %v3178_v45 }
 0x305   :  { %1373 = vmatpush.msrb.mxu0 %v3181_v46  ;;  %1393 = vmatpush.msrb.mxu1 %v3184_v48 }
 0x306   :  { %1413 = vmatpush.msrb.mxu2 %v3187_v49  ;;  %1433 = vmatpush.msrb.mxu3 %v3190_v51 }
 0x307   :  { %1374 = vmatpush.msrb.mxu0 %v3193_v55  ;;  %1394 = vmatpush.msrb.mxu1 %v3196_v1 }
 0x308   :  { %1414 = vmatpush.msrb.mxu2 %v3199_v54  ;;  %1434 = vmatpush.msrb.mxu3 %v3202_v8 }
 0x309   :  { %1375 = vmatpush.msrb.mxu0 %v3205_v34  ;;  %1395 = vmatpush.msrb.mxu1 %v3208_v60 }
 0x30a   :  { %1415 = vmatpush.msrb.mxu2 %v3211_v57  ;;  %1435 = vmatpush.msrb.mxu3 %v3214_v52 }
 0x30b   :  { %1376 = vmatpush.msrb.mxu0 %v3217_v53  ;;  %1396 = vmatpush.msrb.mxu1 %v3220_v47 }
 0x30c   :  { %1416 = vmatpush.msrb.mxu2 %v3223_v59  ;;  %1436 = vmatpush.msrb.mxu3 %v3226_v3 }
 0x30d   :  { %1377 = vmatpush.msrb.mxu0 %v3229_v4  ;;  %1397 = vmatpush.msrb.mxu1 %v3232_v61 }
 0x30e   :  { %1417 = vmatpush.msrb.mxu2 %v3235_v56  ;;  %1437 = vmatpush.msrb.mxu3 %v3238_v7 }
 0x30f   :  { %1378 = vmatpush.msrb.mxu0 %v3241_v62  ;;  %1398 = vmatpush.msrb.mxu1 %v3244_v2 }
 0x310   :  { %1418 = vmatpush.msrb.mxu2 %v3247_v6  ;;  %1438 = vmatpush.msrb.mxu3 %v3250_v5 }
 0x311   :  { %1379 = vmatpush.msrb.mxu0 %v3253_v20  ;;  %1399 = vmatpush.msrb.mxu1 %v3256_v63 }
 0x312   :  { %1419 = vmatpush.msrb.mxu2 %v3259_v9  ;;  %1439 = vmatpush.msrb.mxu3 %v3262_v10 }
 0x313   :  { %1380 = vmatpush.msrb.mxu0 %v3874_v31  ;;  %1400 = vmatpush.msrb.mxu1 %v3907_v36 }
 0x314   :  { %1420 = vmatpush.msrb.mxu2 %v3908_v13  ;;  %1440 = vmatpush.msrb.mxu3 %v3909_v39 }
 0x315   :  { %1381 = vmatpush.msrb.mxu0 %v3910_v21  ;;  %1401 = vmatpush.msrb.mxu1 %v3911_v37 }
 0x316   :  { %1421 = vmatpush.msrb.mxu2 %v3912_v38  ;;  %1441 = vmatpush.msrb.mxu3 %v3913_v27 }
 0x317   :  { %1382 = vmatpush.msrb.mxu0 %v3914_v18  ;;  %1402 = vmatpush.msrb.mxu1 %v3915_v25 }
 0x318   :  { %1422 = vmatpush.msrb.mxu2 %v3916_v14  ;;  %1442 = vmatpush.msrb.mxu3 %v3917_v16 }
 0x319   :  { %1383 = vmatpush.msrb.mxu0 %v3918_v28  ;;  %1403 = vmatpush.msrb.mxu1 %v3919_v22  ;;  %v3935_v22 = vld [vmem:[#allocation53_spill] sm:$0xff] }
 0x31a   :  { %1423 = vmatpush.msrb.mxu2 %v3920_v23  ;;  %1443 = vmatpush.msrb.mxu3 %v3921_v24  ;;  %v3932_v24 = vld [vmem:[#allocation40_spill] sm:$0xff] }
 0x31b   :  { %1384 = vmatpush.msrb.mxu0 %v3922_v35  ;;  %1404 = vmatpush.msrb.mxu1 %v3923_v58  ;;  %v3933_v35 = vld [vmem:[#allocation41_spill] sm:$0xff]  ;;  %v3934_v23 = vld [vmem:[#allocation52_spill] sm:$0xff] }
 0x31c   :  { %1424 = vmatpush.msrb.mxu2 %v3924_v19  ;;  %1444 = vmatpush.msrb.mxu3 %v3925_v32 }
 0x31d   :  { %1385 = vmatpush.msrb.mxu0 %v3926_v30  ;;  %1405 = vmatpush.msrb.mxu1 %v3927_v15 }
 0x31e   :  { %1425 = vmatpush.msrb.mxu2 %v3928_v17  ;;  %1445 = vmatpush.msrb.mxu3 %v3929_v12  ;;  %v3936_v12 = vld [vmem:[#allocation55_spill] sm:$0xff] }
 0x31f   :  { %1386 = vmatpush.msrb.mxu0 %v3930_v29  ;;  %1406 = vmatpush.msrb.mxu1 %v3931_v11 }
 0x320   :  { %1426 = vmatpush.msrb.mxu2 %v3932_v24  ;;  %1446 = vmatpush.msrb.mxu3 %v3933_v35 }
 0x331   :  { %v1198_v39 = vpop.permute.xlu2 %1197 }
 0x332   :  { %vm1199_vm5 = vcmp.eq.s32.totalorder %v1198_v39, 1 }
 0x37c   :  { %v1064_v58 = vpop.f32.mrf.mxu0  ;;  %v1084_v19 = vpop.f32.mrf.mxu1 }
 0x37d   :  { %v1127_v32 = vadd.f32 %v1064_v58, %v3934_v23  ;;  %v1128_v30 = vadd.f32 %v1084_v19, %v3935_v22  ;;  %v3937_v22 = vld [vmem:[#allocation54_spill] sm:$0xff] }
 0x37f   :  { %v2158_v28 = vmul.f32 -1.442695, %v1127_v32  ;;  %v2159_v15 = vmul.f32 -1.442695, %v1128_v30 }
 0x381   :  { %2253 = vpow2.f32 %v2158_v28 }
 0x382   :  { %2255 = vpow2.f32 %v2159_v15 }
 0x383   :  { %v1124_v17 = vpop.f32.mrf.mxu3  ;;  %v1104_v35 = vpop.f32.mrf.mxu2 }
 0x384   :  { %v1130_v16 = vadd.f32 %v1124_v17, %v3936_v12  ;;  %v1129_v19 = vadd.f32 %v1104_v35, %v3937_v22 }
 0x386   :  { %v2160_v29 = vmul.f32 -1.442695, %v1130_v16 }
 0x387   :  { %v2254_v14 = vpop.eup %2253 }
 0x388   :  { %v2256_v11 = vpop.eup %2255  ;;  %v1134_v25 = vadd.f32 1.0, %v2254_v14  ;;  %2257 = vpow2.f32 %v2160_v29 }
 0x389   :  { %v1153_v24 = vadd.f32 1.0, %v2256_v11 }
 0x38a   :  { %2259 = vrcp.f32 %v1134_v25  ;;  %v1146_v16 = vand.u32 2147483648, %v1134_v25  ;;  %v1144_v14 = vand.u32 2147483647, %v1134_v25  ;;  %vm1140_vm15 = vweird.f32 %v1134_v25 }
 0x38b   :  { %2261 = vrcp.f32 %v1153_v24  ;;  %v1165_v29 = vand.u32 2147483648, %v1153_v24  ;;  %v1163_v27 = vand.u32 2147483647, %v1153_v24  ;;  %vm1159_vm1 = vweird.f32 %v1153_v24 }
 0x38c   :  { %v1147_v35 = vor.u32 1.1754944e-38, %v1146_v16  ;;  %vm1145_vm2 = vcmp.eq.f32.partialorder %v1144_v14, 8.507059e+37 }
 0x38d   :  { %vm1164_vm4 = vcmp.eq.f32.partialorder %v1163_v27, 8.507059e+37 }
 0x38e   :  { %v2258_v18 = vpop.eup %2257 }
 0x38f   :  { %v1173_v23 = vadd.f32 1.0, %v2258_v18 }
 0x390   :  { %v2260_v58 = vpop.eup %2259 }
 0x391   :  { %v2262_v32 = vpop.eup %2261  ;;  %v1136_v28 = vmul.f32 %v2260_v58, %v1134_v25  ;;  %2263 = vrcp.f32 %v1173_v23  ;;  %vm1141_vm13 = vweird.f32 %v2260_v58  ;;  %vm1179_vm7 = vweird.f32 %v1173_v23 }
 0x392   :  { %v1155_v30 = vmul.f32 %v2262_v32, %v1153_v24  ;;  %2265 = vtanh.f32 %v1129_v19  ;;  %vm1160_vm14 = vweird.f32 %v2262_v32  ;;  %vm1142_vm0 = vmor %vm1140_vm15, %vm1141_vm13  ;;  %v1185_v24 = vand.u32 2147483648, %v1173_v23 }
 0x393   :  { %v1137_v15 = vsub.f32 1.0, %v1136_v28  ;;  %vm1161_vm3 = vmor %vm1159_vm1, %vm1160_vm14  ;;  %v1166_v28 = vor.u32 1.1754944e-38, %v1165_v29 }
 0x394   :  { %v1156_v17 = vsub.f32 1.0, %v1155_v30  ;;  %v1186_v27 = vor.u32 1.1754944e-38, %v1185_v24 }
 0x395   :  { %v1138_v12 = vmul.f32 %v2260_v58, %v1137_v15 }
 0x396   :  { %v1157_v11 = vmul.f32 %v2262_v32, %v1156_v17 }
 0x397   :  { %v2264_v38 = vpop.eup %2263  ;;  %v1139_v18 = vadd.f32 %v2260_v58, %v1138_v12 }
 0x398   :  { %v1175_v22 = vmul.f32 %v2264_v38, %v1173_v23  ;;  %v1158_v37 = vadd.f32 %v2262_v32, %v1157_v11  ;;  %v2266_v19 = vpop.eup %2265  ;;  %vm1180_vm6 = vweird.f32 %v2264_v38 }
 0x399   :  { %v1143_v21 = vsel %vm1142_vm0, %v2260_v58, %v1139_v18  ;;  %vm1181_vm8 = vmor %vm1179_vm7, %vm1180_vm6 }
 0x39a   :  { %v1148_v30 = vsel %vm1145_vm2, %v1147_v35, %v1143_v21  ;;  %v1176_v15 = vsub.f32 1.0, %v1175_v22  ;;  %v1162_v13 = vsel %vm1161_vm3, %v2262_v32, %v1158_v37  ;;  %v1183_v21 = vand.u32 2147483647, %v1173_v23 }
 0x39b   :  { %v1190_v17 = vmul.f32 %v2266_v19, %v1148_v30  ;;  %v1167_v36 = vsel %vm1164_vm4, %v1166_v28, %v1162_v13  ;;  %v3969_v19 = vld [vmem:[#allocation58_spill] sm:$0xff] }
 0x39c   :  { %v1177_v31 = vmul.f32 %v2264_v38, %v1176_v15  ;;  %v1189_v25 = vmul.f32 %v1167_v36, %v3441_v33  ;;  %vm1184_vm9 = vcmp.eq.f32.partialorder %v1183_v21, 8.507059e+37 }
 0x39e   :  { %v1191_v16 = vadd.f32 %v1190_v17, %v1189_v25  ;;  %v1178_v12 = vadd.f32 %v2264_v38, %v1177_v31 }
 0x3a0   :  { %2267 = vtanh.f32 %v1191_v16  ;;  %v3521_v58 = vsel %vm1199_vm5, %v1191_v16, %v3441_v33  ;;  %v1182_v37 = vsel %vm1181_vm8, %v2264_v38, %v1178_v12  ;;  %v3968_v33 = vld [vmem:[#allocation59_spill] sm:$0xff] }
 0x3a1   :  { %v1187_v32 = vsel %vm1184_vm9, %v1186_v27, %v1182_v37 }
 0x3a6   :  { %v2268_v13 = vpop.eup %2267 }
 0x3a7   :  { %v1193_v14 = vmul.f32 %v2268_v13, %v1187_v32 }
 0x3a9   :  { %v3525_v36 = vsel %vm1199_vm5, %v1193_v14, %v3444_v26 }
 0x3aa   :  { %1225 = vmatmul.f32.vlgmr.msra.gmra.mxu0 %v3525_v36  ;;  %1245 = vmatmul.f32.vlgmr.msra.gmra.mxu1 %v3525_v36 }
 0x3ab   :  { %1265 = vmatmul.f32.vlgmr.msra.gmra.mxu2 %v3525_v36  ;;  %1285 = vmatmul.f32.vlgmr.msra.gmra.mxu3 %v3525_v36 }
 0x3ac   :  { %1533 = vmatpush.msra.mxu0 %v3157_v0  ;;  %1553 = vmatpush.msra.mxu1 %v3160_v40  ;;  %v3938_v0 = vld [vmem:[#allocation14_spill] sm:$0xff]  ;;  %v3939_v40 = vld [vmem:[#allocation13_spill] sm:$0xff] }
 0x3ad   :  { %1573 = vmatpush.msra.mxu2 %v3163_v41  ;;  %1593 = vmatpush.msra.mxu3 %v3166_v50  ;;  %v3940_v41 = vld [vmem:[#allocation15_spill] sm:$0xff]  ;;  %v3941_v50 = vld [vmem:[#allocation16_spill] sm:$0xff] }
 0x3ae   :  { %1534 = vmatpush.msra.mxu0 %v3169_v42  ;;  %1554 = vmatpush.msra.mxu1 %v3172_v43  ;;  %v3942_v42 = vld [vmem:[#allocation18_spill] sm:$0xff]  ;;  %v3943_v43 = vld [vmem:[#allocation17_spill] sm:$0xff] }
 0x3af   :  { %1574 = vmatpush.msra.mxu2 %v3175_v44  ;;  %1594 = vmatpush.msra.mxu3 %v3178_v45  ;;  %v3944_v44 = vld [vmem:[#allocation19_spill] sm:$0xff]  ;;  %v3945_v45 = vld [vmem:[#allocation20_spill] sm:$0xff] }
 0x3b0   :  { %1535 = vmatpush.msra.mxu0 %v3181_v46  ;;  %1555 = vmatpush.msra.mxu1 %v3184_v48  ;;  %v3946_v46 = vld [vmem:[#allocation22_spill] sm:$0xff]  ;;  %v3947_v48 = vld [vmem:[#allocation21_spill] sm:$0xff] }
 0x3b1   :  { %1575 = vmatpush.msra.mxu2 %v3187_v49  ;;  %1595 = vmatpush.msra.mxu3 %v3190_v51  ;;  %v3948_v49 = vld [vmem:[#allocation23_spill] sm:$0xff]  ;;  %v3949_v51 = vld [vmem:[#allocation24_spill] sm:$0xff] }
 0x3b2   :  { %1536 = vmatpush.msra.mxu0 %v3193_v55  ;;  %1556 = vmatpush.msra.mxu1 %v3196_v1  ;;  %v3950_v55 = vld [vmem:[#allocation26_spill] sm:$0xff]  ;;  %v3951_v1 = vld [vmem:[#allocation25_spill] sm:$0xff] }
 0x3b3   :  { %1576 = vmatpush.msra.mxu2 %v3199_v54  ;;  %1596 = vmatpush.msra.mxu3 %v3202_v8  ;;  %v3952_v54 = vld [vmem:[#allocation27_spill] sm:$0xff]  ;;  %v3953_v8 = vld [vmem:[#allocation28_spill] sm:$0xff] }
 0x3b4   :  { %1537 = vmatpush.msra.mxu0 %v3205_v34  ;;  %1557 = vmatpush.msra.mxu1 %v3208_v60  ;;  %v3954_v34 = vld [vmem:[#allocation30_spill] sm:$0xff]  ;;  %v3955_v60 = vld [vmem:[#allocation29_spill] sm:$0xff] }
 0x3b5   :  { %1577 = vmatpush.msra.mxu2 %v3211_v57  ;;  %1597 = vmatpush.msra.mxu3 %v3214_v52  ;;  %v3956_v57 = vld [vmem:[#allocation31_spill] sm:$0xff]  ;;  %v3957_v52 = vld [vmem:[#allocation32_spill] sm:$0xff] }
 0x3b6   :  { %1538 = vmatpush.msra.mxu0 %v3217_v53  ;;  %1558 = vmatpush.msra.mxu1 %v3220_v47  ;;  %v3958_v53 = vld [vmem:[#allocation33_spill] sm:$0xff]  ;;  %v3959_v47 = vld [vmem:[#allocation34_spill] sm:$0xff] }
 0x3b7   :  { %1578 = vmatpush.msra.mxu2 %v3223_v59  ;;  %1598 = vmatpush.msra.mxu3 %v3226_v3  ;;  %v3960_v59 = vld [vmem:[#allocation36_spill] sm:$0xff]  ;;  %v3961_v3 = vld [vmem:[#allocation37_spill] sm:$0xff] }
 0x3b8   :  { %1539 = vmatpush.msra.mxu0 %v3229_v4  ;;  %1559 = vmatpush.msra.mxu1 %v3232_v61  ;;  %v3962_v4 = vld [vmem:[#allocation38_spill] sm:$0xff]  ;;  %v3963_v61 = vld [vmem:[#allocation39_spill] sm:$0xff] }
 0x3b9   :  { %1579 = vmatpush.msra.mxu2 %v3235_v56  ;;  %1599 = vmatpush.msra.mxu3 %v3238_v7  ;;  %v3964_v56 = vld [vmem:[#allocation40_spill] sm:$0xff]  ;;  %v3965_v7 = vld [vmem:[#allocation41_spill] sm:$0xff] }
 0x3ba   :  { %1540 = vmatpush.msra.mxu0 %v3241_v62  ;;  %1560 = vmatpush.msra.mxu1 %v3244_v2 }
 0x3bb   :  { %1580 = vmatpush.msra.mxu2 %v3247_v6  ;;  %1600 = vmatpush.msra.mxu3 %v3250_v5  ;;  %v3966_v6 = vld [vmem:[#allocation56_spill] sm:$0xff] }
 0x3bc   :  { %1541 = vmatpush.msra.mxu0 %v3253_v20  ;;  %1561 = vmatpush.msra.mxu1 %v3256_v63  ;;  %v3967_v20 = vld [vmem:[#allocation57_spill] sm:$0xff] }
 0x3bd   :  { %1581 = vmatpush.msra.mxu2 %v3259_v9  ;;  %1601 = vmatpush.msra.mxu3 %v3262_v10 }
 0x3be   :  { %1542 = vmatpush.msra.mxu0 %v3938_v0  ;;  %1562 = vmatpush.msra.mxu1 %v3939_v40 }
 0x3bf   :  { %1582 = vmatpush.msra.mxu2 %v3940_v41  ;;  %1602 = vmatpush.msra.mxu3 %v3941_v50 }
 0x3c0   :  { %1543 = vmatpush.msra.mxu0 %v3942_v42  ;;  %1563 = vmatpush.msra.mxu1 %v3943_v43 }
 0x3c1   :  { %1583 = vmatpush.msra.mxu2 %v3944_v44  ;;  %1603 = vmatpush.msra.mxu3 %v3945_v45 }
 0x3c2   :  { %1544 = vmatpush.msra.mxu0 %v3946_v46  ;;  %1564 = vmatpush.msra.mxu1 %v3947_v48 }
 0x3c3   :  { %1584 = vmatpush.msra.mxu2 %v3948_v49  ;;  %1604 = vmatpush.msra.mxu3 %v3949_v51 }
 0x3c4   :  { %1545 = vmatpush.msra.mxu0 %v3950_v55  ;;  %1565 = vmatpush.msra.mxu1 %v3951_v1  ;;  %v1360_v55 = vpop.permute.xlu2 %1359 }
 0x3c5   :  { %1585 = vmatpush.msra.mxu2 %v3952_v54  ;;  %1605 = vmatpush.msra.mxu3 %v3953_v8  ;;  %vm1361_vm2 = vcmp.eq.s32.totalorder %v1360_v55, 1 }
 0x3c6   :  { %1546 = vmatpush.msra.mxu0 %v3954_v34  ;;  %1566 = vmatpush.msra.mxu1 %v3955_v60 }
 0x3c7   :  { %1586 = vmatpush.msra.mxu2 %v3956_v57  ;;  %1606 = vmatpush.msra.mxu3 %v3957_v52 }
 0x3c8   :  { %1547 = vmatpush.msra.mxu0 %v3958_v53  ;;  %1567 = vmatpush.msra.mxu1 %v3959_v47 }
 0x3c9   :  { %1587 = vmatpush.msra.mxu2 %v3960_v59  ;;  %1607 = vmatpush.msra.mxu3 %v3961_v3 }
 0x3ca   :  { %1548 = vmatpush.msra.mxu0 %v3962_v4  ;;  %1568 = vmatpush.msra.mxu1 %v3963_v61 }
 0x3cb   :  { %1588 = vmatpush.msra.mxu2 %v3964_v56  ;;  %1608 = vmatpush.msra.mxu3 %v3965_v7  ;;  %v3970_v7 = vld [vmem:[#allocation60_spill] sm:$0xff] }
 0x427   :  { %v1226_v62 = vpop.f32.mrf.mxu0  ;;  %v1246_v2 = vpop.f32.mrf.mxu1 }
 0x428   :  { %v1289_v5 = vadd.f32 %v1226_v62, %v3966_v6  ;;  %v1290_v63 = vadd.f32 %v1246_v2, %v3967_v20  ;;  %v3971_v2 = vld [vmem:[#allocation61_spill] sm:$0xff] }
 0x42a   :  { %v2161_v9 = vmul.f32 -1.442695, %v1289_v5  ;;  %v2162_v10 = vmul.f32 -1.442695, %v1290_v63  ;;  %v3972_v63 = vld [vmem:[#allocation63_spill] sm:$0xff] }
 0x42c   :  { %2269 = vpow2.f32 %v2161_v9 }
 0x42d   :  { %2271 = vpow2.f32 %v2162_v10 }
 0x42e   :  { %v1286_v31 = vpop.f32.mrf.mxu3  ;;  %v1266_v18 = vpop.f32.mrf.mxu2 }
 0x42f   :  { %v1292_v26 = vadd.f32 %v1286_v31, %v3968_v33  ;;  %v1291_v30 = vadd.f32 %v1266_v18, %v3969_v19  ;;  %v3973_v18 = vld [vmem:[#allocation62_spill] sm:$0xff] }
 0x431   :  { %v2163_v39 = vmul.f32 -1.442695, %v1292_v26 }
 0x432   :  { %v2270_v38 = vpop.eup %2269 }
 0x433   :  { %v2272_v23 = vpop.eup %2271  ;;  %v1296_v29 = vadd.f32 1.0, %v2270_v38  ;;  %2273 = vpow2.f32 %v2163_v39 }
 0x434   :  { %v1315_v11 = vadd.f32 1.0, %v2272_v23 }
 0x435   :  { %2275 = vrcp.f32 %v1296_v29  ;;  %v1308_v24 = vand.u32 2147483648, %v1296_v29  ;;  %v1306_v27 = vand.u32 2147483647, %v1296_v29  ;;  %vm1302_vm12 = vweird.f32 %v1296_v29 }
 0x436   :  { %2277 = vrcp.f32 %v1315_v11  ;;  %v1327_v21 = vand.u32 2147483648, %v1315_v11  ;;  %v1325_v32 = vand.u32 2147483647, %v1315_v11  ;;  %vm1321_vm13 = vweird.f32 %v1315_v11 }
 0x437   :  { %v1309_v40 = vor.u32 1.1754944e-38, %v1308_v24  ;;  %vm1307_vm0 = vcmp.eq.f32.partialorder %v1306_v27, 8.507059e+37 }
 0x438   :  { %v1328_v42 = vor.u32 1.1754944e-38, %v1327_v21  ;;  %vm1326_vm1 = vcmp.eq.f32.partialorder %v1325_v32, 8.507059e+37 }
 0x439   :  { %v2274_v35 = vpop.eup %2273 }
 0x43a   :  { %v1335_v22 = vadd.f32 1.0, %v2274_v35 }
 0x43b   :  { %v2276_v28 = vpop.eup %2275 }
 0x43c   :  { %v2278_v15 = vpop.eup %2277  ;;  %v1298_v17 = vmul.f32 %v2276_v28, %v1296_v29  ;;  %2279 = vrcp.f32 %v1335_v22  ;;  %vm1303_vm10 = vweird.f32 %v2276_v28  ;;  %v1347_v60 = vand.u32 2147483648, %v1335_v22 }
 0x43d   :  { %v1317_v25 = vmul.f32 %v2278_v15, %v1315_v11  ;;  %2281 = vtanh.f32 %v1291_v30  ;;  %vm1322_vm11 = vweird.f32 %v2278_v15  ;;  %vm1304_vm14 = vmor %vm1302_vm12, %vm1303_vm10  ;;  %vm1341_vm4 = vweird.f32 %v1335_v22 }
 0x43e   :  { %v1299_v16 = vsub.f32 1.0, %v1298_v17  ;;  %vm1323_vm15 = vmor %vm1321_vm13, %vm1322_vm11  ;;  %v1345_v52 = vand.u32 2147483647, %v1335_v22  ;;  %v1348_v47 = vor.u32 1.1754944e-38, %v1347_v60 }
 0x43f   :  { %v1318_v12 = vsub.f32 1.0, %v1317_v25 }
 0x440   :  { %v1300_v37 = vmul.f32 %v2276_v28, %v1299_v16  ;;  %vm1346_vm6 = vcmp.eq.f32.partialorder %v1345_v52, 8.507059e+37 }
 0x441   :  { %v1319_v13 = vmul.f32 %v2278_v15, %v1318_v12 }
 0x442   :  { %v2280_v14 = vpop.eup %2279  ;;  %v1301_v0 = vadd.f32 %v2276_v28, %v1300_v37 }
 0x443   :  { %v1320_v41 = vadd.f32 %v2278_v15, %v1319_v13  ;;  %v1337_v50 = vmul.f32 %v2280_v14, %v1335_v22  ;;  %v2282_v44 = vpop.eup %2281  ;;  %vm1342_vm3 = vweird.f32 %v2280_v14 }
 0x444   :  { %v1305_v43 = vsel %vm1304_vm14, %v2276_v28, %v1301_v0  ;;  %vm1343_vm5 = vmor %vm1341_vm4, %vm1342_vm3 }
 0x445   :  { %v1310_v45 = vsel %vm1307_vm0, %v1309_v40, %v1305_v43  ;;  %v1324_v46 = vsel %vm1323_vm15, %v2278_v15, %v1320_v41  ;;  %v1338_v48 = vsub.f32 1.0, %v1337_v50 }
 0x446   :  { %v1329_v49 = vsel %vm1326_vm1, %v1328_v42, %v1324_v46  ;;  %v1352_v51 = vmul.f32 %v2282_v44, %v1310_v45  ;;  %v1522_v46 = vpop.permute.xlu0 %1521 }
 0x447   :  { %v1351_v1 = vmul.f32 %v1329_v49, %v3521_v58  ;;  %v1339_v54 = vmul.f32 %v2280_v14, %v1338_v48  ;;  %vm1523_vm15 = vcmp.eq.s32.totalorder %v1522_v46, 1 }
 0x449   :  { %v1353_v8 = vadd.f32 %v1352_v51, %v1351_v1  ;;  %v1340_v34 = vadd.f32 %v2280_v14, %v1339_v54 }
 0x44b   :  { %2283 = vtanh.f32 %v1353_v8  ;;  %v3601_v57 = vsel %vm1361_vm2, %v1353_v8, %v3521_v58  ;;  %v1344_v53 = vsel %vm1343_vm5, %v2280_v14, %v1340_v34 }
 0x44c   :  { %v1349_v3 = vsel %vm1346_vm6, %v1348_v47, %v1344_v53 }
 0x451   :  { %v2284_v59 = vpop.eup %2283 }
 0x452   :  { %v1355_v4 = vmul.f32 %v2284_v59, %v1349_v3  ;;  %v1748_v3 = vld [vmem:[#allocation6 + $0x1e8] sm:$0xff] }
 0x454   :  { %v3604_v61 = vsel %vm1361_vm2, %v1355_v4, %v3525_v36  ;;  %v1749_v4 = vld [vmem:[#allocation6 + $0x1f0] sm:$0xff] }
 0x455   :  { %1387 = vmatmul.f32.vlgmr.msrb.gmra.mxu0 %v3604_v61  ;;  %1407 = vmatmul.f32.vlgmr.msrb.gmra.mxu1 %v3604_v61 }
 0x456   :  { %1427 = vmatmul.f32.vlgmr.msrb.gmra.mxu2 %v3604_v61  ;;  %1447 = vmatmul.f32.vlgmr.msrb.gmra.mxu3 %v3604_v61 }
 0x457   :  { %1781 = vmatpush.msrb.mxu1 %v1748_v3  ;;  %1801 = vmatpush.msrb.mxu2 %v1749_v4  ;;  %v1697_v3 = vld [vmem:[#allocation6 + $0x50] sm:$0xff]  ;;  %v1698_v4 = vld [vmem:[#allocation6 + $0x58] sm:$0xff] }
 0x4d2   :  { %v1388_v58 = vpop.f32.mrf.mxu0  ;;  %v1408_v56 = vpop.f32.mrf.mxu1 }
 0x4d3   :  { %v1451_v62 = vadd.f32 %v1388_v58, %v3970_v7  ;;  %v1452_v6 = vadd.f32 %v1408_v56, %v3971_v2  ;;  %v1750_v58 = vld [vmem:[#allocation6 + $0x1f8] sm:$0xff]  ;;  %v1743_v56 = vld [vmem:[#allocation6 + $0x1c0] sm:$0xff]  ;;  %v1744_v7 = vld [vmem:[#allocation6 + $0x1c8] sm:$0xff] }
 0x4d4   :  { %1821 = vmatpush.msrb.mxu3 %v1750_v58  ;;  %1782 = vmatpush.msrb.mxu1 %v1744_v7  ;;  %v1739_v2 = vld [vmem:[#allocation6 + $0x1a0] sm:$0xff]  ;;  %v3976_v58 = vld [vmem:[#allocation67_spill] sm:$0xff] }
 0x4d5   :  { %v2164_v5 = vmul.f32 -1.442695, %v1451_v62  ;;  %v2165_v20 = vmul.f32 -1.442695, %v1452_v6  ;;  %v1746_v62 = vld [vmem:[#allocation6 + $0x1d8] sm:$0xff]  ;;  %v1740_v6 = vld [vmem:[#allocation6 + $0x1a8] sm:$0xff] }
 0x4d6   :  { %1822 = vmatpush.msrb.mxu3 %v1746_v62  ;;  %1783 = vmatpush.msrb.mxu1 %v1740_v6  ;;  %v1691_v7 = vld [vmem:[#allocation6 + $0x20] sm:$0xff]  ;;  %v1693_v62 = vld [vmem:[#allocation6 + $0x30] sm:$0xff] }
 0x4d7   :  { %2285 = vpow2.f32 %v2164_v5  ;;  %v1741_v5 = vld [vmem:[#allocation6 + $0x1b0] sm:$0xff] }
 0x4d8   :  { %2287 = vpow2.f32 %v2165_v20  ;;  %v1742_v20 = vld [vmem:[#allocation6 + $0x1b8] sm:$0xff] }
 0x4d9   :  { %v1448_v36 = vpop.f32.mrf.mxu3  ;;  %v1428_v38 = vpop.f32.mrf.mxu2  ;;  %1823 = vmatpush.msrb.mxu3 %v1742_v20  ;;  %v1688_v20 = vld [vmem:[#allocation6 + $0x8] sm:$0xff] }
 0x4da   :  { %v1454_v9 = vadd.f32 %v1448_v36, %v3972_v63  ;;  %v1453_v35 = vadd.f32 %v1428_v38, %v3973_v18  ;;  %v1735_v36 = vld [vmem:[#allocation6 + $0x180] sm:$0xff]  ;;  %v1736_v63 = vld [vmem:[#allocation6 + $0x188] sm:$0xff] }
 0x4db   :  { %1784 = vmatpush.msrb.mxu1 %v1736_v63  ;;  %v1727_v38 = vld [vmem:[#allocation6 + $0x140] sm:$0xff]  ;;  %v1689_v63 = vld [vmem:[#allocation6 + $0x10] sm:$0xff] }
 0x4dc   :  { %v2166_v10 = vmul.f32 -1.442695, %v1454_v9  ;;  %v1737_v9 = vld [vmem:[#allocation6 + $0x190] sm:$0xff]  ;;  %v1723_v18 = vld [vmem:[#allocation6 + $0x120] sm:$0xff] }
 0x4dd   :  { %v2286_v31 = vpop.eup %2285 }
 0x4de   :  { %v2288_v33 = vpop.eup %2287  ;;  %v1458_v26 = vadd.f32 1.0, %v2286_v31  ;;  %2289 = vpow2.f32 %v2166_v10  ;;  %v1738_v10 = vld [vmem:[#allocation6 + $0x198] sm:$0xff]  ;;  %v1731_v31 = vld [vmem:[#allocation6 + $0x160] sm:$0xff] }
 0x4df   :  { %v1477_v39 = vadd.f32 1.0, %v2288_v33  ;;  %1824 = vmatpush.msrb.mxu3 %v1738_v10  ;;  %v1732_v33 = vld [vmem:[#allocation6 + $0x168] sm:$0xff] }
 0x4e0   :  { %2291 = vrcp.f32 %v1458_v26  ;;  %v1470_v17 = vand.u32 2147483648, %v1458_v26  ;;  %v1468_v12 = vand.u32 2147483647, %v1458_v26  ;;  %vm1464_vm9 = vweird.f32 %v1458_v26  ;;  %1785 = vmatpush.msrb.mxu1 %v1732_v33 }
 0x4e1   :  { %2293 = vrcp.f32 %v1477_v39  ;;  %v1489_v25 = vand.u32 2147483648, %v1477_v39  ;;  %v1487_v21 = vand.u32 2147483647, %v1477_v39  ;;  %vm1483_vm10 = vweird.f32 %v1477_v39 }
 0x4e2   :  { %v1471_v13 = vor.u32 1.1754944e-38, %v1470_v17  ;;  %vm1469_vm13 = vcmp.eq.f32.partialorder %v1468_v12, 8.507059e+37  ;;  %v1722_v17 = vld [vmem:[#allocation6 + $0x118] sm:$0xff]  ;;  %v1717_v12 = vld [vmem:[#allocation6 + $0xf0] sm:$0xff] }
 0x4e3   :  { %v1490_v0 = vor.u32 1.1754944e-38, %v1489_v25  ;;  %vm1488_vm14 = vcmp.eq.f32.partialorder %v1487_v21, 8.507059e+37  ;;  %v1715_v25 = vld [vmem:[#allocation6 + $0xe0] sm:$0xff] }
 0x4e4   :  { %v2290_v23 = vpop.eup %2289 }
 0x4e5   :  { %v1497_v29 = vadd.f32 1.0, %v2290_v23  ;;  %v1728_v23 = vld [vmem:[#allocation6 + $0x148] sm:$0xff] }
 0x4e6   :  { %v2292_v11 = vpop.eup %2291  ;;  %1786 = vmatpush.msrb.mxu1 %v1728_v23 }
 0x4e7   :  { %v2294_v22 = vpop.eup %2293  ;;  %v1460_v28 = vmul.f32 %v2292_v11, %v1458_v26  ;;  %2295 = vrcp.f32 %v1497_v29  ;;  %vm1465_vm7 = vweird.f32 %v2292_v11  ;;  %v1509_v1 = vand.u32 2147483648, %v1497_v29  ;;  %v1733_v26 = vld [vmem:[#allocation6 + $0x170] sm:$0xff] }
 0x4e8   :  { %v1479_v19 = vmul.f32 %v2294_v22, %v1477_v39  ;;  %2297 = vtanh.f32 %v1453_v35  ;;  %vm1484_vm8 = vweird.f32 %v2294_v22  ;;  %vm1466_vm11 = vmor %vm1464_vm9, %vm1465_vm7  ;;  %vm1503_vm1 = vweird.f32 %v1497_v29  ;;  %v1734_v39 = vld [vmem:[#allocation6 + $0x178] sm:$0xff]  ;;  %v1724_v35 = vld [vmem:[#allocation6 + $0x128] sm:$0xff] }
 0x4e9   :  { %v1461_v30 = vsub.f32 1.0, %v1460_v28  ;;  %vm1485_vm12 = vmor %vm1483_vm10, %vm1484_vm8  ;;  %v1507_v8 = vand.u32 2147483647, %v1497_v29  ;;  %v1510_v60 = vor.u32 1.1754944e-38, %v1509_v1  ;;  %1825 = vmatpush.msrb.mxu3 %v1734_v39  ;;  %1787 = vmatpush.msrb.mxu1 %v1724_v35  ;;  %v1726_v28 = vld [vmem:[#allocation6 + $0x138] sm:$0xff] }
 0x4ea   :  { %v1480_v15 = vsub.f32 1.0, %v1479_v19  ;;  %v1719_v19 = vld [vmem:[#allocation6 + $0x100] sm:$0xff]  ;;  %v1706_v1 = vld [vmem:[#allocation6 + $0x98] sm:$0xff] }
 0x4eb   :  { %v1462_v16 = vmul.f32 %v2292_v11, %v1461_v30  ;;  %vm1508_vm3 = vcmp.eq.f32.partialorder %v1507_v8, 8.507059e+37  ;;  %v1720_v30 = vld [vmem:[#allocation6 + $0x108] sm:$0xff]  ;;  %v1699_v8 = vld [vmem:[#allocation6 + $0x60] sm:$0xff] }
 0x4ec   :  { %v1481_v24 = vmul.f32 %v2294_v22, %v1480_v15  ;;  %v1721_v15 = vld [vmem:[#allocation6 + $0x110] sm:$0xff]  ;;  %1788 = vmatpush.msrb.mxu1 %v1720_v30 }
 0x4ed   :  { %v2296_v37 = vpop.eup %2295  ;;  %v1463_v27 = vadd.f32 %v2292_v11, %v1462_v16  ;;  %v1716_v16 = vld [vmem:[#allocation6 + $0xe8] sm:$0xff] }
 0x4ee   :  { %v1482_v32 = vadd.f32 %v2294_v22, %v1481_v24  ;;  %v1499_v14 = vmul.f32 %v2296_v37, %v1497_v29  ;;  %v2298_v41 = vpop.eup %2297  ;;  %vm1504_vm0 = vweird.f32 %v2296_v37  ;;  %v1729_v29 = vld [vmem:[#allocation6 + $0x150] sm:$0xff]  ;;  %1789 = vmatpush.msrb.mxu1 %v1716_v16  ;;  %v1718_v24 = vld [vmem:[#allocation6 + $0xf8] sm:$0xff] }
 0x4ef   :  { %v1467_v40 = vsel %vm1466_vm11, %v2292_v11, %v1463_v27  ;;  %vm1505_vm2 = vmor %vm1503_vm1, %vm1504_vm0  ;;  %v1730_v11 = vld [vmem:[#allocation6 + $0x158] sm:$0xff]  ;;  %v1711_v27 = vld [vmem:[#allocation6 + $0xc0] sm:$0xff] }
 0x4f0   :  { %v1472_v50 = vsel %vm1469_vm13, %v1471_v13, %v1467_v40  ;;  %v1486_v42 = vsel %vm1485_vm12, %v2294_v22, %v1482_v32  ;;  %v1500_v43 = vsub.f32 1.0, %v1499_v14  ;;  %1826 = vmatpush.msrb.mxu3 %v1730_v11  ;;  %v1725_v22 = vld [vmem:[#allocation6 + $0x130] sm:$0xff]  ;;  %v1712_v13 = vld [vmem:[#allocation6 + $0xc8] sm:$0xff]  ;;  %v3974_v14 = vld [vmem:[#allocation64_spill] sm:$0xff] }
 0x4f1   :  { %v1491_v44 = vsel %vm1488_vm14, %v1490_v0, %v1486_v42  ;;  %v1514_v45 = vmul.f32 %v2298_v41, %v1472_v50  ;;  %v1713_v32 = vld [vmem:[#allocation6 + $0xd0] sm:$0xff]  ;;  %v3975_v40 = vld [vmem:[#allocation65_spill] sm:$0xff]  ;;  %1790 = vmatpush.msrb.mxu1 %v1712_v13  ;;  %v1714_v50 = vld [vmem:[#allocation6 + $0xd8] sm:$0xff] }
 0x4f2   :  { %v1513_v48 = vmul.f32 %v1491_v44, %v3601_v57  ;;  %v1501_v49 = vmul.f32 %v2296_v37, %v1500_v43  ;;  %1827 = vmatpush.msrb.mxu3 %v1726_v28  ;;  %v1707_v42 = vld [vmem:[#allocation6 + $0xa0] sm:$0xff]  ;;  %v1708_v43 = vld [vmem:[#allocation6 + $0xa8] sm:$0xff]  ;;  %v1709_v44 = vld [vmem:[#allocation6 + $0xb0] sm:$0xff] }
 0x4f3   :  { %1791 = vmatpush.msrb.mxu1 %v1708_v43 }
 0x4f4   :  { %v1515_v51 = vadd.f32 %v1514_v45, %v1513_v48  ;;  %v1502_v55 = vadd.f32 %v2296_v37, %v1501_v49  ;;  %1828 = vmatpush.msrb.mxu3 %v1722_v17  ;;  %v1710_v48 = vld [vmem:[#allocation6 + $0xb8] sm:$0xff]  ;;  %v1703_v49 = vld [vmem:[#allocation6 + $0x80] sm:$0xff] }
 0x4f6   :  { %2299 = vtanh.f32 %v1515_v51  ;;  %v3616_v54 = vsel %vm1523_vm15, %v1515_v51, %v3601_v57  ;;  %v1506_v34 = vsel %vm1505_vm2, %v2296_v37, %v1502_v55  ;;  %v1747_v57 = vld [vmem:[#allocation6 + $0x1e0] sm:$0xff]  ;;  %1829 = vmatpush.msrb.mxu3 %v1718_v24  ;;  %v1704_v51 = vld [vmem:[#allocation6 + $0x88] sm:$0xff]  ;;  %v1705_v55 = vld [vmem:[#allocation6 + $0x90] sm:$0xff] }
 0x4f7   :  { %v1511_v53 = vsel %vm1508_vm3, %v1510_v60, %v1506_v34  ;;  %1761 = vmatpush.msrb.mxu0 %v1747_v57  ;;  %1792 = vmatpush.msrb.mxu1 %v1704_v51  ;;  %v1700_v34 = vld [vmem:[#allocation6 + $0x68] sm:$0xff]  ;;  %v1701_v60 = vld [vmem:[#allocation6 + $0x70] sm:$0xff] }
 0x4f8   :  { %1830 = vmatpush.msrb.mxu3 %v1714_v50  ;;  %v1696_v57 = vld [vmem:[#allocation6 + $0x48] sm:$0xff] }
 0x4f9   :  { %1762 = vmatpush.msrb.mxu0 %v1743_v56  ;;  %1793 = vmatpush.msrb.mxu1 %v1700_v34 }
 0x4fa   :  { %1831 = vmatpush.msrb.mxu3 %v1710_v48 }
 0x4fb   :  { %1763 = vmatpush.msrb.mxu0 %v1739_v2  ;;  %1794 = vmatpush.msrb.mxu1 %v1696_v57  ;;  %v1694_v2 = vld [vmem:[#allocation6 + $0x38] sm:$0xff]  ;;  %v1931_v57 = vld [vmem:[#allocation8 + $0x70] sm:$0xff] }
 0x4fc   :  { %v2300_v52 = vpop.eup %2299  ;;  %1832 = vmatpush.msrb.mxu3 %v1706_v1 }
 0x4fd   :  { %v1517_v47 = vmul.f32 %v2300_v52, %v1511_v53  ;;  %1764 = vmatpush.msrb.mxu0 %v1735_v36  ;;  %v1702_v52 = vld [vmem:[#allocation6 + $0x78] sm:$0xff]  ;;  %v1695_v53 = vld [vmem:[#allocation6 + $0x40] sm:$0xff] }
 0x4fe   :  { %1833 = vmatpush.msrb.mxu3 %v1702_v52 }
 0x4ff   :  { %v3619_v59 = vsel %vm1523_vm15, %v1517_v47, %v3604_v61  ;;  %v1745_v61 = vld [vmem:[#allocation6 + $0x1d0] sm:$0xff]  ;;  %1765 = vmatpush.msrb.mxu0 %v1731_v31 }
 0x500   :  { %1549 = vmatmul.f32.vlgmr.msra.gmra.mxu0 %v3619_v59  ;;  %1569 = vmatmul.f32.vlgmr.msra.gmra.mxu1 %v3619_v59 }
 0x501   :  { %1589 = vmatmul.f32.vlgmr.msra.gmra.mxu2 %v3619_v59  ;;  %1609 = vmatmul.f32.vlgmr.msra.gmra.mxu3 %v3619_v59 }
 0x502   :  { %1802 = vmatpush.msrb.mxu2 %v1745_v61  ;;  %1766 = vmatpush.msrb.mxu0 %v1727_v38  ;;  %v1692_v61 = vld [vmem:[#allocation6 + $0x28] sm:$0xff] }
 0x503   :  { %1834 = vmatpush.msrb.mxu3 %v1698_v4  ;;  %1795 = vmatpush.msrb.mxu1 %v1692_v61  ;;  %v1930_v4 = vld [vmem:[#allocation8 + $0x68] sm:$0xff]  ;;  %v1964_v61 = vld [vmem:[#allocation8 + $0x178] sm:$0xff] }
 0x504   :  { %1803 = vmatpush.msrb.mxu2 %v1741_v5  ;;  %1767 = vmatpush.msrb.mxu0 %v1723_v18  ;;  %v1687_v5 = vld [vmem:[#allocation6] sm:$0xff] }
 0x505   :  { %1835 = vmatpush.msrb.mxu3 %v1694_v2  ;;  %1796 = vmatpush.msrb.mxu1 %v1688_v20  ;;  %v1944_v2 = vld [vmem:[#allocation8 + $0xd8] sm:$0xff]  ;;  %v1927_v20 = vld [vmem:[#allocation8 + $0x50] sm:$0xff] }
 0x506   :  { %1804 = vmatpush.msrb.mxu2 %v1737_v9  ;;  %1768 = vmatpush.msrb.mxu0 %v1719_v19  ;;  %v1690_v9 = vld [vmem:[#allocation6 + $0x18] sm:$0xff] }
 0x507   :  { %1836 = vmatpush.msrb.mxu3 %v1690_v9  ;;  %v1978_v9 = vld [vmem:[#allocation8 + $0x1e8] sm:$0xff] }
 0x508   :  { %1805 = vmatpush.msrb.mxu2 %v1733_v26  ;;  %1769 = vmatpush.msrb.mxu0 %v1715_v25 }
 0x50a   :  { %1806 = vmatpush.msrb.mxu2 %v1729_v29  ;;  %1770 = vmatpush.msrb.mxu0 %v1711_v27  ;;  %v3977_v29 = vld [vmem:[#allocation66_spill] sm:$0xff] }
 0x50c   :  { %1807 = vmatpush.msrb.mxu2 %v1725_v22  ;;  %1771 = vmatpush.msrb.mxu0 %v1707_v42 }
 0x50e   :  { %1808 = vmatpush.msrb.mxu2 %v1721_v15  ;;  %1772 = vmatpush.msrb.mxu0 %v1703_v49 }
 0x510   :  { %1809 = vmatpush.msrb.mxu2 %v1717_v12  ;;  %1773 = vmatpush.msrb.mxu0 %v1699_v8  ;;  %v1684_v8 = vpop.permute.xlu1 %1683 }
 0x511   :  { %vm1685_vm0 = vcmp.eq.s32.totalorder %v1684_v8, 1  ;;  %v1952_v8 = vld [vmem:[#allocation8 + $0x118] sm:$0xff] }
 0x512   :  { %1810 = vmatpush.msrb.mxu2 %v1713_v32  ;;  %1774 = vmatpush.msrb.mxu0 %v1695_v53 }
 0x514   :  { %1811 = vmatpush.msrb.mxu2 %v1709_v44  ;;  %1775 = vmatpush.msrb.mxu0 %v1691_v7  ;;  %v1945_v7 = vld [vmem:[#allocation8 + $0xe0] sm:$0xff] }
 0x516   :  { %1812 = vmatpush.msrb.mxu2 %v1705_v55  ;;  %1776 = vmatpush.msrb.mxu0 %v1687_v5  ;;  %v1979_v5 = vld [vmem:[#allocation8 + $0x1f0] sm:$0xff] }
 0x518   :  { %1813 = vmatpush.msrb.mxu2 %v1701_v60 }
 0x51a   :  { %1814 = vmatpush.msrb.mxu2 %v1697_v3  ;;  %v1947_v3 = vld [vmem:[#allocation8 + $0xf0] sm:$0xff] }
 0x51c   :  { %1815 = vmatpush.msrb.mxu2 %v1693_v62  ;;  %v1928_v62 = vld [vmem:[#allocation8 + $0x58] sm:$0xff] }
 0x51e   :  { %1816 = vmatpush.msrb.mxu2 %v1689_v63  ;;  %v1962_v63 = vld [vmem:[#allocation8 + $0x168] sm:$0xff] }
 0x520   :  { %2025 = vmatpush.msra.mxu2 %v1964_v61 }
 0x57d   :  { %v1550_v21 = vpop.f32.mrf.mxu0  ;;  %v1570_v37 = vpop.f32.mrf.mxu1 }
 0x57e   :  { %v1613_v0 = vadd.f32 %v1550_v21, %v3974_v14  ;;  %v1614_v41 = vadd.f32 %v1570_v37, %v3975_v40 }
 0x580   :  { %v2167_v45 = vmul.f32 -1.442695, %v1613_v0  ;;  %v2168_v46 = vmul.f32 -1.442695, %v1614_v41 }
 0x582   :  { %2301 = vpow2.f32 %v2167_v45 }
 0x583   :  { %2303 = vpow2.f32 %v2168_v46 }
 0x584   :  { %v1610_v47 = vpop.f32.mrf.mxu3  ;;  %v1590_v26 = vpop.f32.mrf.mxu2 }
 0x585   :  { %v1616_v56 = vadd.f32 %v1610_v47, %v3976_v58  ;;  %v1615_v11 = vadd.f32 %v1590_v26, %v3977_v29  ;;  %v1948_v47 = vld [vmem:[#allocation8 + $0xf8] sm:$0xff]  ;;  %v1946_v58 = vld [vmem:[#allocation8 + $0xe8] sm:$0xff]  ;;  %v1977_v26 = vld [vmem:[#allocation8 + $0x1e0] sm:$0xff] }
 0x586   :  { %2005 = vmatpush.msra.mxu1 %v1948_v47  ;;  %v1976_v29 = vld [vmem:[#allocation8 + $0x1d8] sm:$0xff] }
 0x587   :  { %v2169_v6 = vmul.f32 -1.442695, %v1616_v56  ;;  %v1929_v56 = vld [vmem:[#allocation8 + $0x60] sm:$0xff] }
 0x588   :  { %v2302_v36 = vpop.eup %2301  ;;  %2006 = vmatpush.msra.mxu1 %v1947_v3  ;;  %v1950_v3 = vld [vmem:[#allocation8 + $0x108] sm:$0xff] }
 0x589   :  { %v2304_v10 = vpop.eup %2303  ;;  %v1620_v31 = vadd.f32 1.0, %v2302_v36  ;;  %2305 = vpow2.f32 %v2169_v6  ;;  %v1963_v6 = vld [vmem:[#allocation8 + $0x170] sm:$0xff] }
 0x58a   :  { %v1639_v33 = vadd.f32 1.0, %v2304_v10  ;;  %2007 = vmatpush.msra.mxu1 %v1946_v58  ;;  %2026 = vmatpush.msra.mxu2 %v1963_v6  ;;  %v1943_v36 = vld [vmem:[#allocation8 + $0xd0] sm:$0xff]  ;;  %v1926_v10 = vld [vmem:[#allocation8 + $0x48] sm:$0xff] }
 0x58b   :  { %2307 = vrcp.f32 %v1620_v31  ;;  %v1632_v30 = vand.u32 2147483648, %v1620_v31  ;;  %v1630_v25 = vand.u32 2147483647, %v1620_v31  ;;  %vm1626_vm6 = vweird.f32 %v1620_v31 }
 0x58c   :  { %2309 = vrcp.f32 %v1639_v33  ;;  %v1651_v15 = vand.u32 2147483648, %v1639_v33  ;;  %v1649_v12 = vand.u32 2147483647, %v1639_v33  ;;  %vm1645_vm7 = vweird.f32 %v1639_v33  ;;  %2008 = vmatpush.msra.mxu1 %v1945_v7  ;;  %2027 = vmatpush.msra.mxu2 %v1962_v63 }
 0x58d   :  { %v1633_v37 = vor.u32 1.1754944e-38, %v1632_v30  ;;  %vm1631_vm10 = vcmp.eq.f32.partialorder %v1630_v25, 8.507059e+37  ;;  %v1958_v30 = vld [vmem:[#allocation8 + $0x148] sm:$0xff] }
 0x58e   :  { %v1652_v32 = vor.u32 1.1754944e-38, %v1651_v15  ;;  %vm1650_vm11 = vcmp.eq.f32.partialorder %v1649_v12, 8.507059e+37  ;;  %2009 = vmatpush.msra.mxu1 %v1944_v2  ;;  %v1974_v15 = vld [vmem:[#allocation8 + $0x1c8] sm:$0xff]  ;;  %v1973_v12 = vld [vmem:[#allocation8 + $0x1c0] sm:$0xff] }
 0x58f   :  { %v2306_v39 = vpop.eup %2305  ;;  %v1938_v25 = vld [vmem:[#allocation8 + $0xa8] sm:$0xff] }
 0x590   :  { %v1659_v38 = vadd.f32 1.0, %v2306_v39  ;;  %2010 = vmatpush.msra.mxu1 %v1943_v36  ;;  %v1925_v39 = vld [vmem:[#allocation8 + $0x40] sm:$0xff] }
 0x591   :  { %v2308_v23 = vpop.eup %2307 }
 0x592   :  { %v2310_v18 = vpop.eup %2309  ;;  %v1622_v35 = vmul.f32 %v2308_v23, %v1620_v31  ;;  %2311 = vrcp.f32 %v1659_v38  ;;  %vm1627_vm4 = vweird.f32 %v2308_v23  ;;  %v1671_v49 = vand.u32 2147483648, %v1659_v38  ;;  %v1942_v31 = vld [vmem:[#allocation8 + $0xc8] sm:$0xff] }
 0x593   :  { %v1641_v22 = vmul.f32 %v2310_v18, %v1639_v33  ;;  %2313 = vtanh.f32 %v1615_v11  ;;  %vm1646_vm5 = vweird.f32 %v2310_v18  ;;  %vm1628_vm8 = vmor %vm1626_vm6, %vm1627_vm4  ;;  %vm1665_vm13 = vweird.f32 %v1659_v38  ;;  %v1961_v33 = vld [vmem:[#allocation8 + $0x160] sm:$0xff]  ;;  %2011 = vmatpush.msra.mxu1 %v1942_v31  ;;  %v1924_v11 = vld [vmem:[#allocation8 + $0x38] sm:$0xff] }
 0x594   :  { %v1623_v28 = vsub.f32 1.0, %v1622_v35  ;;  %vm1647_vm9 = vmor %vm1645_vm7, %vm1646_vm5  ;;  %v1669_v51 = vand.u32 2147483647, %v1659_v38  ;;  %v1672_v1 = vor.u32 1.1754944e-38, %v1671_v49  ;;  %2028 = vmatpush.msra.mxu2 %v1961_v33  ;;  %v1959_v35 = vld [vmem:[#allocation8 + $0x150] sm:$0xff] }
 0x595   :  { %v1642_v19 = vsub.f32 1.0, %v1641_v22  ;;  %v1975_v22 = vld [vmem:[#allocation8 + $0x1d0] sm:$0xff] }
 0x596   :  { %v1624_v17 = vmul.f32 %v2308_v23, %v1623_v28  ;;  %vm1670_vm15 = vcmp.eq.f32.partialorder %v1669_v51, 8.507059e+37  ;;  %v1923_v28 = vld [vmem:[#allocation8 + $0x30] sm:$0xff] }
 0x597   :  { %v1643_v16 = vmul.f32 %v2310_v18, %v1642_v19  ;;  %v1939_v19 = vld [vmem:[#allocation8 + $0xb0] sm:$0xff] }
 0x598   :  { %v2312_v24 = vpop.eup %2311  ;;  %v1625_v21 = vadd.f32 %v2308_v23, %v1624_v17  ;;  %v1922_v17 = vld [vmem:[#allocation8 + $0x28] sm:$0xff] }
 0x599   :  { %v1644_v27 = vadd.f32 %v2310_v18, %v1643_v16  ;;  %v1661_v13 = vmul.f32 %v2312_v24, %v1659_v38  ;;  %v2314_v0 = vpop.eup %2313  ;;  %vm1666_vm12 = vweird.f32 %v2312_v24  ;;  %v1941_v38 = vld [vmem:[#allocation8 + $0xc0] sm:$0xff] }
 0x59a   :  { %v1629_v14 = vsel %vm1628_vm8, %v2308_v23, %v1625_v21  ;;  %vm1667_vm14 = vmor %vm1665_vm13, %vm1666_vm12  ;;  %v1960_v23 = vld [vmem:[#allocation8 + $0x158] sm:$0xff]  ;;  %2012 = vmatpush.msra.mxu1 %v1941_v38  ;;  %v1957_v16 = vld [vmem:[#allocation8 + $0x140] sm:$0xff] }
 0x59b   :  { %v1634_v40 = vsel %vm1631_vm10, %v1633_v37, %v1629_v14  ;;  %v1648_v41 = vsel %vm1647_vm9, %v2310_v18, %v1644_v27  ;;  %v1662_v50 = vsub.f32 1.0, %v1661_v13  ;;  %2029 = vmatpush.msra.mxu2 %v1960_v23  ;;  %v1940_v18 = vld [vmem:[#allocation8 + $0xb8] sm:$0xff]  ;;  %v1937_v21 = vld [vmem:[#allocation8 + $0xa0] sm:$0xff]  ;;  %v1955_v14 = vld [vmem:[#allocation8 + $0x130] sm:$0xff] }
 0x59c   :  { %v1653_v42 = vsel %vm1650_vm11, %v1652_v32, %v1648_v41  ;;  %v1676_v43 = vmul.f32 %v2314_v0, %v1634_v40  ;;  %2013 = vmatpush.msra.mxu1 %v1940_v18  ;;  %v1956_v37 = vld [vmem:[#allocation8 + $0x138] sm:$0xff]  ;;  %v1971_v0 = vld [vmem:[#allocation8 + $0x1b0] sm:$0xff] }
 0x59d   :  { %v1675_v44 = vmul.f32 %v1653_v42, %v3616_v54  ;;  %v1663_v45 = vmul.f32 %v2312_v24, %v1662_v50  ;;  %v1932_v54 = vld [vmem:[#allocation8 + $0x78] sm:$0xff]  ;;  %2030 = vmatpush.msra.mxu2 %v1959_v35  ;;  %v1919_v40 = vld [vmem:[#allocation8 + $0x10] sm:$0xff]  ;;  %v1751_v50 = vld [vmem:[%s3646_s6] sm:$0xf] }
 0x59e   :  { %1985 = vmatpush.msra.mxu0 %v1932_v54  ;;  %2014 = vmatpush.msra.mxu1 %v1939_v19  ;;  %v1972_v27 = vld [vmem:[#allocation8 + $0x1b8] sm:$0xff]  ;;  %v1935_v41 = vld [vmem:[#allocation8 + $0x90] sm:$0xff]  ;;  %v1954_v42 = vld [vmem:[#allocation8 + $0x128] sm:$0xff]  ;;  %v1753_v49 = vperm.slane %v1751_v50, 0  ;;  %v1754_v51 = vperm.slane %v1751_v50, 1  ;;  %v1755_v7 = vperm.slane %v1751_v50, 2 }
 0x59f   :  { %v1677_v46 = vadd.f32 %v1676_v43, %v1675_v44  ;;  %v1664_v48 = vadd.f32 %v2312_v24, %v1663_v45  ;;  %2031 = vmatpush.msra.mxu2 %v1958_v30  ;;  %v1920_v13 = vld [vmem:[#allocation8 + $0x18] sm:$0xff]  ;;  %v1970_v43 = vld [vmem:[#allocation8 + $0x1a8] sm:$0xff]  ;;  %v1967_v54 = vld [vmem:[#allocation8 + $0x190] sm:$0xff]  ;;  %v1756_v61 = vperm.slane %v1751_v50, 3 }
 0x5a0   :  { %1986 = vmatpush.msra.mxu0 %v1931_v57  ;;  %2015 = vmatpush.msra.mxu1 %v1938_v25  ;;  %v1936_v32 = vld [vmem:[#allocation8 + $0x98] sm:$0xff]  ;;  %v1918_v44 = vld [vmem:[#allocation8 + $0x8] sm:$0xff] }
 0x5a1   :  { %2315 = vtanh.f32 %v1677_v46  ;;  %v1668_v55 = vsel %vm1667_vm14, %v2312_v24, %v1664_v48  ;;  %v1921_v24 = vld [vmem:[#allocation8 + $0x20] sm:$0xff]  ;;  %2032 = vmatpush.msra.mxu2 %v1957_v16  ;;  %v1934_v45 = vld [vmem:[#allocation8 + $0x88] sm:$0xff] }
 0x5a2   :  { %v1673_v60 = vsel %vm1670_vm15, %v1672_v1, %v1668_v55  ;;  %1987 = vmatpush.msra.mxu0 %v1930_v4  ;;  %2016 = vmatpush.msra.mxu1 %v1937_v21  ;;  %v1953_v46 = vld [vmem:[#allocation8 + $0x120] sm:$0xff]  ;;  %v1966_v4 = vld [vmem:[#allocation8 + $0x188] sm:$0xff] }
 0x5a3   :  { %2033 = vmatpush.msra.mxu2 %v1956_v37  ;;  %v1969_v48 = vld [vmem:[#allocation8 + $0x1a0] sm:$0xff] }
 0x5a4   :  { %1988 = vmatpush.msra.mxu0 %v1929_v56  ;;  %2017 = vmatpush.msra.mxu1 %v1936_v32  ;;  %v1917_v55 = vld [vmem:[#allocation8] sm:$0xff] }
 0x5a5   :  { %2034 = vmatpush.msra.mxu2 %v1955_v14  ;;  %v1933_v1 = vld [vmem:[#allocation8 + $0x80] sm:$0xff] }
 0x5a6   :  { %1989 = vmatpush.msra.mxu0 %v1928_v62  ;;  %2018 = vmatpush.msra.mxu1 %v1935_v41  ;;  %v1965_v62 = vld [vmem:[#allocation8 + $0x180] sm:$0xff] }
 0x5a7   :  { %v2316_v34 = vpop.eup %2315  ;;  %2035 = vmatpush.msra.mxu2 %v1954_v42 }
 0x5a8   :  { %v1679_v52 = vmul.f32 %v2316_v34, %v1673_v60  ;;  %1990 = vmatpush.msra.mxu0 %v1927_v20  ;;  %2019 = vmatpush.msra.mxu1 %v1934_v45  ;;  %v1968_v34 = vld [vmem:[#allocation8 + $0x198] sm:$0xff] }
 0x5a9   :  { %2036 = vmatpush.msra.mxu2 %v1953_v46 }
 0x5aa   :  { %v1686_v53 = vsel %vm1685_vm0, %v1679_v52, %v3619_v59  ;;  %v1980_v59 = vld [vmem:[#allocation8 + $0x1f8] sm:$0xff]  ;;  %1991 = vmatpush.msra.mxu0 %v1926_v10  ;;  %2020 = vmatpush.msra.mxu1 %v1933_v1 }
 0x5ab   :  { %1777 = vmatmul.f32.vlgmr.msrb.gmra.mxu0 %v1686_v53  ;;  %1797 = vmatmul.f32.vlgmr.msrb.gmra.mxu1 %v1686_v53 }
 0x5ac   :  { %1817 = vmatmul.f32.vlgmr.msrb.gmra.mxu2 %v1686_v53  ;;  %1837 = vmatmul.f32.vlgmr.msrb.gmra.mxu3 %v1686_v53  ;;  %v1951_v53 = vld [vmem:[#allocation8 + $0x110] sm:$0xff] }
 0x5ad   :  { %2045 = vmatpush.msra.mxu3 %v1980_v59  ;;  %1992 = vmatpush.msra.mxu0 %v1925_v39  ;;  %v1949_v59 = vld [vmem:[#allocation8 + $0x100] sm:$0xff] }
 0x5ae   :  { %2037 = vmatpush.msra.mxu2 %v1952_v8 }
 0x5af   :  { %2046 = vmatpush.msra.mxu3 %v1979_v5  ;;  %1993 = vmatpush.msra.mxu0 %v1924_v11 }
 0x5b0   :  { %2038 = vmatpush.msra.mxu2 %v1951_v53 }
 0x5b1   :  { %2047 = vmatpush.msra.mxu3 %v1978_v9  ;;  %1994 = vmatpush.msra.mxu0 %v1923_v28 }
 0x5b2   :  { %2039 = vmatpush.msra.mxu2 %v1950_v3 }
 0x5b3   :  { %2048 = vmatpush.msra.mxu3 %v1977_v26  ;;  %1995 = vmatpush.msra.mxu0 %v1922_v17 }
 0x5b4   :  { %2040 = vmatpush.msra.mxu2 %v1949_v59 }
 0x5b5   :  { %2049 = vmatpush.msra.mxu3 %v1976_v29  ;;  %1996 = vmatpush.msra.mxu0 %v1921_v24 }
 0x5b7   :  { %2050 = vmatpush.msra.mxu3 %v1975_v22  ;;  %1997 = vmatpush.msra.mxu0 %v1920_v13 }
 0x5b9   :  { %2051 = vmatpush.msra.mxu3 %v1974_v15  ;;  %1998 = vmatpush.msra.mxu0 %v1919_v40 }
 0x5bb   :  { %2052 = vmatpush.msra.mxu3 %v1973_v12  ;;  %1999 = vmatpush.msra.mxu0 %v1918_v44 }
 0x5bd   :  { %2053 = vmatpush.msra.mxu3 %v1972_v27  ;;  %2000 = vmatpush.msra.mxu0 %v1917_v55 }
 0x5bf   :  { %2054 = vmatpush.msra.mxu3 %v1971_v0 }
 0x5c1   :  { %2055 = vmatpush.msra.mxu3 %v1970_v43 }
 0x5c3   :  { %2056 = vmatpush.msra.mxu3 %v1969_v48 }
 0x5c5   :  { %2057 = vmatpush.msra.mxu3 %v1968_v34 }
 0x5c7   :  { %2058 = vmatpush.msra.mxu3 %v1967_v54 }
 0x5c9   :  { %2059 = vmatpush.msra.mxu3 %v1966_v4 }
 0x5cb   :  { %2060 = vmatpush.msra.mxu3 %v1965_v62 }
 0x628   :  { %v1778_v60 = vpop.f32.mrf.mxu0  ;;  %v1798_v52 = vpop.f32.mrf.mxu1 }
 0x629   :  { %v1779_v47 = vadd.f32 %v1778_v60, %v1753_v49  ;;  %v1799_v57 = vadd.f32 %v1798_v52, %v1754_v51 }
 0x62b   :  { %v2170_v58 = vmul.f32 -1.442695, %v1779_v47  ;;  %v2171_v56 = vmul.f32 -1.442695, %v1799_v57  ;;  %v2188_v47 = vld [vmem:[%s3648_s8] ss:$0 sm:$0xff] }
 0x62c   :  { %s2513_s8 = smov [#allocation9]  }
 0x62d   :  { %2317 = vpow2.f32 %v2170_v58  ;;  %s2090_s17 = sshll.u32 %s2513_s8, 4  ;;  %s2091_s17 = int_to_ptr.vmem [resolvable:$true] %s2090_s17 }
 0x62e   :  { %2319 = vpow2.f32 %v2171_v56 }
 0x62f   :  { %v1818_v2 = vpop.f32.mrf.mxu2  ;;  %v1838_v6 = vpop.f32.mrf.mxu3 }
 0x630   :  { %v1819_v5 = vadd.f32 %v1818_v2, %v1755_v7  ;;  %v1839_v20 = vadd.f32 %v1838_v6, %v1756_v61 }
 0x632   :  { %v2172_v36 = vmul.f32 -1.442695, %v1819_v5  ;;  %v2173_v63 = vmul.f32 -1.442695, %v1839_v20 }
 0x633   :  { %v2318_v9 = vpop.eup %2317 }
 0x634   :  { %v2320_v10 = vpop.eup %2319  ;;  %v1853_v31 = vadd.f32 1.0, %v2318_v9  ;;  %2321 = vpow2.f32 %v2172_v36 }
 0x635   :  { %v1854_v33 = vadd.f32 1.0, %v2320_v10  ;;  %2323 = vpow2.f32 %v2173_v63 }
 0x636   :  { %2325 = vrcp.f32 %v1853_v31  ;;  %v1868_v28 = vand.u32 2147483648, %v1853_v31  ;;  %v1866_v15 = vand.u32 2147483647, %v1853_v31  ;;  %vm1862_vm3 = vweird.f32 %v1853_v31 }
 0x637   :  { %2327 = vrcp.f32 %v1854_v33  ;;  %v1883_v17 = vand.u32 2147483648, %v1854_v33  ;;  %v1881_v16 = vand.u32 2147483647, %v1854_v33  ;;  %vm1877_vm5 = vweird.f32 %v1854_v33 }
 0x638   :  { %v1869_v37 = vor.u32 1.1754944e-38, %v1868_v28  ;;  %vm1867_vm6 = vcmp.eq.f32.partialorder %v1866_v15, 8.507059e+37 }
 0x639   :  { %v1884_v14 = vor.u32 1.1754944e-38, %v1883_v17  ;;  %vm1882_vm8 = vcmp.eq.f32.partialorder %v1881_v16, 8.507059e+37 }
 0x63a   :  { %v2322_v26 = vpop.eup %2321 }
 0x63b   :  { %v2324_v39 = vpop.eup %2323  ;;  %v1855_v38 = vadd.f32 1.0, %v2322_v26 }
 0x63c   :  { %v2326_v23 = vpop.eup %2325  ;;  %v1856_v29 = vadd.f32 1.0, %v2324_v39 }
 0x63d   :  { %v2328_v11 = vpop.eup %2327  ;;  %2329 = vrcp.f32 %v1855_v38  ;;  %v1858_v18 = vmul.f32 %v2326_v23, %v1853_v31  ;;  %vm1863_vm1 = vweird.f32 %v2326_v23  ;;  %v1898_v43 = vand.u32 2147483648, %v1855_v38 }
 0x63e   :  { %2331 = vrcp.f32 %v1856_v29  ;;  %v1873_v35 = vmul.f32 %v2328_v11, %v1854_v33  ;;  %vm1878_vm2 = vweird.f32 %v2328_v11  ;;  %vm1864_vm4 = vmor %vm1862_vm3, %vm1863_vm1  ;;  %v1896_v46 = vand.u32 2147483647, %v1855_v38 }
 0x63f   :  { %v1859_v22 = vsub.f32 1.0, %v1858_v18  ;;  %vm1879_vm7 = vmor %vm1877_vm5, %vm1878_vm2  ;;  %v1913_v48 = vand.u32 2147483648, %v1856_v29  ;;  %v1911_v51 = vand.u32 2147483647, %v1856_v29  ;;  %vm1892_vm11 = vweird.f32 %v1855_v38 }
 0x640   :  { %v1874_v19 = vsub.f32 1.0, %v1873_v35  ;;  %v1899_v1 = vor.u32 1.1754944e-38, %v1898_v43  ;;  %vm1907_vm13 = vweird.f32 %v1856_v29  ;;  %vm1897_vm14 = vcmp.eq.f32.partialorder %v1896_v46, 8.507059e+37 }
 0x641   :  { %v1860_v30 = vmul.f32 %v2326_v23, %v1859_v22  ;;  %v1914_v60 = vor.u32 1.1754944e-38, %v1913_v48  ;;  %vm1912_vm0 = vcmp.eq.f32.partialorder %v1911_v51, 8.507059e+37 }
 0x642   :  { %v1875_v25 = vmul.f32 %v2328_v11, %v1874_v19 }
 0x643   :  { %v2330_v12 = vpop.eup %2329  ;;  %v1861_v24 = vadd.f32 %v2326_v23, %v1860_v30 }
 0x644   :  { %v2332_v21 = vpop.eup %2331  ;;  %v1876_v27 = vadd.f32 %v2328_v11, %v1875_v25  ;;  %v1888_v13 = vmul.f32 %v2330_v12, %v1855_v38  ;;  %vm1893_vm9 = vweird.f32 %v2330_v12 }
 0x645   :  { %v1865_v32 = vsel %vm1864_vm4, %v2326_v23, %v1861_v24  ;;  %v1903_v0 = vmul.f32 %v2332_v21, %v1856_v29  ;;  %vm1908_vm10 = vweird.f32 %v2332_v21  ;;  %vm1894_vm12 = vmor %vm1892_vm11, %vm1893_vm9 }
 0x646   :  { %v1870_v40 = vsel %vm1867_vm6, %v1869_v37, %v1865_v32  ;;  %v1880_v41 = vsel %vm1879_vm7, %v2328_v11, %v1876_v27  ;;  %v1889_v50 = vsub.f32 1.0, %v1888_v13  ;;  %vm1909_vm15 = vmor %vm1907_vm13, %vm1908_vm10 }
 0x647   :  { %2001 = vmatmul.f32.vlgmr.msra.gmra.mxu0 %v1870_v40  ;;  %v1885_v42 = vsel %vm1882_vm8, %v1884_v14, %v1880_v41  ;;  %v1904_v44 = vsub.f32 1.0, %v1903_v0 }
 0x648   :  { %2021 = vmatmul.f32.vlgmr.msra.gmra.mxu1 %v1885_v42  ;;  %v1890_v45 = vmul.f32 %v2330_v12, %v1889_v50 }
 0x649   :  { %v1905_v49 = vmul.f32 %v2332_v21, %v1904_v44 }
 0x64a   :  { %v1891_v55 = vadd.f32 %v2330_v12, %v1890_v45 }
 0x64b   :  { %v1906_v8 = vadd.f32 %v2332_v21, %v1905_v49 }
 0x64c   :  { %v1895_v34 = vsel %vm1894_vm12, %v2330_v12, %v1891_v55 }
 0x64d   :  { %v1900_v52 = vsel %vm1897_vm14, %v1899_v1, %v1895_v34  ;;  %v1910_v53 = vsel %vm1909_vm15, %v2332_v21, %v1906_v8 }
 0x64e   :  { %2041 = vmatmul.f32.vlgmr.msra.gmra.mxu2 %v1900_v52  ;;  %v1915_v54 = vsel %vm1912_vm0, %v1914_v60, %v1910_v53 }
 0x64f   :  { %2061 = vmatmul.f32.vlgmr.msra.gmra.mxu3 %v1915_v54 }
 0x6c4   :  { %v2002_v57 = vpop.f32.mrf.mxu0 }
 0x6c5   :  { %v2003_v3 = vadd.f32 %v2188_v47, %v2002_v57  ;;  %v2022_v4 = vpop.f32.mrf.mxu1 }
 0x6c7   :  { %v2023_v58 = vadd.f32 %v2022_v4, %v2003_v3 }
 0x6d1   :  { %v2042_v56 = vpop.f32.mrf.mxu2 }
 0x6d2   :  { %v2043_v7 = vadd.f32 %v2042_v56, %v2023_v58  ;;  %v2062_v61 = vpop.f32.mrf.mxu3 }
 0x6d4   :  { %v2063_v59 = vadd.f32 %v2062_v61, %v2043_v7 }
 0x6d6   :  { %v2174_v62 = vmul.f32 -1.442695, %v2063_v59 }
 0x6d8   :  { %2333 = vpow2.f32 %v2174_v62 }
 0x6de   :  { %v2334_v2 = vpop.eup %2333 }
 0x6df   :  { %v2068_v6 = vadd.f32 1.0, %v2334_v2 }
 0x6e1   :  { %2335 = vrcp.f32 %v2068_v6  ;;  %v2080_v63 = vand.u32 2147483648, %v2068_v6  ;;  %v2078_v10 = vand.u32 2147483647, %v2068_v6  ;;  %vm2074_vm2 = vweird.f32 %v2068_v6 }
 0x6e3   :  { %v2081_v33 = vor.u32 1.1754944e-38, %v2080_v63  ;;  %vm2079_vm4 = vcmp.eq.f32.partialorder %v2078_v10, 8.507059e+37 }
 0x6e7   :  { %v2336_v5 = vpop.eup %2335 }
 0x6e8   :  { %v2070_v20 = vmul.f32 %v2336_v5, %v2068_v6  ;;  %vm2075_vm1 = vweird.f32 %v2336_v5 }
 0x6e9   :  { %vm2076_vm3 = vmor %vm2074_vm2, %vm2075_vm1 }
 0x6ea   :  { %v2071_v36 = vsub.f32 1.0, %v2070_v20 }
 0x6ec   :  { %v2072_v9 = vmul.f32 %v2336_v5, %v2071_v36 }
 0x6ee   :  { %v2073_v31 = vadd.f32 %v2336_v5, %v2072_v9 }
 0x6f0   :  { %v2077_v26 = vsel %vm2076_vm3, %v2336_v5, %v2073_v31 }
 0x6f1   :  { %v2082_v39 = vsel %vm2079_vm4, %v2081_v33, %v2077_v26 }
 0x6f2   :  { %2084 = vst [vmem:[#allocation9] sm:$0xff] %v2082_v39 }
 0x6f3   :  { %2095 = dma.vmem_to_hbm [thread:$0]  %s2091_s17, 128, %s2093_s20, [#allocation5]  }
 0x6f4   :  { %2502 = dma.done.wait [#allocation5], 128  }
 0x6f5   :  { %2503 = vsyncadd [#allocation5], 4294967168 }
 0x6f6   :  { %2100 = vsyncpa [#allocation4], 1 }
 0x6f7   :  { %2101 = vsyncpa [#allocation7], 1 }
 0x6f8   :  { %2102 = vsyncpa [#allocation5], 1 }

</bundles_post_ra>
